<compile_context>
chip_gen: v6e
topology: v6e:2x2x1
jax: 0.10.0
libtpu: 0.0.40
codegen_flags: <defaults>
</compile_context>

<pallas_src>
import math

import jax
import jax.numpy as jnp
from jax import lax
from jax.experimental import pallas as pl
from jax.experimental.pallas import tpu as pltpu

BN_EPS = 1e-5  # nn.BatchNorm3d default
_VMEM_LIMIT = 32 * 1024 * 1024  # safe on v5e/v6e/v7x, above the v5e default


# ----------------------------------------------------------------------------
# Pass 1 kernel: fused Conv3d (all units of a layer) + per-tile BN partials.
#   xm/x0/xp1 : (1, H+2, W+2, Cin)  the three padded depth slabs for this step
#   w_ref     : (27, Cin, Ctot)     fused conv weights (tap-major)
#   conv_ref  : (1, 1, H*W, Ctot)   conv output tile (pre-BN)
#   stats_ref : (1, 1, 2, Ctot)     [sum, sum-of-squares] per channel, this tile
# ----------------------------------------------------------------------------
def conv_stats_kernel(xm_ref, x0_ref, xp1_ref, w_ref, conv_ref, stats_ref):
    _, hp2, wp2, cin = x0_ref.shape
    H, W = hp2 - 2, wp2 - 2
    ctot = conv_ref.shape[-1]

    slabs = (
        xm_ref[0, :, :, :],   # padded depth d
        x0_ref[0, :, :, :],   # padded depth d + 1
        xp1_ref[0, :, :, :],  # padded depth d + 2
    )

    acc = jnp.zeros((H * W, ctot), jnp.float32)
    k = 0
    for kd in range(3):
        xs = slabs[kd]
        for kh in range(3):
            for kw in range(3):
                patch = xs[kh:kh + H, kw:kw + W, :].reshape(H * W, cin)
                acc = acc + jnp.dot(
                    patch, w_ref[k], preferred_element_type=jnp.float32
                )
                k += 1

    conv_ref[0, 0, :, :] = acc

    s = jnp.sum(acc, axis=0, keepdims=True)          # (1, Ctot)
    ss = jnp.sum(acc * acc, axis=0, keepdims=True)   # (1, Ctot)
    stats_ref[0, 0, :, :] = jnp.concatenate([s, ss], axis=0)


# ----------------------------------------------------------------------------
# Pass 2 kernel: lane-dense fused BN affine + ReLU (in place over conv output).
#   x_ref              : (tR, H*W*Ctot)  conv output rows (one row = one (n,d) slab)
#   scale_ref/shift_ref: (1, H*W*Ctot)   per-channel scale/shift tiled over H*W
# ----------------------------------------------------------------------------
def bn_relu_kernel(x_ref, scale_ref, shift_ref, o_ref):
    o_ref[...] = jnp.maximum(
        x_ref[...] * scale_ref[...] + shift_ref[...], 0.0
    ).astype(o_ref.dtype)


def conv_bn_relu_layer(x_nl, w, gamma, beta):
    """One fused Layer (all units).  x_nl: (N,D,H,W,Cin); w: (3,3,3,Cin,Ctot)."""
    N, D, H, W, Cin = x_nl.shape
    Ctot = w.shape[-1]
    HW = H * W

    # Glue (pure data movement): spatial zero-padding, depth axis flattened so a
    # single block index addresses one padded depth slab.
    xp = jnp.pad(x_nl, ((0, 0), (1, 1), (1, 1), (1, 1), (0, 0)))
    xp_flat = xp.reshape(N * (D + 2), H + 2, W + 2, Cin)
    w_mat = w.reshape(27, Cin, Ctot)

    slab_spec = lambda kd: pl.BlockSpec(
        (1, H + 2, W + 2, Cin),
        lambda n, d, kd=kd: (n * (D + 2) + d + kd, 0, 0, 0),
    )

    conv_out, stats = pl.pallas_call(
        conv_stats_kernel,
        out_shape=(
            jax.ShapeDtypeStruct((N, D, HW, Ctot), jnp.float32),
            jax.ShapeDtypeStruct((N, D, 2, Ctot), jnp.float32),
        ),
        grid=(N, D),
        in_specs=[
            slab_spec(0),
            slab_spec(1),
            slab_spec(2),
            # Same block every step -> fetched once, held in VMEM.
            pl.BlockSpec((27, Cin, Ctot), lambda n, d: (0, 0, 0)),
        ],
        out_specs=(
            pl.BlockSpec((1, 1, HW, Ctot), lambda n, d: (n, d, 0, 0)),
            pl.BlockSpec((1, 1, 2, Ctot), lambda n, d: (n, d, 0, 0)),
        ),
        compiler_params=pltpu.CompilerParams(
            dimension_semantics=("parallel", "parallel"),
            vmem_limit_bytes=_VMEM_LIMIT,
        ),
    )(xp_flat, xp_flat, xp_flat, w_mat)

    # Tiny JAX reduction of the per-tile partials -> fused BN scale/shift.
    # (conv bias is omitted entirely: it cancels against the mean subtraction)
    count = float(N * D * HW)
    s = jnp.sum(stats[:, :, 0, :], axis=(0, 1))
    ss = jnp.sum(stats[:, :, 1, :], axis=(0, 1))
    mean = s / count
    var = jnp.maximum(ss / count - mean * mean, 0.0)   # biased (training) var
    scale = gamma * lax.rsqrt(var + BN_EPS)
    shift = beta - mean * scale

    # Pass 2: lane-dense normalize + ReLU.  (N*D, H*W*Ctot) is a free reshape of
    # the (N, D, HW, Ctot) conv output (identical HBM layout).
    rows = N * D
    wflat = HW * Ctot
    conv_flat = conv_out.reshape(rows, wflat)
    scale_row = jnp.tile(scale, HW).reshape(1, wflat)
    shift_row = jnp.tile(shift, HW).reshape(1, wflat)

    # Largest row-tile that divides `rows` and stays ~<= 2 MiB per block.
    target = max(1, (2 * 1024 * 1024) // (wflat * 4))
    t_rows = 1
    for cand in range(1, rows + 1):
        if rows % cand == 0 and cand <= target:
            t_rows = cand

    out_flat = pl.pallas_call(
        bn_relu_kernel,
        out_shape=jax.ShapeDtypeStruct((rows, wflat), jnp.float32),
        grid=(rows // t_rows,),
        in_specs=[
            pl.BlockSpec((t_rows, wflat), lambda i: (i, 0)),
            pl.BlockSpec((1, wflat), lambda i: (0, 0)),
            pl.BlockSpec((1, wflat), lambda i: (0, 0)),
        ],
        out_specs=pl.BlockSpec((t_rows, wflat), lambda i: (i, 0)),
        # BN+ReLU is written in place over the conv temp (no extra HBM buffer).
        input_output_aliases={0: 0},
        compiler_params=pltpu.CompilerParams(
            dimension_semantics=("parallel",),
            vmem_limit_bytes=_VMEM_LIMIT,
        ),
    )(conv_flat, scale_row, shift_row)

    return out_flat.reshape(N, D, H, W, Ctot)


# ----------------------------------------------------------------------------
# Parameter init (deterministic, PyTorch-default-style uniform bounds).
# ----------------------------------------------------------------------------
def init_layernet_params(key, base_channels, out_channels, layers, units_per_layer):
    params = []
    in_ch = base_channels
    for li in range(layers):
        units = 1 if li == layers - 1 else units_per_layer
        layer_params = []
        for _ in range(units):
            key, kw, kb = jax.random.split(key, 3)
            fan_in = in_ch * 27
            bound = 1.0 / math.sqrt(fan_in)
            w = jax.random.uniform(
                kw, (3, 3, 3, in_ch, out_channels), jnp.float32, -bound, bound
            )
            b = jax.random.uniform(kb, (out_channels,), jnp.float32, -bound, bound)
            gamma = jnp.ones((out_channels,), jnp.float32)
            beta = jnp.zeros((out_channels,), jnp.float32)
            layer_params.append((w, b, gamma, beta))
        params.append(layer_params)
        in_ch = units * out_channels
    return params


# ----------------------------------------------------------------------------
# LayerNet forward (y=None path: loss list is empty, matching the module).
# ----------------------------------------------------------------------------
def layernet_forward(params, x_ncdhw):
    # TODO(synk): the y-loss branch (|x_out - y_out| + |x_out - y| sums) and the
    # per-unit Adam optimizers are training-time state, not part of the y=None
    # forward pass, so they are not implemented here.
    x = jnp.transpose(x_ncdhw, (0, 2, 3, 4, 1))  # NCDHW -> NDHWC
    for layer_params in params:
        # Fuse all units of this layer into one wide kernel call.
        w = jnp.concatenate([p[0] for p in layer_params], axis=-1)
        gamma = jnp.concatenate([p[2] for p in layer_params], axis=-1)
        beta = jnp.concatenate([p[3] for p in layer_params], axis=-1)
        # conv bias (p[1]) is exactly cancelled by the BN mean subtraction.
        x = conv_bn_relu_layer(x, w, gamma, beta)
    x = jnp.transpose(x, (0, 4, 1, 2, 3))        # NDHWC -> NCDHW
    return x, []


# ----------------------------------------------------------------------------
# Pure-JAX reference (mirrors the PyTorch module unit-by-unit, bias included).
# ----------------------------------------------------------------------------
def reference_forward(params, x_ncdhw):
    x = jnp.transpose(x_ncdhw, (0, 2, 3, 4, 1))
    for layer_params in params:
        outs = []
        for (w, b, gamma, beta) in layer_params:
            z = lax.conv_general_dilated(
                x, w, (1, 1, 1), [(1, 1), (1, 1), (1, 1)],
                dimension_numbers=("NDHWC", "DHWIO", "NDHWC"),
                precision=lax.Precision.HIGHEST,
            ) + b
            mean = jnp.mean(z, axis=(0, 1, 2, 3))
            var = jnp.mean((z - mean) ** 2, axis=(0, 1, 2, 3))
            z = (z - mean) * (gamma / jnp.sqrt(var + BN_EPS)) + beta
            outs.append(jnp.maximum(z, 0.0))
        x = jnp.concatenate(outs, axis=-1)
    return jnp.transpose(x, (0, 4, 1, 2, 3))


if __name__ == "__main__":
    base_channels = 4
    out_channels = 8
    num_layers = 2
    units_per_layer = 2
    N, D, H, W = 2, 8, 8, 8

    root = jax.random.PRNGKey(0)
    key_params, key_x = jax.random.split(root)
    params = init_layernet_params(
        key_params, base_channels, out_channels, num_layers, units_per_layer
    )
    x = jax.random.normal(key_x, (N, base_channels, D, H, W), jnp.float32)

    fwd = jax.jit(layernet_forward)
    out, losses = fwd(params, x)
    out = jax.block_until_ready(out)

    # Last layer has 1 unit -> out_channels channels.
    assert out.shape == (N, out_channels, D, H, W), out.shape
    assert losses == []

    ref = jax.block_until_ready(reference_forward(params, x))
    max_err = float(jnp.max(jnp.abs(out - ref)))
    assert max_err < 2e-3, f"mismatch vs reference: {max_err}"

    print("KERNEL_OK")
</pallas_src>

<mosaic_0001>
module attributes {stable_mosaic.version = 11 : i64} {
  func.func @conv_stats_kernel(%arg0: i32, %arg1: i32, %arg2: memref<1x10x10x4xf32, #tpu.memory_space<vmem>>, %arg3: memref<1x10x10x4xf32, #tpu.memory_space<vmem>>, %arg4: memref<1x10x10x4xf32, #tpu.memory_space<vmem>>, %arg5: memref<27x4x16xf32, #tpu.memory_space<vmem>>, %arg6: memref<1x1x64x16xf32, #tpu.memory_space<vmem>>, %arg7: memref<1x1x2x16xf32, #tpu.memory_space<vmem>>) attributes {dimension_semantics = [#tpu.dimension_semantics<parallel>, #tpu.dimension_semantics<parallel>], iteration_bounds = array<i64: 2, 8>, scalar_prefetch = 0 : i64, scratch_operands = 0 : i64, tpu.core_type = #tpu.core_type<tc>, window_params = [{transform_indices = @transform_0, window_bounds = array<i64: 1, 10, 10, 4>}, {transform_indices = @transform_1, window_bounds = array<i64: 1, 10, 10, 4>}, {transform_indices = @transform_2, window_bounds = array<i64: 1, 10, 10, 4>}, {pipeline_mode = #tpu.pipeline_mode<synchronous>, transform_indices = @transform_3, window_bounds = array<i64: 27, 4, 16>}, {transform_indices = @transform_4, window_bounds = array<i64: 1, 1, 64, 16>}, {transform_indices = @transform_5, window_bounds = array<i64: 1, 1, 2, 16>}]} {
    %c0 = arith.constant 0 : index
    %c0_0 = arith.constant 0 : index
    %c0_1 = arith.constant 0 : index
    %c0_2 = arith.constant 0 : index
    %0 = vector.load %arg2[%c0, %c0_0, %c0_1, %c0_2] : memref<1x10x10x4xf32, #tpu.memory_space<vmem>>, vector<1x10x10x4xf32>
    %1 = vector.shape_cast %0 : vector<1x10x10x4xf32> to vector<10x10x4xf32>
    %c0_3 = arith.constant 0 : index
    %c0_4 = arith.constant 0 : index
    %c0_5 = arith.constant 0 : index
    %c0_6 = arith.constant 0 : index
    %2 = vector.load %arg3[%c0_3, %c0_4, %c0_5, %c0_6] : memref<1x10x10x4xf32, #tpu.memory_space<vmem>>, vector<1x10x10x4xf32>
    %3 = vector.shape_cast %2 : vector<1x10x10x4xf32> to vector<10x10x4xf32>
    %c0_7 = arith.constant 0 : index
    %c0_8 = arith.constant 0 : index
    %c0_9 = arith.constant 0 : index
    %c0_10 = arith.constant 0 : index
    %4 = vector.load %arg4[%c0_7, %c0_8, %c0_9, %c0_10] : memref<1x10x10x4xf32, #tpu.memory_space<vmem>>, vector<1x10x10x4xf32>
    %5 = vector.shape_cast %4 : vector<1x10x10x4xf32> to vector<10x10x4xf32>
    %cst = arith.constant 0.000000e+00 : f32
    %6 = vector.broadcast %cst : f32 to vector<64x16xf32>
    %7 = vector.extract_strided_slice %1 {offsets = [0, 0, 0], sizes = [8, 8, 4], strides = [1, 1, 1]} : vector<10x10x4xf32> to vector<8x8x4xf32>
    %8 = vector.shape_cast %7 : vector<8x8x4xf32> to vector<64x4xf32>
    %c0_11 = arith.constant 0 : index
    %c0_12 = arith.constant 0 : index
    %c0_13 = arith.constant 0 : index
    %9 = vector.load %arg5[%c0_11, %c0_12, %c0_13] : memref<27x4x16xf32, #tpu.memory_space<vmem>>, vector<1x4x16xf32>
    %10 = vector.shape_cast %9 : vector<1x4x16xf32> to vector<4x16xf32>
    %cst_14 = arith.constant dense<0.000000e+00> : vector<64x16xf32>
    %11 = tpu.matmul %8, %10, %cst_14 {dimension_numbers = #tpu.dot_dimension_numbers<[1], [0], [0], [1], [0, 0, 1, 1], [], []>} : vector<64x4xf32>, vector<4x16xf32>, vector<64x16xf32> -> vector<64x16xf32>
    %12 = arith.addf %6, %11 : vector<64x16xf32>
    %13 = vector.extract_strided_slice %1 {offsets = [0, 1, 0], sizes = [8, 8, 4], strides = [1, 1, 1]} : vector<10x10x4xf32> to vector<8x8x4xf32>
    %14 = vector.shape_cast %13 : vector<8x8x4xf32> to vector<64x4xf32>
    %c1 = arith.constant 1 : index
    %c0_15 = arith.constant 0 : index
    %c0_16 = arith.constant 0 : index
    %15 = vector.load %arg5[%c1, %c0_15, %c0_16] : memref<27x4x16xf32, #tpu.memory_space<vmem>>, vector<1x4x16xf32>
    %16 = vector.shape_cast %15 : vector<1x4x16xf32> to vector<4x16xf32>
    %cst_17 = arith.constant dense<0.000000e+00> : vector<64x16xf32>
    %17 = tpu.matmul %14, %16, %cst_17 {dimension_numbers = #tpu.dot_dimension_numbers<[1], [0], [0], [1], [0, 0, 1, 1], [], []>} : vector<64x4xf32>, vector<4x16xf32>, vector<64x16xf32> -> vector<64x16xf32>
    %18 = arith.addf %12, %17 : vector<64x16xf32>
    %19 = vector.extract_strided_slice %1 {offsets = [0, 2, 0], sizes = [8, 8, 4], strides = [1, 1, 1]} : vector<10x10x4xf32> to vector<8x8x4xf32>
    %20 = vector.shape_cast %19 : vector<8x8x4xf32> to vector<64x4xf32>
    %c2 = arith.constant 2 : index
    %c0_18 = arith.constant 0 : index
    %c0_19 = arith.constant 0 : index
    %21 = vector.load %arg5[%c2, %c0_18, %c0_19] : memref<27x4x16xf32, #tpu.memory_space<vmem>>, vector<1x4x16xf32>
    %22 = vector.shape_cast %21 : vector<1x4x16xf32> to vector<4x16xf32>
    %cst_20 = arith.constant dense<0.000000e+00> : vector<64x16xf32>
    %23 = tpu.matmul %20, %22, %cst_20 {dimension_numbers = #tpu.dot_dimension_numbers<[1], [0], [0], [1], [0, 0, 1, 1], [], []>} : vector<64x4xf32>, vector<4x16xf32>, vector<64x16xf32> -> vector<64x16xf32>
    %24 = arith.addf %18, %23 : vector<64x16xf32>
    %25 = vector.extract_strided_slice %1 {offsets = [1, 0, 0], sizes = [8, 8, 4], strides = [1, 1, 1]} : vector<10x10x4xf32> to vector<8x8x4xf32>
    %26 = vector.shape_cast %25 : vector<8x8x4xf32> to vector<64x4xf32>
    %c3 = arith.constant 3 : index
    %c0_21 = arith.constant 0 : index
    %c0_22 = arith.constant 0 : index
    %27 = vector.load %arg5[%c3, %c0_21, %c0_22] : memref<27x4x16xf32, #tpu.memory_space<vmem>>, vector<1x4x16xf32>
    %28 = vector.shape_cast %27 : vector<1x4x16xf32> to vector<4x16xf32>
    %cst_23 = arith.constant dense<0.000000e+00> : vector<64x16xf32>
    %29 = tpu.matmul %26, %28, %cst_23 {dimension_numbers = #tpu.dot_dimension_numbers<[1], [0], [0], [1], [0, 0, 1, 1], [], []>} : vector<64x4xf32>, vector<4x16xf32>, vector<64x16xf32> -> vector<64x16xf32>
    %30 = arith.addf %24, %29 : vector<64x16xf32>
    %31 = vector.extract_strided_slice %1 {offsets = [1, 1, 0], sizes = [8, 8, 4], strides = [1, 1, 1]} : vector<10x10x4xf32> to vector<8x8x4xf32>
    %32 = vector.shape_cast %31 : vector<8x8x4xf32> to vector<64x4xf32>
    %c4 = arith.constant 4 : index
    %c0_24 = arith.constant 0 : index
    %c0_25 = arith.constant 0 : index
    %33 = vector.load %arg5[%c4, %c0_24, %c0_25] : memref<27x4x16xf32, #tpu.memory_space<vmem>>, vector<1x4x16xf32>
    %34 = vector.shape_cast %33 : vector<1x4x16xf32> to vector<4x16xf32>
    %cst_26 = arith.constant dense<0.000000e+00> : vector<64x16xf32>
    %35 = tpu.matmul %32, %34, %cst_26 {dimension_numbers = #tpu.dot_dimension_numbers<[1], [0], [0], [1], [0, 0, 1, 1], [], []>} : vector<64x4xf32>, vector<4x16xf32>, vector<64x16xf32> -> vector<64x16xf32>
    %36 = arith.addf %30, %35 : vector<64x16xf32>
    %37 = vector.extract_strided_slice %1 {offsets = [1, 2, 0], sizes = [8, 8, 4], strides = [1, 1, 1]} : vector<10x10x4xf32> to vector<8x8x4xf32>
    %38 = vector.shape_cast %37 : vector<8x8x4xf32> to vector<64x4xf32>
    %c5 = arith.constant 5 : index
    %c0_27 = arith.constant 0 : index
    %c0_28 = arith.constant 0 : index
    %39 = vector.load %arg5[%c5, %c0_27, %c0_28] : memref<27x4x16xf32, #tpu.memory_space<vmem>>, vector<1x4x16xf32>
    %40 = vector.shape_cast %39 : vector<1x4x16xf32> to vector<4x16xf32>
    %cst_29 = arith.constant dense<0.000000e+00> : vector<64x16xf32>
    %41 = tpu.matmul %38, %40, %cst_29 {dimension_numbers = #tpu.dot_dimension_numbers<[1], [0], [0], [1], [0, 0, 1, 1], [], []>} : vector<64x4xf32>, vector<4x16xf32>, vector<64x16xf32> -> vector<64x16xf32>
    %42 = arith.addf %36, %41 : vector<64x16xf32>
    %43 = vector.extract_strided_slice %1 {offsets = [2, 0, 0], sizes = [8, 8, 4], strides = [1, 1, 1]} : vector<10x10x4xf32> to vector<8x8x4xf32>
    %44 = vector.shape_cast %43 : vector<8x8x4xf32> to vector<64x4xf32>
    %c6 = arith.constant 6 : index
    %c0_30 = arith.constant 0 : index
    %c0_31 = arith.constant 0 : index
    %45 = vector.load %arg5[%c6, %c0_30, %c0_31] : memref<27x4x16xf32, #tpu.memory_space<vmem>>, vector<1x4x16xf32>
    %46 = vector.shape_cast %45 : vector<1x4x16xf32> to vector<4x16xf32>
    %cst_32 = arith.constant dense<0.000000e+00> : vector<64x16xf32>
    %47 = tpu.matmul %44, %46, %cst_32 {dimension_numbers = #tpu.dot_dimension_numbers<[1], [0], [0], [1], [0, 0, 1, 1], [], []>} : vector<64x4xf32>, vector<4x16xf32>, vector<64x16xf32> -> vector<64x16xf32>
    %48 = arith.addf %42, %47 : vector<64x16xf32>
    %49 = vector.extract_strided_slice %1 {offsets = [2, 1, 0], sizes = [8, 8, 4], strides = [1, 1, 1]} : vector<10x10x4xf32> to vector<8x8x4xf32>
    %50 = vector.shape_cast %49 : vector<8x8x4xf32> to vector<64x4xf32>
    %c7 = arith.constant 7 : index
    %c0_33 = arith.constant 0 : index
    %c0_34 = arith.constant 0 : index
    %51 = vector.load %arg5[%c7, %c0_33, %c0_34] : memref<27x4x16xf32, #tpu.memory_space<vmem>>, vector<1x4x16xf32>
    %52 = vector.shape_cast %51 : vector<1x4x16xf32> to vector<4x16xf32>
    %cst_35 = arith.constant dense<0.000000e+00> : vector<64x16xf32>
    %53 = tpu.matmul %50, %52, %cst_35 {dimension_numbers = #tpu.dot_dimension_numbers<[1], [0], [0], [1], [0, 0, 1, 1], [], []>} : vector<64x4xf32>, vector<4x16xf32>, vector<64x16xf32> -> vector<64x16xf32>
    %54 = arith.addf %48, %53 : vector<64x16xf32>
    %55 = vector.extract_strided_slice %1 {offsets = [2, 2, 0], sizes = [8, 8, 4], strides = [1, 1, 1]} : vector<10x10x4xf32> to vector<8x8x4xf32>
    %56 = vector.shape_cast %55 : vector<8x8x4xf32> to vector<64x4xf32>
    %c8 = arith.constant 8 : index
    %c0_36 = arith.constant 0 : index
    %c0_37 = arith.constant 0 : index
    %57 = vector.load %arg5[%c8, %c0_36, %c0_37] : memref<27x4x16xf32, #tpu.memory_space<vmem>>, vector<1x4x16xf32>
    %58 = vector.shape_cast %57 : vector<1x4x16xf32> to vector<4x16xf32>
    %cst_38 = arith.constant dense<0.000000e+00> : vector<64x16xf32>
    %59 = tpu.matmul %56, %58, %cst_38 {dimension_numbers = #tpu.dot_dimension_numbers<[1], [0], [0], [1], [0, 0, 1, 1], [], []>} : vector<64x4xf32>, vector<4x16xf32>, vector<64x16xf32> -> vector<64x16xf32>
    %60 = arith.addf %54, %59 : vector<64x16xf32>
    %61 = vector.extract_strided_slice %3 {offsets = [0, 0, 0], sizes = [8, 8, 4], strides = [1, 1, 1]} : vector<10x10x4xf32> to vector<8x8x4xf32>
    %62 = vector.shape_cast %61 : vector<8x8x4xf32> to vector<64x4xf32>
    %c9 = arith.constant 9 : index
    %c0_39 = arith.constant 0 : index
    %c0_40 = arith.constant 0 : index
    %63 = vector.load %arg5[%c9, %c0_39, %c0_40] : memref<27x4x16xf32, #tpu.memory_space<vmem>>, vector<1x4x16xf32>
    %64 = vector.shape_cast %63 : vector<1x4x16xf32> to vector<4x16xf32>
    %cst_41 = arith.constant dense<0.000000e+00> : vector<64x16xf32>
    %65 = tpu.matmul %62, %64, %cst_41 {dimension_numbers = #tpu.dot_dimension_numbers<[1], [0], [0], [1], [0, 0, 1, 1], [], []>} : vector<64x4xf32>, vector<4x16xf32>, vector<64x16xf32> -> vector<64x16xf32>
    %66 = arith.addf %60, %65 : vector<64x16xf32>
    %67 = vector.extract_strided_slice %3 {offsets = [0, 1, 0], sizes = [8, 8, 4], strides = [1, 1, 1]} : vector<10x10x4xf32> to vector<8x8x4xf32>
    %68 = vector.shape_cast %67 : vector<8x8x4xf32> to vector<64x4xf32>
    %c10 = arith.constant 10 : index
    %c0_42 = arith.constant 0 : index
    %c0_43 = arith.constant 0 : index
    %69 = vector.load %arg5[%c10, %c0_42, %c0_43] : memref<27x4x16xf32, #tpu.memory_space<vmem>>, vector<1x4x16xf32>
    %70 = vector.shape_cast %69 : vector<1x4x16xf32> to vector<4x16xf32>
    %cst_44 = arith.constant dense<0.000000e+00> : vector<64x16xf32>
    %71 = tpu.matmul %68, %70, %cst_44 {dimension_numbers = #tpu.dot_dimension_numbers<[1], [0], [0], [1], [0, 0, 1, 1], [], []>} : vector<64x4xf32>, vector<4x16xf32>, vector<64x16xf32> -> vector<64x16xf32>
    %72 = arith.addf %66, %71 : vector<64x16xf32>
    %73 = vector.extract_strided_slice %3 {offsets = [0, 2, 0], sizes = [8, 8, 4], strides = [1, 1, 1]} : vector<10x10x4xf32> to vector<8x8x4xf32>
    %74 = vector.shape_cast %73 : vector<8x8x4xf32> to vector<64x4xf32>
    %c11 = arith.constant 11 : index
    %c0_45 = arith.constant 0 : index
    %c0_46 = arith.constant 0 : index
    %75 = vector.load %arg5[%c11, %c0_45, %c0_46] : memref<27x4x16xf32, #tpu.memory_space<vmem>>, vector<1x4x16xf32>
    %76 = vector.shape_cast %75 : vector<1x4x16xf32> to vector<4x16xf32>
    %cst_47 = arith.constant dense<0.000000e+00> : vector<64x16xf32>
    %77 = tpu.matmul %74, %76, %cst_47 {dimension_numbers = #tpu.dot_dimension_numbers<[1], [0], [0], [1], [0, 0, 1, 1], [], []>} : vector<64x4xf32>, vector<4x16xf32>, vector<64x16xf32> -> vector<64x16xf32>
    %78 = arith.addf %72, %77 : vector<64x16xf32>
    %79 = vector.extract_strided_slice %3 {offsets = [1, 0, 0], sizes = [8, 8, 4], strides = [1, 1, 1]} : vector<10x10x4xf32> to vector<8x8x4xf32>
    %80 = vector.shape_cast %79 : vector<8x8x4xf32> to vector<64x4xf32>
    %c12 = arith.constant 12 : index
    %c0_48 = arith.constant 0 : index
    %c0_49 = arith.constant 0 : index
    %81 = vector.load %arg5[%c12, %c0_48, %c0_49] : memref<27x4x16xf32, #tpu.memory_space<vmem>>, vector<1x4x16xf32>
    %82 = vector.shape_cast %81 : vector<1x4x16xf32> to vector<4x16xf32>
    %cst_50 = arith.constant dense<0.000000e+00> : vector<64x16xf32>
    %83 = tpu.matmul %80, %82, %cst_50 {dimension_numbers = #tpu.dot_dimension_numbers<[1], [0], [0], [1], [0, 0, 1, 1], [], []>} : vector<64x4xf32>, vector<4x16xf32>, vector<64x16xf32> -> vector<64x16xf32>
    %84 = arith.addf %78, %83 : vector<64x16xf32>
    %85 = vector.extract_strided_slice %3 {offsets = [1, 1, 0], sizes = [8, 8, 4], strides = [1, 1, 1]} : vector<10x10x4xf32> to vector<8x8x4xf32>
    %86 = vector.shape_cast %85 : vector<8x8x4xf32> to vector<64x4xf32>
    %c13 = arith.constant 13 : index
    %c0_51 = arith.constant 0 : index
    %c0_52 = arith.constant 0 : index
    %87 = vector.load %arg5[%c13, %c0_51, %c0_52] : memref<27x4x16xf32, #tpu.memory_space<vmem>>, vector<1x4x16xf32>
    %88 = vector.shape_cast %87 : vector<1x4x16xf32> to vector<4x16xf32>
    %cst_53 = arith.constant dense<0.000000e+00> : vector<64x16xf32>
    %89 = tpu.matmul %86, %88, %cst_53 {dimension_numbers = #tpu.dot_dimension_numbers<[1], [0], [0], [1], [0, 0, 1, 1], [], []>} : vector<64x4xf32>, vector<4x16xf32>, vector<64x16xf32> -> vector<64x16xf32>
    %90 = arith.addf %84, %89 : vector<64x16xf32>
    %91 = vector.extract_strided_slice %3 {offsets = [1, 2, 0], sizes = [8, 8, 4], strides = [1, 1, 1]} : vector<10x10x4xf32> to vector<8x8x4xf32>
    %92 = vector.shape_cast %91 : vector<8x8x4xf32> to vector<64x4xf32>
    %c14 = arith.constant 14 : index
    %c0_54 = arith.constant 0 : index
    %c0_55 = arith.constant 0 : index
    %93 = vector.load %arg5[%c14, %c0_54, %c0_55] : memref<27x4x16xf32, #tpu.memory_space<vmem>>, vector<1x4x16xf32>
    %94 = vector.shape_cast %93 : vector<1x4x16xf32> to vector<4x16xf32>
    %cst_56 = arith.constant dense<0.000000e+00> : vector<64x16xf32>
    %95 = tpu.matmul %92, %94, %cst_56 {dimension_numbers = #tpu.dot_dimension_numbers<[1], [0], [0], [1], [0, 0, 1, 1], [], []>} : vector<64x4xf32>, vector<4x16xf32>, vector<64x16xf32> -> vector<64x16xf32>
    %96 = arith.addf %90, %95 : vector<64x16xf32>
    %97 = vector.extract_strided_slice %3 {offsets = [2, 0, 0], sizes = [8, 8, 4], strides = [1, 1, 1]} : vector<10x10x4xf32> to vector<8x8x4xf32>
    %98 = vector.shape_cast %97 : vector<8x8x4xf32> to vector<64x4xf32>
    %c15 = arith.constant 15 : index
    %c0_57 = arith.constant 0 : index
    %c0_58 = arith.constant 0 : index
    %99 = vector.load %arg5[%c15, %c0_57, %c0_58] : memref<27x4x16xf32, #tpu.memory_space<vmem>>, vector<1x4x16xf32>
    %100 = vector.shape_cast %99 : vector<1x4x16xf32> to vector<4x16xf32>
    %cst_59 = arith.constant dense<0.000000e+00> : vector<64x16xf32>
    %101 = tpu.matmul %98, %100, %cst_59 {dimension_numbers = #tpu.dot_dimension_numbers<[1], [0], [0], [1], [0, 0, 1, 1], [], []>} : vector<64x4xf32>, vector<4x16xf32>, vector<64x16xf32> -> vector<64x16xf32>
    %102 = arith.addf %96, %101 : vector<64x16xf32>
    %103 = vector.extract_strided_slice %3 {offsets = [2, 1, 0], sizes = [8, 8, 4], strides = [1, 1, 1]} : vector<10x10x4xf32> to vector<8x8x4xf32>
    %104 = vector.shape_cast %103 : vector<8x8x4xf32> to vector<64x4xf32>
    %c16 = arith.constant 16 : index
    %c0_60 = arith.constant 0 : index
    %c0_61 = arith.constant 0 : index
    %105 = vector.load %arg5[%c16, %c0_60, %c0_61] : memref<27x4x16xf32, #tpu.memory_space<vmem>>, vector<1x4x16xf32>
    %106 = vector.shape_cast %105 : vector<1x4x16xf32> to vector<4x16xf32>
    %cst_62 = arith.constant dense<0.000000e+00> : vector<64x16xf32>
    %107 = tpu.matmul %104, %106, %cst_62 {dimension_numbers = #tpu.dot_dimension_numbers<[1], [0], [0], [1], [0, 0, 1, 1], [], []>} : vector<64x4xf32>, vector<4x16xf32>, vector<64x16xf32> -> vector<64x16xf32>
    %108 = arith.addf %102, %107 : vector<64x16xf32>
    %109 = vector.extract_strided_slice %3 {offsets = [2, 2, 0], sizes = [8, 8, 4], strides = [1, 1, 1]} : vector<10x10x4xf32> to vector<8x8x4xf32>
    %110 = vector.shape_cast %109 : vector<8x8x4xf32> to vector<64x4xf32>
    %c17 = arith.constant 17 : index
    %c0_63 = arith.constant 0 : index
    %c0_64 = arith.constant 0 : index
    %111 = vector.load %arg5[%c17, %c0_63, %c0_64] : memref<27x4x16xf32, #tpu.memory_space<vmem>>, vector<1x4x16xf32>
    %112 = vector.shape_cast %111 : vector<1x4x16xf32> to vector<4x16xf32>
    %cst_65 = arith.constant dense<0.000000e+00> : vector<64x16xf32>
    %113 = tpu.matmul %110, %112, %cst_65 {dimension_numbers = #tpu.dot_dimension_numbers<[1], [0], [0], [1], [0, 0, 1, 1], [], []>} : vector<64x4xf32>, vector<4x16xf32>, vector<64x16xf32> -> vector<64x16xf32>
    %114 = arith.addf %108, %113 : vector<64x16xf32>
    %115 = vector.extract_strided_slice %5 {offsets = [0, 0, 0], sizes = [8, 8, 4], strides = [1, 1, 1]} : vector<10x10x4xf32> to vector<8x8x4xf32>
    %116 = vector.shape_cast %115 : vector<8x8x4xf32> to vector<64x4xf32>
    %c18 = arith.constant 18 : index
    %c0_66 = arith.constant 0 : index
    %c0_67 = arith.constant 0 : index
    %117 = vector.load %arg5[%c18, %c0_66, %c0_67] : memref<27x4x16xf32, #tpu.memory_space<vmem>>, vector<1x4x16xf32>
    %118 = vector.shape_cast %117 : vector<1x4x16xf32> to vector<4x16xf32>
    %cst_68 = arith.constant dense<0.000000e+00> : vector<64x16xf32>
    %119 = tpu.matmul %116, %118, %cst_68 {dimension_numbers = #tpu.dot_dimension_numbers<[1], [0], [0], [1], [0, 0, 1, 1], [], []>} : vector<64x4xf32>, vector<4x16xf32>, vector<64x16xf32> -> vector<64x16xf32>
    %120 = arith.addf %114, %119 : vector<64x16xf32>
    %121 = vector.extract_strided_slice %5 {offsets = [0, 1, 0], sizes = [8, 8, 4], strides = [1, 1, 1]} : vector<10x10x4xf32> to vector<8x8x4xf32>
    %122 = vector.shape_cast %121 : vector<8x8x4xf32> to vector<64x4xf32>
    %c19 = arith.constant 19 : index
    %c0_69 = arith.constant 0 : index
    %c0_70 = arith.constant 0 : index
    %123 = vector.load %arg5[%c19, %c0_69, %c0_70] : memref<27x4x16xf32, #tpu.memory_space<vmem>>, vector<1x4x16xf32>
    %124 = vector.shape_cast %123 : vector<1x4x16xf32> to vector<4x16xf32>
    %cst_71 = arith.constant dense<0.000000e+00> : vector<64x16xf32>
    %125 = tpu.matmul %122, %124, %cst_71 {dimension_numbers = #tpu.dot_dimension_numbers<[1], [0], [0], [1], [0, 0, 1, 1], [], []>} : vector<64x4xf32>, vector<4x16xf32>, vector<64x16xf32> -> vector<64x16xf32>
    %126 = arith.addf %120, %125 : vector<64x16xf32>
    %127 = vector.extract_strided_slice %5 {offsets = [0, 2, 0], sizes = [8, 8, 4], strides = [1, 1, 1]} : vector<10x10x4xf32> to vector<8x8x4xf32>
    %128 = vector.shape_cast %127 : vector<8x8x4xf32> to vector<64x4xf32>
    %c20 = arith.constant 20 : index
    %c0_72 = arith.constant 0 : index
    %c0_73 = arith.constant 0 : index
    %129 = vector.load %arg5[%c20, %c0_72, %c0_73] : memref<27x4x16xf32, #tpu.memory_space<vmem>>, vector<1x4x16xf32>
    %130 = vector.shape_cast %129 : vector<1x4x16xf32> to vector<4x16xf32>
    %cst_74 = arith.constant dense<0.000000e+00> : vector<64x16xf32>
    %131 = tpu.matmul %128, %130, %cst_74 {dimension_numbers = #tpu.dot_dimension_numbers<[1], [0], [0], [1], [0, 0, 1, 1], [], []>} : vector<64x4xf32>, vector<4x16xf32>, vector<64x16xf32> -> vector<64x16xf32>
    %132 = arith.addf %126, %131 : vector<64x16xf32>
    %133 = vector.extract_strided_slice %5 {offsets = [1, 0, 0], sizes = [8, 8, 4], strides = [1, 1, 1]} : vector<10x10x4xf32> to vector<8x8x4xf32>
    %134 = vector.shape_cast %133 : vector<8x8x4xf32> to vector<64x4xf32>
    %c21 = arith.constant 21 : index
    %c0_75 = arith.constant 0 : index
    %c0_76 = arith.constant 0 : index
    %135 = vector.load %arg5[%c21, %c0_75, %c0_76] : memref<27x4x16xf32, #tpu.memory_space<vmem>>, vector<1x4x16xf32>
    %136 = vector.shape_cast %135 : vector<1x4x16xf32> to vector<4x16xf32>
    %cst_77 = arith.constant dense<0.000000e+00> : vector<64x16xf32>
    %137 = tpu.matmul %134, %136, %cst_77 {dimension_numbers = #tpu.dot_dimension_numbers<[1], [0], [0], [1], [0, 0, 1, 1], [], []>} : vector<64x4xf32>, vector<4x16xf32>, vector<64x16xf32> -> vector<64x16xf32>
    %138 = arith.addf %132, %137 : vector<64x16xf32>
    %139 = vector.extract_strided_slice %5 {offsets = [1, 1, 0], sizes = [8, 8, 4], strides = [1, 1, 1]} : vector<10x10x4xf32> to vector<8x8x4xf32>
    %140 = vector.shape_cast %139 : vector<8x8x4xf32> to vector<64x4xf32>
    %c22 = arith.constant 22 : index
    %c0_78 = arith.constant 0 : index
    %c0_79 = arith.constant 0 : index
    %141 = vector.load %arg5[%c22, %c0_78, %c0_79] : memref<27x4x16xf32, #tpu.memory_space<vmem>>, vector<1x4x16xf32>
    %142 = vector.shape_cast %141 : vector<1x4x16xf32> to vector<4x16xf32>
    %cst_80 = arith.constant dense<0.000000e+00> : vector<64x16xf32>
    %143 = tpu.matmul %140, %142, %cst_80 {dimension_numbers = #tpu.dot_dimension_numbers<[1], [0], [0], [1], [0, 0, 1, 1], [], []>} : vector<64x4xf32>, vector<4x16xf32>, vector<64x16xf32> -> vector<64x16xf32>
    %144 = arith.addf %138, %143 : vector<64x16xf32>
    %145 = vector.extract_strided_slice %5 {offsets = [1, 2, 0], sizes = [8, 8, 4], strides = [1, 1, 1]} : vector<10x10x4xf32> to vector<8x8x4xf32>
    %146 = vector.shape_cast %145 : vector<8x8x4xf32> to vector<64x4xf32>
    %c23 = arith.constant 23 : index
    %c0_81 = arith.constant 0 : index
    %c0_82 = arith.constant 0 : index
    %147 = vector.load %arg5[%c23, %c0_81, %c0_82] : memref<27x4x16xf32, #tpu.memory_space<vmem>>, vector<1x4x16xf32>
    %148 = vector.shape_cast %147 : vector<1x4x16xf32> to vector<4x16xf32>
    %cst_83 = arith.constant dense<0.000000e+00> : vector<64x16xf32>
    %149 = tpu.matmul %146, %148, %cst_83 {dimension_numbers = #tpu.dot_dimension_numbers<[1], [0], [0], [1], [0, 0, 1, 1], [], []>} : vector<64x4xf32>, vector<4x16xf32>, vector<64x16xf32> -> vector<64x16xf32>
    %150 = arith.addf %144, %149 : vector<64x16xf32>
    %151 = vector.extract_strided_slice %5 {offsets = [2, 0, 0], sizes = [8, 8, 4], strides = [1, 1, 1]} : vector<10x10x4xf32> to vector<8x8x4xf32>
    %152 = vector.shape_cast %151 : vector<8x8x4xf32> to vector<64x4xf32>
    %c24 = arith.constant 24 : index
    %c0_84 = arith.constant 0 : index
    %c0_85 = arith.constant 0 : index
    %153 = vector.load %arg5[%c24, %c0_84, %c0_85] : memref<27x4x16xf32, #tpu.memory_space<vmem>>, vector<1x4x16xf32>
    %154 = vector.shape_cast %153 : vector<1x4x16xf32> to vector<4x16xf32>
    %cst_86 = arith.constant dense<0.000000e+00> : vector<64x16xf32>
    %155 = tpu.matmul %152, %154, %cst_86 {dimension_numbers = #tpu.dot_dimension_numbers<[1], [0], [0], [1], [0, 0, 1, 1], [], []>} : vector<64x4xf32>, vector<4x16xf32>, vector<64x16xf32> -> vector<64x16xf32>
    %156 = arith.addf %150, %155 : vector<64x16xf32>
    %157 = vector.extract_strided_slice %5 {offsets = [2, 1, 0], sizes = [8, 8, 4], strides = [1, 1, 1]} : vector<10x10x4xf32> to vector<8x8x4xf32>
    %158 = vector.shape_cast %157 : vector<8x8x4xf32> to vector<64x4xf32>
    %c25 = arith.constant 25 : index
    %c0_87 = arith.constant 0 : index
    %c0_88 = arith.constant 0 : index
    %159 = vector.load %arg5[%c25, %c0_87, %c0_88] : memref<27x4x16xf32, #tpu.memory_space<vmem>>, vector<1x4x16xf32>
    %160 = vector.shape_cast %159 : vector<1x4x16xf32> to vector<4x16xf32>
    %cst_89 = arith.constant dense<0.000000e+00> : vector<64x16xf32>
    %161 = tpu.matmul %158, %160, %cst_89 {dimension_numbers = #tpu.dot_dimension_numbers<[1], [0], [0], [1], [0, 0, 1, 1], [], []>} : vector<64x4xf32>, vector<4x16xf32>, vector<64x16xf32> -> vector<64x16xf32>
    %162 = arith.addf %156, %161 : vector<64x16xf32>
    %163 = vector.extract_strided_slice %5 {offsets = [2, 2, 0], sizes = [8, 8, 4], strides = [1, 1, 1]} : vector<10x10x4xf32> to vector<8x8x4xf32>
    %164 = vector.shape_cast %163 : vector<8x8x4xf32> to vector<64x4xf32>
    %c26 = arith.constant 26 : index
    %c0_90 = arith.constant 0 : index
    %c0_91 = arith.constant 0 : index
    %165 = vector.load %arg5[%c26, %c0_90, %c0_91] : memref<27x4x16xf32, #tpu.memory_space<vmem>>, vector<1x4x16xf32>
    %166 = vector.shape_cast %165 : vector<1x4x16xf32> to vector<4x16xf32>
    %cst_92 = arith.constant dense<0.000000e+00> : vector<64x16xf32>
    %167 = tpu.matmul %164, %166, %cst_92 {dimension_numbers = #tpu.dot_dimension_numbers<[1], [0], [0], [1], [0, 0, 1, 1], [], []>} : vector<64x4xf32>, vector<4x16xf32>, vector<64x16xf32> -> vector<64x16xf32>
    %168 = arith.addf %162, %167 : vector<64x16xf32>
    %c0_93 = arith.constant 0 : index
    %c0_94 = arith.constant 0 : index
    %c0_95 = arith.constant 0 : index
    %c0_96 = arith.constant 0 : index
    %169 = vector.load %arg6[%c0_93, %c0_94, %c0_95, %c0_96] : memref<1x1x64x16xf32, #tpu.memory_space<vmem>>, vector<1x1x64x16xf32>
    %170 = vector.shape_cast %169 : vector<1x1x64x16xf32> to vector<64x16xf32>
    %171 = vector.shape_cast %168 : vector<64x16xf32> to vector<1x1x64x16xf32>
    tpu.vector_store %arg6[%c0_93, %c0_94, %c0_95, %c0_96], %171 {strides = array<i32>} : memref<1x1x64x16xf32, #tpu.memory_space<vmem>>, vector<1x1x64x16xf32>,
    %cst_97 = arith.constant dense<0.000000e+00> : vector<16xf32>
    %172 = vector.multi_reduction <add>, %168, %cst_97 [0] : vector<64x16xf32> to vector<16xf32>
    %173 = vector.shape_cast %172 : vector<16xf32> to vector<1x16xf32>
    %174 = arith.mulf %168, %168 : vector<64x16xf32>
    %cst_98 = arith.constant dense<0.000000e+00> : vector<16xf32>
    %175 = vector.multi_reduction <add>, %174, %cst_98 [0] : vector<64x16xf32> to vector<16xf32>
    %176 = vector.shape_cast %175 : vector<16xf32> to vector<1x16xf32>
    %177 = tpu.concatenate %173, %176 in 0 : vector<1x16xf32>, vector<1x16xf32> -> vector<2x16xf32>
    %c0_99 = arith.constant 0 : index
    %c0_100 = arith.constant 0 : index
    %c0_101 = arith.constant 0 : index
    %c0_102 = arith.constant 0 : index
    %178 = vector.load %arg7[%c0_99, %c0_100, %c0_101, %c0_102] : memref<1x1x2x16xf32, #tpu.memory_space<vmem>>, vector<1x1x2x16xf32>
    %179 = vector.shape_cast %178 : vector<1x1x2x16xf32> to vector<2x16xf32>
    %180 = vector.shape_cast %177 : vector<2x16xf32> to vector<1x1x2x16xf32>
    tpu.vector_store %arg7[%c0_99, %c0_100, %c0_101, %c0_102], %180 {strides = array<i32>} : memref<1x1x2x16xf32, #tpu.memory_space<vmem>>, vector<1x1x2x16xf32>,
    return
  }
  func.func @transform_0(%arg0: i32, %arg1: i32) -> (i32, i32, i32, i32) {
    %c10_i32 = arith.constant 10 : i32
    %0 = arith.muli %arg0, %c10_i32 : i32
    %1 = arith.addi %0, %arg1 : i32
    %c0_i32 = arith.constant 0 : i32
    %2 = arith.addi %1, %c0_i32 : i32
    %c0_i32_0 = arith.constant 0 : i32
    %c0_i32_1 = arith.constant 0 : i32
    %c0_i32_2 = arith.constant 0 : i32
    %c0_i32_3 = arith.constant 0 : i32
    return %2, %c0_i32_0, %c0_i32_1, %c0_i32_2 : i32, i32, i32, i32
  }
  func.func @transform_1(%arg0: i32, %arg1: i32) -> (i32, i32, i32, i32) {
    %c10_i32 = arith.constant 10 : i32
    %0 = arith.muli %arg0, %c10_i32 : i32
    %1 = arith.addi %0, %arg1 : i32
    %c1_i32 = arith.constant 1 : i32
    %2 = arith.addi %1, %c1_i32 : i32
    %c0_i32 = arith.constant 0 : i32
    %c0_i32_0 = arith.constant 0 : i32
    %c0_i32_1 = arith.constant 0 : i32
    %c0_i32_2 = arith.constant 0 : i32
    return %2, %c0_i32, %c0_i32_0, %c0_i32_1 : i32, i32, i32, i32
  }
  func.func @transform_2(%arg0: i32, %arg1: i32) -> (i32, i32, i32, i32) {
    %c10_i32 = arith.constant 10 : i32
    %0 = arith.muli %arg0, %c10_i32 : i32
    %1 = arith.addi %0, %arg1 : i32
    %c2_i32 = arith.constant 2 : i32
    %2 = arith.addi %1, %c2_i32 : i32
    %c0_i32 = arith.constant 0 : i32
    %c0_i32_0 = arith.constant 0 : i32
    %c0_i32_1 = arith.constant 0 : i32
    %c0_i32_2 = arith.constant 0 : i32
    return %2, %c0_i32, %c0_i32_0, %c0_i32_1 : i32, i32, i32, i32
  }
  func.func @transform_3(%arg0: i32, %arg1: i32) -> (i32, i32, i32) {
    %c0_i32 = arith.constant 0 : i32
    %c0_i32_0 = arith.constant 0 : i32
    %c0_i32_1 = arith.constant 0 : i32
    %c0_i32_2 = arith.constant 0 : i32
    return %c0_i32, %c0_i32_0, %c0_i32_1 : i32, i32, i32
  }
  func.func @transform_4(%arg0: i32, %arg1: i32) -> (i32, i32, i32, i32) {
    %c0_i32 = arith.constant 0 : i32
    %c0_i32_0 = arith.constant 0 : i32
    %c0_i32_1 = arith.constant 0 : i32
    return %arg0, %arg1, %c0_i32, %c0_i32_0 : i32, i32, i32, i32
  }
  func.func @transform_5(%arg0: i32, %arg1: i32) -> (i32, i32, i32, i32) {
    %c0_i32 = arith.constant 0 : i32
    %c0_i32_0 = arith.constant 0 : i32
    %c0_i32_1 = arith.constant 0 : i32
    return %arg0, %arg1, %c0_i32, %c0_i32_0 : i32, i32, i32, i32
  }
}

module attributes {stable_mosaic.version = 11 : i64} {
  func.func @bn_relu_kernel(%arg0: i32, %arg1: memref<16x1024xf32, #tpu.memory_space<vmem>>, %arg2: memref<1x1024xf32, #tpu.memory_space<vmem>>, %arg3: memref<1x1024xf32, #tpu.memory_space<vmem>>, %arg4: memref<16x1024xf32, #tpu.memory_space<vmem>>) attributes {dimension_semantics = [#tpu.dimension_semantics<parallel>], iteration_bounds = array<i64: 1>, scalar_prefetch = 0 : i64, scratch_operands = 0 : i64, tpu.core_type = #tpu.core_type<tc>, window_params = [{transform_indices = @transform_0, window_bounds = array<i64: 16, 1024>}, {pipeline_mode = #tpu.pipeline_mode<synchronous>, transform_indices = @transform_1, window_bounds = array<i64: 1, 1024>}, {pipeline_mode = #tpu.pipeline_mode<synchronous>, transform_indices = @transform_2, window_bounds = array<i64: 1, 1024>}, {transform_indices = @transform_3, window_bounds = array<i64: 16, 1024>}]} {
    %c0 = arith.constant 0 : index
    %c0_0 = arith.constant 0 : index
    %0 = vector.load %arg1[%c0, %c0_0] : memref<16x1024xf32, #tpu.memory_space<vmem>>, vector<16x1024xf32>
    %c0_1 = arith.constant 0 : index
    %c0_2 = arith.constant 0 : index
    %1 = vector.load %arg2[%c0_1, %c0_2] : memref<1x1024xf32, #tpu.memory_space<vmem>>, vector<1x1024xf32>
    %2 = vector.broadcast %1 : vector<1x1024xf32> to vector<16x1024xf32>
    %3 = arith.mulf %0, %2 : vector<16x1024xf32>
    %c0_3 = arith.constant 0 : index
    %c0_4 = arith.constant 0 : index
    %4 = vector.load %arg3[%c0_3, %c0_4] : memref<1x1024xf32, #tpu.memory_space<vmem>>, vector<1x1024xf32>
    %5 = vector.broadcast %4 : vector<1x1024xf32> to vector<16x1024xf32>
    %6 = arith.addf %3, %5 : vector<16x1024xf32>
    %cst = arith.constant 0.000000e+00 : f32
    %7 = vector.broadcast %cst : f32 to vector<16x1024xf32>
    %8 = arith.maximumf %6, %7 : vector<16x1024xf32>
    %c0_5 = arith.constant 0 : index
    %c0_6 = arith.constant 0 : index
    %9 = vector.load %arg4[%c0_5, %c0_6] : memref<16x1024xf32, #tpu.memory_space<vmem>>, vector<16x1024xf32>
    tpu.vector_store %arg4[%c0_5, %c0_6], %8 {strides = array<i32>} : memref<16x1024xf32, #tpu.memory_space<vmem>>, vector<16x1024xf32>,
    return
  }
  func.func @transform_0(%arg0: i32) -> (i32, i32) {
    %c0_i32 = arith.constant 0 : i32
    %c0_i32_0 = arith.constant 0 : i32
    return %arg0, %c0_i32 : i32, i32
  }
  func.func @transform_1(%arg0: i32) -> (i32, i32) {
    %c0_i32 = arith.constant 0 : i32
    %c0_i32_0 = arith.constant 0 : i32
    %c0_i32_1 = arith.constant 0 : i32
    return %c0_i32, %c0_i32_0 : i32, i32
  }
  func.func @transform_2(%arg0: i32) -> (i32, i32) {
    %c0_i32 = arith.constant 0 : i32
    %c0_i32_0 = arith.constant 0 : i32
    %c0_i32_1 = arith.constant 0 : i32
    return %c0_i32, %c0_i32_0 : i32, i32
  }
  func.func @transform_3(%arg0: i32) -> (i32, i32) {
    %c0_i32 = arith.constant 0 : i32
    %c0_i32_0 = arith.constant 0 : i32
    return %arg0, %c0_i32 : i32, i32
  }
}

module attributes {stable_mosaic.version = 11 : i64} {
  func.func @conv_stats_kernel(%arg0: i32, %arg1: i32, %arg2: memref<1x10x10x16xf32, #tpu.memory_space<vmem>>, %arg3: memref<1x10x10x16xf32, #tpu.memory_space<vmem>>, %arg4: memref<1x10x10x16xf32, #tpu.memory_space<vmem>>, %arg5: memref<27x16x8xf32, #tpu.memory_space<vmem>>, %arg6: memref<1x1x64x8xf32, #tpu.memory_space<vmem>>, %arg7: memref<1x1x2x8xf32, #tpu.memory_space<vmem>>) attributes {dimension_semantics = [#tpu.dimension_semantics<parallel>, #tpu.dimension_semantics<parallel>], iteration_bounds = array<i64: 2, 8>, scalar_prefetch = 0 : i64, scratch_operands = 0 : i64, tpu.core_type = #tpu.core_type<tc>, window_params = [{transform_indices = @transform_0, window_bounds = array<i64: 1, 10, 10, 16>}, {transform_indices = @transform_1, window_bounds = array<i64: 1, 10, 10, 16>}, {transform_indices = @transform_2, window_bounds = array<i64: 1, 10, 10, 16>}, {pipeline_mode = #tpu.pipeline_mode<synchronous>, transform_indices = @transform_3, window_bounds = array<i64: 27, 16, 8>}, {transform_indices = @transform_4, window_bounds = array<i64: 1, 1, 64, 8>}, {transform_indices = @transform_5, window_bounds = array<i64: 1, 1, 2, 8>}]} {
    %c0 = arith.constant 0 : index
    %c0_0 = arith.constant 0 : index
    %c0_1 = arith.constant 0 : index
    %c0_2 = arith.constant 0 : index
    %0 = vector.load %arg2[%c0, %c0_0, %c0_1, %c0_2] : memref<1x10x10x16xf32, #tpu.memory_space<vmem>>, vector<1x10x10x16xf32>
    %1 = vector.shape_cast %0 : vector<1x10x10x16xf32> to vector<10x10x16xf32>
    %c0_3 = arith.constant 0 : index
    %c0_4 = arith.constant 0 : index
    %c0_5 = arith.constant 0 : index
    %c0_6 = arith.constant 0 : index
    %2 = vector.load %arg3[%c0_3, %c0_4, %c0_5, %c0_6] : memref<1x10x10x16xf32, #tpu.memory_space<vmem>>, vector<1x10x10x16xf32>
    %3 = vector.shape_cast %2 : vector<1x10x10x16xf32> to vector<10x10x16xf32>
    %c0_7 = arith.constant 0 : index
    %c0_8 = arith.constant 0 : index
    %c0_9 = arith.constant 0 : index
    %c0_10 = arith.constant 0 : index
    %4 = vector.load %arg4[%c0_7, %c0_8, %c0_9, %c0_10] : memref<1x10x10x16xf32, #tpu.memory_space<vmem>>, vector<1x10x10x16xf32>
    %5 = vector.shape_cast %4 : vector<1x10x10x16xf32> to vector<10x10x16xf32>
    %cst = arith.constant 0.000000e+00 : f32
    %6 = vector.broadcast %cst : f32 to vector<64x8xf32>
    %7 = vector.extract_strided_slice %1 {offsets = [0, 0, 0], sizes = [8, 8, 16], strides = [1, 1, 1]} : vector<10x10x16xf32> to vector<8x8x16xf32>
    %8 = vector.shape_cast %7 : vector<8x8x16xf32> to vector<64x16xf32>
    %c0_11 = arith.constant 0 : index
    %c0_12 = arith.constant 0 : index
    %c0_13 = arith.constant 0 : index
    %9 = vector.load %arg5[%c0_11, %c0_12, %c0_13] : memref<27x16x8xf32, #tpu.memory_space<vmem>>, vector<1x16x8xf32>
    %10 = vector.shape_cast %9 : vector<1x16x8xf32> to vector<16x8xf32>
    %cst_14 = arith.constant dense<0.000000e+00> : vector<64x8xf32>
    %11 = tpu.matmul %8, %10, %cst_14 {dimension_numbers = #tpu.dot_dimension_numbers<[1], [0], [0], [1], [0, 0, 1, 1], [], []>} : vector<64x16xf32>, vector<16x8xf32>, vector<64x8xf32> -> vector<64x8xf32>
    %12 = arith.addf %6, %11 : vector<64x8xf32>
    %13 = vector.extract_strided_slice %1 {offsets = [0, 1, 0], sizes = [8, 8, 16], strides = [1, 1, 1]} : vector<10x10x16xf32> to vector<8x8x16xf32>
    %14 = vector.shape_cast %13 : vector<8x8x16xf32> to vector<64x16xf32>
    %c1 = arith.constant 1 : index
    %c0_15 = arith.constant 0 : index
    %c0_16 = arith.constant 0 : index
    %15 = vector.load %arg5[%c1, %c0_15, %c0_16] : memref<27x16x8xf32, #tpu.memory_space<vmem>>, vector<1x16x8xf32>
    %16 = vector.shape_cast %15 : vector<1x16x8xf32> to vector<16x8xf32>
    %cst_17 = arith.constant dense<0.000000e+00> : vector<64x8xf32>
    %17 = tpu.matmul %14, %16, %cst_17 {dimension_numbers = #tpu.dot_dimension_numbers<[1], [0], [0], [1], [0, 0, 1, 1], [], []>} : vector<64x16xf32>, vector<16x8xf32>, vector<64x8xf32> -> vector<64x8xf32>
    %18 = arith.addf %12, %17 : vector<64x8xf32>
    %19 = vector.extract_strided_slice %1 {offsets = [0, 2, 0], sizes = [8, 8, 16], strides = [1, 1, 1]} : vector<10x10x16xf32> to vector<8x8x16xf32>
    %20 = vector.shape_cast %19 : vector<8x8x16xf32> to vector<64x16xf32>
    %c2 = arith.constant 2 : index
    %c0_18 = arith.constant 0 : index
    %c0_19 = arith.constant 0 : index
    %21 = vector.load %arg5[%c2, %c0_18, %c0_19] : memref<27x16x8xf32, #tpu.memory_space<vmem>>, vector<1x16x8xf32>
    %22 = vector.shape_cast %21 : vector<1x16x8xf32> to vector<16x8xf32>
    %cst_20 = arith.constant dense<0.000000e+00> : vector<64x8xf32>
    %23 = tpu.matmul %20, %22, %cst_20 {dimension_numbers = #tpu.dot_dimension_numbers<[1], [0], [0], [1], [0, 0, 1, 1], [], []>} : vector<64x16xf32>, vector<16x8xf32>, vector<64x8xf32> -> vector<64x8xf32>
    %24 = arith.addf %18, %23 : vector<64x8xf32>
    %25 = vector.extract_strided_slice %1 {offsets = [1, 0, 0], sizes = [8, 8, 16], strides = [1, 1, 1]} : vector<10x10x16xf32> to vector<8x8x16xf32>
    %26 = vector.shape_cast %25 : vector<8x8x16xf32> to vector<64x16xf32>
    %c3 = arith.constant 3 : index
    %c0_21 = arith.constant 0 : index
    %c0_22 = arith.constant 0 : index
    %27 = vector.load %arg5[%c3, %c0_21, %c0_22] : memref<27x16x8xf32, #tpu.memory_space<vmem>>, vector<1x16x8xf32>
    %28 = vector.shape_cast %27 : vector<1x16x8xf32> to vector<16x8xf32>
    %cst_23 = arith.constant dense<0.000000e+00> : vector<64x8xf32>
    %29 = tpu.matmul %26, %28, %cst_23 {dimension_numbers = #tpu.dot_dimension_numbers<[1], [0], [0], [1], [0, 0, 1, 1], [], []>} : vector<64x16xf32>, vector<16x8xf32>, vector<64x8xf32> -> vector<64x8xf32>
    %30 = arith.addf %24, %29 : vector<64x8xf32>
    %31 = vector.extract_strided_slice %1 {offsets = [1, 1, 0], sizes = [8, 8, 16], strides = [1, 1, 1]} : vector<10x10x16xf32> to vector<8x8x16xf32>
    %32 = vector.shape_cast %31 : vector<8x8x16xf32> to vector<64x16xf32>
    %c4 = arith.constant 4 : index
    %c0_24 = arith.constant 0 : index
    %c0_25 = arith.constant 0 : index
    %33 = vector.load %arg5[%c4, %c0_24, %c0_25] : memref<27x16x8xf32, #tpu.memory_space<vmem>>, vector<1x16x8xf32>
    %34 = vector.shape_cast %33 : vector<1x16x8xf32> to vector<16x8xf32>
    %cst_26 = arith.constant dense<0.000000e+00> : vector<64x8xf32>
    %35 = tpu.matmul %32, %34, %cst_26 {dimension_numbers = #tpu.dot_dimension_numbers<[1], [0], [0], [1], [0, 0, 1, 1], [], []>} : vector<64x16xf32>, vector<16x8xf32>, vector<64x8xf32> -> vector<64x8xf32>
    %36 = arith.addf %30, %35 : vector<64x8xf32>
    %37 = vector.extract_strided_slice %1 {offsets = [1, 2, 0], sizes = [8, 8, 16], strides = [1, 1, 1]} : vector<10x10x16xf32> to vector<8x8x16xf32>
    %38 = vector.shape_cast %37 : vector<8x8x16xf32> to vector<64x16xf32>
    %c5 = arith.constant 5 : index
    %c0_27 = arith.constant 0 : index
    %c0_28 = arith.constant 0 : index
    %39 = vector.load %arg5[%c5, %c0_27, %c0_28] : memref<27x16x8xf32, #tpu.memory_space<vmem>>, vector<1x16x8xf32>
    %40 = vector.shape_cast %39 : vector<1x16x8xf32> to vector<16x8xf32>
    %cst_29 = arith.constant dense<0.000000e+00> : vector<64x8xf32>
    %41 = tpu.matmul %38, %40, %cst_29 {dimension_numbers = #tpu.dot_dimension_numbers<[1], [0], [0], [1], [0, 0, 1, 1], [], []>} : vector<64x16xf32>, vector<16x8xf32>, vector<64x8xf32> -> vector<64x8xf32>
    %42 = arith.addf %36, %41 : vector<64x8xf32>
    %43 = vector.extract_strided_slice %1 {offsets = [2, 0, 0], sizes = [8, 8, 16], strides = [1, 1, 1]} : vector<10x10x16xf32> to vector<8x8x16xf32>
    %44 = vector.shape_cast %43 : vector<8x8x16xf32> to vector<64x16xf32>
    %c6 = arith.constant 6 : index
    %c0_30 = arith.constant 0 : index
    %c0_31 = arith.constant 0 : index
    %45 = vector.load %arg5[%c6, %c0_30, %c0_31] : memref<27x16x8xf32, #tpu.memory_space<vmem>>, vector<1x16x8xf32>
    %46 = vector.shape_cast %45 : vector<1x16x8xf32> to vector<16x8xf32>
    %cst_32 = arith.constant dense<0.000000e+00> : vector<64x8xf32>
    %47 = tpu.matmul %44, %46, %cst_32 {dimension_numbers = #tpu.dot_dimension_numbers<[1], [0], [0], [1], [0, 0, 1, 1], [], []>} : vector<64x16xf32>, vector<16x8xf32>, vector<64x8xf32> -> vector<64x8xf32>
    %48 = arith.addf %42, %47 : vector<64x8xf32>
    %49 = vector.extract_strided_slice %1 {offsets = [2, 1, 0], sizes = [8, 8, 16], strides = [1, 1, 1]} : vector<10x10x16xf32> to vector<8x8x16xf32>
    %50 = vector.shape_cast %49 : vector<8x8x16xf32> to vector<64x16xf32>
    %c7 = arith.constant 7 : index
    %c0_33 = arith.constant 0 : index
    %c0_34 = arith.constant 0 : index
    %51 = vector.load %arg5[%c7, %c0_33, %c0_34] : memref<27x16x8xf32, #tpu.memory_space<vmem>>, vector<1x16x8xf32>
    %52 = vector.shape_cast %51 : vector<1x16x8xf32> to vector<16x8xf32>
    %cst_35 = arith.constant dense<0.000000e+00> : vector<64x8xf32>
    %53 = tpu.matmul %50, %52, %cst_35 {dimension_numbers = #tpu.dot_dimension_numbers<[1], [0], [0], [1], [0, 0, 1, 1], [], []>} : vector<64x16xf32>, vector<16x8xf32>, vector<64x8xf32> -> vector<64x8xf32>
    %54 = arith.addf %48, %53 : vector<64x8xf32>
    %55 = vector.extract_strided_slice %1 {offsets = [2, 2, 0], sizes = [8, 8, 16], strides = [1, 1, 1]} : vector<10x10x16xf32> to vector<8x8x16xf32>
    %56 = vector.shape_cast %55 : vector<8x8x16xf32> to vector<64x16xf32>
    %c8 = arith.constant 8 : index
    %c0_36 = arith.constant 0 : index
    %c0_37 = arith.constant 0 : index
    %57 = vector.load %arg5[%c8, %c0_36, %c0_37] : memref<27x16x8xf32, #tpu.memory_space<vmem>>, vector<1x16x8xf32>
    %58 = vector.shape_cast %57 : vector<1x16x8xf32> to vector<16x8xf32>
    %cst_38 = arith.constant dense<0.000000e+00> : vector<64x8xf32>
    %59 = tpu.matmul %56, %58, %cst_38 {dimension_numbers = #tpu.dot_dimension_numbers<[1], [0], [0], [1], [0, 0, 1, 1], [], []>} : vector<64x16xf32>, vector<16x8xf32>, vector<64x8xf32> -> vector<64x8xf32>
    %60 = arith.addf %54, %59 : vector<64x8xf32>
    %61 = vector.extract_strided_slice %3 {offsets = [0, 0, 0], sizes = [8, 8, 16], strides = [1, 1, 1]} : vector<10x10x16xf32> to vector<8x8x16xf32>
    %62 = vector.shape_cast %61 : vector<8x8x16xf32> to vector<64x16xf32>
    %c9 = arith.constant 9 : index
    %c0_39 = arith.constant 0 : index
    %c0_40 = arith.constant 0 : index
    %63 = vector.load %arg5[%c9, %c0_39, %c0_40] : memref<27x16x8xf32, #tpu.memory_space<vmem>>, vector<1x16x8xf32>
    %64 = vector.shape_cast %63 : vector<1x16x8xf32> to vector<16x8xf32>
    %cst_41 = arith.constant dense<0.000000e+00> : vector<64x8xf32>
    %65 = tpu.matmul %62, %64, %cst_41 {dimension_numbers = #tpu.dot_dimension_numbers<[1], [0], [0], [1], [0, 0, 1, 1], [], []>} : vector<64x16xf32>, vector<16x8xf32>, vector<64x8xf32> -> vector<64x8xf32>
    %66 = arith.addf %60, %65 : vector<64x8xf32>
    %67 = vector.extract_strided_slice %3 {offsets = [0, 1, 0], sizes = [8, 8, 16], strides = [1, 1, 1]} : vector<10x10x16xf32> to vector<8x8x16xf32>
    %68 = vector.shape_cast %67 : vector<8x8x16xf32> to vector<64x16xf32>
    %c10 = arith.constant 10 : index
    %c0_42 = arith.constant 0 : index
    %c0_43 = arith.constant 0 : index
    %69 = vector.load %arg5[%c10, %c0_42, %c0_43] : memref<27x16x8xf32, #tpu.memory_space<vmem>>, vector<1x16x8xf32>
    %70 = vector.shape_cast %69 : vector<1x16x8xf32> to vector<16x8xf32>
    %cst_44 = arith.constant dense<0.000000e+00> : vector<64x8xf32>
    %71 = tpu.matmul %68, %70, %cst_44 {dimension_numbers = #tpu.dot_dimension_numbers<[1], [0], [0], [1], [0, 0, 1, 1], [], []>} : vector<64x16xf32>, vector<16x8xf32>, vector<64x8xf32> -> vector<64x8xf32>
    %72 = arith.addf %66, %71 : vector<64x8xf32>
    %73 = vector.extract_strided_slice %3 {offsets = [0, 2, 0], sizes = [8, 8, 16], strides = [1, 1, 1]} : vector<10x10x16xf32> to vector<8x8x16xf32>
    %74 = vector.shape_cast %73 : vector<8x8x16xf32> to vector<64x16xf32>
    %c11 = arith.constant 11 : index
    %c0_45 = arith.constant 0 : index
    %c0_46 = arith.constant 0 : index
    %75 = vector.load %arg5[%c11, %c0_45, %c0_46] : memref<27x16x8xf32, #tpu.memory_space<vmem>>, vector<1x16x8xf32>
    %76 = vector.shape_cast %75 : vector<1x16x8xf32> to vector<16x8xf32>
    %cst_47 = arith.constant dense<0.000000e+00> : vector<64x8xf32>
    %77 = tpu.matmul %74, %76, %cst_47 {dimension_numbers = #tpu.dot_dimension_numbers<[1], [0], [0], [1], [0, 0, 1, 1], [], []>} : vector<64x16xf32>, vector<16x8xf32>, vector<64x8xf32> -> vector<64x8xf32>
    %78 = arith.addf %72, %77 : vector<64x8xf32>
    %79 = vector.extract_strided_slice %3 {offsets = [1, 0, 0], sizes = [8, 8, 16], strides = [1, 1, 1]} : vector<10x10x16xf32> to vector<8x8x16xf32>
    %80 = vector.shape_cast %79 : vector<8x8x16xf32> to vector<64x16xf32>
    %c12 = arith.constant 12 : index
    %c0_48 = arith.constant 0 : index
    %c0_49 = arith.constant 0 : index
    %81 = vector.load %arg5[%c12, %c0_48, %c0_49] : memref<27x16x8xf32, #tpu.memory_space<vmem>>, vector<1x16x8xf32>
    %82 = vector.shape_cast %81 : vector<1x16x8xf32> to vector<16x8xf32>
    %cst_50 = arith.constant dense<0.000000e+00> : vector<64x8xf32>
    %83 = tpu.matmul %80, %82, %cst_50 {dimension_numbers = #tpu.dot_dimension_numbers<[1], [0], [0], [1], [0, 0, 1, 1], [], []>} : vector<64x16xf32>, vector<16x8xf32>, vector<64x8xf32> -> vector<64x8xf32>
    %84 = arith.addf %78, %83 : vector<64x8xf32>
    %85 = vector.extract_strided_slice %3 {offsets = [1, 1, 0], sizes = [8, 8, 16], strides = [1, 1, 1]} : vector<10x10x16xf32> to vector<8x8x16xf32>
    %86 = vector.shape_cast %85 : vector<8x8x16xf32> to vector<64x16xf32>
    %c13 = arith.constant 13 : index
    %c0_51 = arith.constant 0 : index
    %c0_52 = arith.constant 0 : index
    %87 = vector.load %arg5[%c13, %c0_51, %c0_52] : memref<27x16x8xf32, #tpu.memory_space<vmem>>, vector<1x16x8xf32>
    %88 = vector.shape_cast %87 : vector<1x16x8xf32> to vector<16x8xf32>
    %cst_53 = arith.constant dense<0.000000e+00> : vector<64x8xf32>
    %89 = tpu.matmul %86, %88, %cst_53 {dimension_numbers = #tpu.dot_dimension_numbers<[1], [0], [0], [1], [0, 0, 1, 1], [], []>} : vector<64x16xf32>, vector<16x8xf32>, vector<64x8xf32> -> vector<64x8xf32>
    %90 = arith.addf %84, %89 : vector<64x8xf32>
    %91 = vector.extract_strided_slice %3 {offsets = [1, 2, 0], sizes = [8, 8, 16], strides = [1, 1, 1]} : vector<10x10x16xf32> to vector<8x8x16xf32>
    %92 = vector.shape_cast %91 : vector<8x8x16xf32> to vector<64x16xf32>
    %c14 = arith.constant 14 : index
    %c0_54 = arith.constant 0 : index
    %c0_55 = arith.constant 0 : index
    %93 = vector.load %arg5[%c14, %c0_54, %c0_55] : memref<27x16x8xf32, #tpu.memory_space<vmem>>, vector<1x16x8xf32>
    %94 = vector.shape_cast %93 : vector<1x16x8xf32> to vector<16x8xf32>
    %cst_56 = arith.constant dense<0.000000e+00> : vector<64x8xf32>
    %95 = tpu.matmul %92, %94, %cst_56 {dimension_numbers = #tpu.dot_dimension_numbers<[1], [0], [0], [1], [0, 0, 1, 1], [], []>} : vector<64x16xf32>, vector<16x8xf32>, vector<64x8xf32> -> vector<64x8xf32>
    %96 = arith.addf %90, %95 : vector<64x8xf32>
    %97 = vector.extract_strided_slice %3 {offsets = [2, 0, 0], sizes = [8, 8, 16], strides = [1, 1, 1]} : vector<10x10x16xf32> to vector<8x8x16xf32>
    %98 = vector.shape_cast %97 : vector<8x8x16xf32> to vector<64x16xf32>
    %c15 = arith.constant 15 : index
    %c0_57 = arith.constant 0 : index
    %c0_58 = arith.constant 0 : index
    %99 = vector.load %arg5[%c15, %c0_57, %c0_58] : memref<27x16x8xf32, #tpu.memory_space<vmem>>, vector<1x16x8xf32>
    %100 = vector.shape_cast %99 : vector<1x16x8xf32> to vector<16x8xf32>
    %cst_59 = arith.constant dense<0.000000e+00> : vector<64x8xf32>
    %101 = tpu.matmul %98, %100, %cst_59 {dimension_numbers = #tpu.dot_dimension_numbers<[1], [0], [0], [1], [0, 0, 1, 1], [], []>} : vector<64x16xf32>, vector<16x8xf32>, vector<64x8xf32> -> vector<64x8xf32>
    %102 = arith.addf %96, %101 : vector<64x8xf32>
    %103 = vector.extract_strided_slice %3 {offsets = [2, 1, 0], sizes = [8, 8, 16], strides = [1, 1, 1]} : vector<10x10x16xf32> to vector<8x8x16xf32>
    %104 = vector.shape_cast %103 : vector<8x8x16xf32> to vector<64x16xf32>
    %c16 = arith.constant 16 : index
    %c0_60 = arith.constant 0 : index
    %c0_61 = arith.constant 0 : index
    %105 = vector.load %arg5[%c16, %c0_60, %c0_61] : memref<27x16x8xf32, #tpu.memory_space<vmem>>, vector<1x16x8xf32>
    %106 = vector.shape_cast %105 : vector<1x16x8xf32> to vector<16x8xf32>
    %cst_62 = arith.constant dense<0.000000e+00> : vector<64x8xf32>
    %107 = tpu.matmul %104, %106, %cst_62 {dimension_numbers = #tpu.dot_dimension_numbers<[1], [0], [0], [1], [0, 0, 1, 1], [], []>} : vector<64x16xf32>, vector<16x8xf32>, vector<64x8xf32> -> vector<64x8xf32>
    %108 = arith.addf %102, %107 : vector<64x8xf32>
    %109 = vector.extract_strided_slice %3 {offsets = [2, 2, 0], sizes = [8, 8, 16], strides = [1, 1, 1]} : vector<10x10x16xf32> to vector<8x8x16xf32>
    %110 = vector.shape_cast %109 : vector<8x8x16xf32> to vector<64x16xf32>
    %c17 = arith.constant 17 : index
    %c0_63 = arith.constant 0 : index
    %c0_64 = arith.constant 0 : index
    %111 = vector.load %arg5[%c17, %c0_63, %c0_64] : memref<27x16x8xf32, #tpu.memory_space<vmem>>, vector<1x16x8xf32>
    %112 = vector.shape_cast %111 : vector<1x16x8xf32> to vector<16x8xf32>
    %cst_65 = arith.constant dense<0.000000e+00> : vector<64x8xf32>
    %113 = tpu.matmul %110, %112, %cst_65 {dimension_numbers = #tpu.dot_dimension_numbers<[1], [0], [0], [1], [0, 0, 1, 1], [], []>} : vector<64x16xf32>, vector<16x8xf32>, vector<64x8xf32> -> vector<64x8xf32>
    %114 = arith.addf %108, %113 : vector<64x8xf32>
    %115 = vector.extract_strided_slice %5 {offsets = [0, 0, 0], sizes = [8, 8, 16], strides = [1, 1, 1]} : vector<10x10x16xf32> to vector<8x8x16xf32>
    %116 = vector.shape_cast %115 : vector<8x8x16xf32> to vector<64x16xf32>
    %c18 = arith.constant 18 : index
    %c0_66 = arith.constant 0 : index
    %c0_67 = arith.constant 0 : index
    %117 = vector.load %arg5[%c18, %c0_66, %c0_67] : memref<27x16x8xf32, #tpu.memory_space<vmem>>, vector<1x16x8xf32>
    %118 = vector.shape_cast %117 : vector<1x16x8xf32> to vector<16x8xf32>
    %cst_68 = arith.constant dense<0.000000e+00> : vector<64x8xf32>
    %119 = tpu.matmul %116, %118, %cst_68 {dimension_numbers = #tpu.dot_dimension_numbers<[1], [0], [0], [1], [0, 0, 1, 1], [], []>} : vector<64x16xf32>, vector<16x8xf32>, vector<64x8xf32> -> vector<64x8xf32>
    %120 = arith.addf %114, %119 : vector<64x8xf32>
    %121 = vector.extract_strided_slice %5 {offsets = [0, 1, 0], sizes = [8, 8, 16], strides = [1, 1, 1]} : vector<10x10x16xf32> to vector<8x8x16xf32>
    %122 = vector.shape_cast %121 : vector<8x8x16xf32> to vector<64x16xf32>
    %c19 = arith.constant 19 : index
    %c0_69 = arith.constant 0 : index
    %c0_70 = arith.constant 0 : index
    %123 = vector.load %arg5[%c19, %c0_69, %c0_70] : memref<27x16x8xf32, #tpu.memory_space<vmem>>, vector<1x16x8xf32>
    %124 = vector.shape_cast %123 : vector<1x16x8xf32> to vector<16x8xf32>
    %cst_71 = arith.constant dense<0.000000e+00> : vector<64x8xf32>
    %125 = tpu.matmul %122, %124, %cst_71 {dimension_numbers = #tpu.dot_dimension_numbers<[1], [0], [0], [1], [0, 0, 1, 1], [], []>} : vector<64x16xf32>, vector<16x8xf32>, vector<64x8xf32> -> vector<64x8xf32>
    %126 = arith.addf %120, %125 : vector<64x8xf32>
    %127 = vector.extract_strided_slice %5 {offsets = [0, 2, 0], sizes = [8, 8, 16], strides = [1, 1, 1]} : vector<10x10x16xf32> to vector<8x8x16xf32>
    %128 = vector.shape_cast %127 : vector<8x8x16xf32> to vector<64x16xf32>
    %c20 = arith.constant 20 : index
    %c0_72 = arith.constant 0 : index
    %c0_73 = arith.constant 0 : index
    %129 = vector.load %arg5[%c20, %c0_72, %c0_73] : memref<27x16x8xf32, #tpu.memory_space<vmem>>, vector<1x16x8xf32>
    %130 = vector.shape_cast %129 : vector<1x16x8xf32> to vector<16x8xf32>
    %cst_74 = arith.constant dense<0.000000e+00> : vector<64x8xf32>
    %131 = tpu.matmul %128, %130, %cst_74 {dimension_numbers = #tpu.dot_dimension_numbers<[1], [0], [0], [1], [0, 0, 1, 1], [], []>} : vector<64x16xf32>, vector<16x8xf32>, vector<64x8xf32> -> vector<64x8xf32>
    %132 = arith.addf %126, %131 : vector<64x8xf32>
    %133 = vector.extract_strided_slice %5 {offsets = [1, 0, 0], sizes = [8, 8, 16], strides = [1, 1, 1]} : vector<10x10x16xf32> to vector<8x8x16xf32>
    %134 = vector.shape_cast %133 : vector<8x8x16xf32> to vector<64x16xf32>
    %c21 = arith.constant 21 : index
    %c0_75 = arith.constant 0 : index
    %c0_76 = arith.constant 0 : index
    %135 = vector.load %arg5[%c21, %c0_75, %c0_76] : memref<27x16x8xf32, #tpu.memory_space<vmem>>, vector<1x16x8xf32>
    %136 = vector.shape_cast %135 : vector<1x16x8xf32> to vector<16x8xf32>
    %cst_77 = arith.constant dense<0.000000e+00> : vector<64x8xf32>
    %137 = tpu.matmul %134, %136, %cst_77 {dimension_numbers = #tpu.dot_dimension_numbers<[1], [0], [0], [1], [0, 0, 1, 1], [], []>} : vector<64x16xf32>, vector<16x8xf32>, vector<64x8xf32> -> vector<64x8xf32>
    %138 = arith.addf %132, %137 : vector<64x8xf32>
    %139 = vector.extract_strided_slice %5 {offsets = [1, 1, 0], sizes = [8, 8, 16], strides = [1, 1, 1]} : vector<10x10x16xf32> to vector<8x8x16xf32>
    %140 = vector.shape_cast %139 : vector<8x8x16xf32> to vector<64x16xf32>
    %c22 = arith.constant 22 : index
    %c0_78 = arith.constant 0 : index
    %c0_79 = arith.constant 0 : index
    %141 = vector.load %arg5[%c22, %c0_78, %c0_79] : memref<27x16x8xf32, #tpu.memory_space<vmem>>, vector<1x16x8xf32>
    %142 = vector.shape_cast %141 : vector<1x16x8xf32> to vector<16x8xf32>
    %cst_80 = arith.constant dense<0.000000e+00> : vector<64x8xf32>
    %143 = tpu.matmul %140, %142, %cst_80 {dimension_numbers = #tpu.dot_dimension_numbers<[1], [0], [0], [1], [0, 0, 1, 1], [], []>} : vector<64x16xf32>, vector<16x8xf32>, vector<64x8xf32> -> vector<64x8xf32>
    %144 = arith.addf %138, %143 : vector<64x8xf32>
    %145 = vector.extract_strided_slice %5 {offsets = [1, 2, 0], sizes = [8, 8, 16], strides = [1, 1, 1]} : vector<10x10x16xf32> to vector<8x8x16xf32>
    %146 = vector.shape_cast %145 : vector<8x8x16xf32> to vector<64x16xf32>
    %c23 = arith.constant 23 : index
    %c0_81 = arith.constant 0 : index
    %c0_82 = arith.constant 0 : index
    %147 = vector.load %arg5[%c23, %c0_81, %c0_82] : memref<27x16x8xf32, #tpu.memory_space<vmem>>, vector<1x16x8xf32>
    %148 = vector.shape_cast %147 : vector<1x16x8xf32> to vector<16x8xf32>
    %cst_83 = arith.constant dense<0.000000e+00> : vector<64x8xf32>
    %149 = tpu.matmul %146, %148, %cst_83 {dimension_numbers = #tpu.dot_dimension_numbers<[1], [0], [0], [1], [0, 0, 1, 1], [], []>} : vector<64x16xf32>, vector<16x8xf32>, vector<64x8xf32> -> vector<64x8xf32>
    %150 = arith.addf %144, %149 : vector<64x8xf32>
    %151 = vector.extract_strided_slice %5 {offsets = [2, 0, 0], sizes = [8, 8, 16], strides = [1, 1, 1]} : vector<10x10x16xf32> to vector<8x8x16xf32>
    %152 = vector.shape_cast %151 : vector<8x8x16xf32> to vector<64x16xf32>
    %c24 = arith.constant 24 : index
    %c0_84 = arith.constant 0 : index
    %c0_85 = arith.constant 0 : index
    %153 = vector.load %arg5[%c24, %c0_84, %c0_85] : memref<27x16x8xf32, #tpu.memory_space<vmem>>, vector<1x16x8xf32>
    %154 = vector.shape_cast %153 : vector<1x16x8xf32> to vector<16x8xf32>
    %cst_86 = arith.constant dense<0.000000e+00> : vector<64x8xf32>
    %155 = tpu.matmul %152, %154, %cst_86 {dimension_numbers = #tpu.dot_dimension_numbers<[1], [0], [0], [1], [0, 0, 1, 1], [], []>} : vector<64x16xf32>, vector<16x8xf32>, vector<64x8xf32> -> vector<64x8xf32>
    %156 = arith.addf %150, %155 : vector<64x8xf32>
    %157 = vector.extract_strided_slice %5 {offsets = [2, 1, 0], sizes = [8, 8, 16], strides = [1, 1, 1]} : vector<10x10x16xf32> to vector<8x8x16xf32>
    %158 = vector.shape_cast %157 : vector<8x8x16xf32> to vector<64x16xf32>
    %c25 = arith.constant 25 : index
    %c0_87 = arith.constant 0 : index
    %c0_88 = arith.constant 0 : index
    %159 = vector.load %arg5[%c25, %c0_87, %c0_88] : memref<27x16x8xf32, #tpu.memory_space<vmem>>, vector<1x16x8xf32>
    %160 = vector.shape_cast %159 : vector<1x16x8xf32> to vector<16x8xf32>
    %cst_89 = arith.constant dense<0.000000e+00> : vector<64x8xf32>
    %161 = tpu.matmul %158, %160, %cst_89 {dimension_numbers = #tpu.dot_dimension_numbers<[1], [0], [0], [1], [0, 0, 1, 1], [], []>} : vector<64x16xf32>, vector<16x8xf32>, vector<64x8xf32> -> vector<64x8xf32>
    %162 = arith.addf %156, %161 : vector<64x8xf32>
    %163 = vector.extract_strided_slice %5 {offsets = [2, 2, 0], sizes = [8, 8, 16], strides = [1, 1, 1]} : vector<10x10x16xf32> to vector<8x8x16xf32>
    %164 = vector.shape_cast %163 : vector<8x8x16xf32> to vector<64x16xf32>
    %c26 = arith.constant 26 : index
    %c0_90 = arith.constant 0 : index
    %c0_91 = arith.constant 0 : index
    %165 = vector.load %arg5[%c26, %c0_90, %c0_91] : memref<27x16x8xf32, #tpu.memory_space<vmem>>, vector<1x16x8xf32>
    %166 = vector.shape_cast %165 : vector<1x16x8xf32> to vector<16x8xf32>
    %cst_92 = arith.constant dense<0.000000e+00> : vector<64x8xf32>
    %167 = tpu.matmul %164, %166, %cst_92 {dimension_numbers = #tpu.dot_dimension_numbers<[1], [0], [0], [1], [0, 0, 1, 1], [], []>} : vector<64x16xf32>, vector<16x8xf32>, vector<64x8xf32> -> vector<64x8xf32>
    %168 = arith.addf %162, %167 : vector<64x8xf32>
    %c0_93 = arith.constant 0 : index
    %c0_94 = arith.constant 0 : index
    %c0_95 = arith.constant 0 : index
    %c0_96 = arith.constant 0 : index
    %169 = vector.load %arg6[%c0_93, %c0_94, %c0_95, %c0_96] : memref<1x1x64x8xf32, #tpu.memory_space<vmem>>, vector<1x1x64x8xf32>
    %170 = vector.shape_cast %169 : vector<1x1x64x8xf32> to vector<64x8xf32>
    %171 = vector.shape_cast %168 : vector<64x8xf32> to vector<1x1x64x8xf32>
    tpu.vector_store %arg6[%c0_93, %c0_94, %c0_95, %c0_96], %171 {strides = array<i32>} : memref<1x1x64x8xf32, #tpu.memory_space<vmem>>, vector<1x1x64x8xf32>,
    %cst_97 = arith.constant dense<0.000000e+00> : vector<8xf32>
    %172 = vector.multi_reduction <add>, %168, %cst_97 [0] : vector<64x8xf32> to vector<8xf32>
    %173 = vector.shape_cast %172 : vector<8xf32> to vector<1x8xf32>
    %174 = arith.mulf %168, %168 : vector<64x8xf32>
    %cst_98 = arith.constant dense<0.000000e+00> : vector<8xf32>
    %175 = vector.multi_reduction <add>, %174, %cst_98 [0] : vector<64x8xf32> to vector<8xf32>
    %176 = vector.shape_cast %175 : vector<8xf32> to vector<1x8xf32>
    %177 = tpu.concatenate %173, %176 in 0 : vector<1x8xf32>, vector<1x8xf32> -> vector<2x8xf32>
    %c0_99 = arith.constant 0 : index
    %c0_100 = arith.constant 0 : index
    %c0_101 = arith.constant 0 : index
    %c0_102 = arith.constant 0 : index
    %178 = vector.load %arg7[%c0_99, %c0_100, %c0_101, %c0_102] : memref<1x1x2x8xf32, #tpu.memory_space<vmem>>, vector<1x1x2x8xf32>
    %179 = vector.shape_cast %178 : vector<1x1x2x8xf32> to vector<2x8xf32>
    %180 = vector.shape_cast %177 : vector<2x8xf32> to vector<1x1x2x8xf32>
    tpu.vector_store %arg7[%c0_99, %c0_100, %c0_101, %c0_102], %180 {strides = array<i32>} : memref<1x1x2x8xf32, #tpu.memory_space<vmem>>, vector<1x1x2x8xf32>,
    return
  }
  func.func @transform_0(%arg0: i32, %arg1: i32) -> (i32, i32, i32, i32) {
    %c10_i32 = arith.constant 10 : i32
    %0 = arith.muli %arg0, %c10_i32 : i32
    %1 = arith.addi %0, %arg1 : i32
    %c0_i32 = arith.constant 0 : i32
    %2 = arith.addi %1, %c0_i32 : i32
    %c0_i32_0 = arith.constant 0 : i32
    %c0_i32_1 = arith.constant 0 : i32
    %c0_i32_2 = arith.constant 0 : i32
    %c0_i32_3 = arith.constant 0 : i32
    return %2, %c0_i32_0, %c0_i32_1, %c0_i32_2 : i32, i32, i32, i32
  }
  func.func @transform_1(%arg0: i32, %arg1: i32) -> (i32, i32, i32, i32) {
    %c10_i32 = arith.constant 10 : i32
    %0 = arith.muli %arg0, %c10_i32 : i32
    %1 = arith.addi %0, %arg1 : i32
    %c1_i32 = arith.constant 1 : i32
    %2 = arith.addi %1, %c1_i32 : i32
    %c0_i32 = arith.constant 0 : i32
    %c0_i32_0 = arith.constant 0 : i32
    %c0_i32_1 = arith.constant 0 : i32
    %c0_i32_2 = arith.constant 0 : i32
    return %2, %c0_i32, %c0_i32_0, %c0_i32_1 : i32, i32, i32, i32
  }
  func.func @transform_2(%arg0: i32, %arg1: i32) -> (i32, i32, i32, i32) {
    %c10_i32 = arith.constant 10 : i32
    %0 = arith.muli %arg0, %c10_i32 : i32
    %1 = arith.addi %0, %arg1 : i32
    %c2_i32 = arith.constant 2 : i32
    %2 = arith.addi %1, %c2_i32 : i32
    %c0_i32 = arith.constant 0 : i32
    %c0_i32_0 = arith.constant 0 : i32
    %c0_i32_1 = arith.constant 0 : i32
    %c0_i32_2 = arith.constant 0 : i32
    return %2, %c0_i32, %c0_i32_0, %c0_i32_1 : i32, i32, i32, i32
  }
  func.func @transform_3(%arg0: i32, %arg1: i32) -> (i32, i32, i32) {
    %c0_i32 = arith.constant 0 : i32
    %c0_i32_0 = arith.constant 0 : i32
    %c0_i32_1 = arith.constant 0 : i32
    %c0_i32_2 = arith.constant 0 : i32
    return %c0_i32, %c0_i32_0, %c0_i32_1 : i32, i32, i32
  }
  func.func @transform_4(%arg0: i32, %arg1: i32) -> (i32, i32, i32, i32) {
    %c0_i32 = arith.constant 0 : i32
    %c0_i32_0 = arith.constant 0 : i32
    %c0_i32_1 = arith.constant 0 : i32
    return %arg0, %arg1, %c0_i32, %c0_i32_0 : i32, i32, i32, i32
  }
  func.func @transform_5(%arg0: i32, %arg1: i32) -> (i32, i32, i32, i32) {
    %c0_i32 = arith.constant 0 : i32
    %c0_i32_0 = arith.constant 0 : i32
    %c0_i32_1 = arith.constant 0 : i32
    return %arg0, %arg1, %c0_i32, %c0_i32_0 : i32, i32, i32, i32
  }
}

module attributes {stable_mosaic.version = 11 : i64} {
  func.func @bn_relu_kernel(%arg0: i32, %arg1: memref<16x512xf32, #tpu.memory_space<vmem>>, %arg2: memref<1x512xf32, #tpu.memory_space<vmem>>, %arg3: memref<1x512xf32, #tpu.memory_space<vmem>>, %arg4: memref<16x512xf32, #tpu.memory_space<vmem>>) attributes {dimension_semantics = [#tpu.dimension_semantics<parallel>], iteration_bounds = array<i64: 1>, scalar_prefetch = 0 : i64, scratch_operands = 0 : i64, tpu.core_type = #tpu.core_type<tc>, window_params = [{transform_indices = @transform_0, window_bounds = array<i64: 16, 512>}, {pipeline_mode = #tpu.pipeline_mode<synchronous>, transform_indices = @transform_1, window_bounds = array<i64: 1, 512>}, {pipeline_mode = #tpu.pipeline_mode<synchronous>, transform_indices = @transform_2, window_bounds = array<i64: 1, 512>}, {transform_indices = @transform_3, window_bounds = array<i64: 16, 512>}]} {
    %c0 = arith.constant 0 : index
    %c0_0 = arith.constant 0 : index
    %0 = vector.load %arg1[%c0, %c0_0] : memref<16x512xf32, #tpu.memory_space<vmem>>, vector<16x512xf32>
    %c0_1 = arith.constant 0 : index
    %c0_2 = arith.constant 0 : index
    %1 = vector.load %arg2[%c0_1, %c0_2] : memref<1x512xf32, #tpu.memory_space<vmem>>, vector<1x512xf32>
    %2 = vector.broadcast %1 : vector<1x512xf32> to vector<16x512xf32>
    %3 = arith.mulf %0, %2 : vector<16x512xf32>
    %c0_3 = arith.constant 0 : index
    %c0_4 = arith.constant 0 : index
    %4 = vector.load %arg3[%c0_3, %c0_4] : memref<1x512xf32, #tpu.memory_space<vmem>>, vector<1x512xf32>
    %5 = vector.broadcast %4 : vector<1x512xf32> to vector<16x512xf32>
    %6 = arith.addf %3, %5 : vector<16x512xf32>
    %cst = arith.constant 0.000000e+00 : f32
    %7 = vector.broadcast %cst : f32 to vector<16x512xf32>
    %8 = arith.maximumf %6, %7 : vector<16x512xf32>
    %c0_5 = arith.constant 0 : index
    %c0_6 = arith.constant 0 : index
    %9 = vector.load %arg4[%c0_5, %c0_6] : memref<16x512xf32, #tpu.memory_space<vmem>>, vector<16x512xf32>
    tpu.vector_store %arg4[%c0_5, %c0_6], %8 {strides = array<i32>} : memref<16x512xf32, #tpu.memory_space<vmem>>, vector<16x512xf32>,
    return
  }
  func.func @transform_0(%arg0: i32) -> (i32, i32) {
    %c0_i32 = arith.constant 0 : i32
    %c0_i32_0 = arith.constant 0 : i32
    return %arg0, %c0_i32 : i32, i32
  }
  func.func @transform_1(%arg0: i32) -> (i32, i32) {
    %c0_i32 = arith.constant 0 : i32
    %c0_i32_0 = arith.constant 0 : i32
    %c0_i32_1 = arith.constant 0 : i32
    return %c0_i32, %c0_i32_0 : i32, i32
  }
  func.func @transform_2(%arg0: i32) -> (i32, i32) {
    %c0_i32 = arith.constant 0 : i32
    %c0_i32_0 = arith.constant 0 : i32
    %c0_i32_1 = arith.constant 0 : i32
    return %c0_i32, %c0_i32_0 : i32, i32
  }
  func.func @transform_3(%arg0: i32) -> (i32, i32) {
    %c0_i32 = arith.constant 0 : i32
    %c0_i32_0 = arith.constant 0 : i32
    return %arg0, %c0_i32 : i32, i32
  }
}

</mosaic_0001>

<bundles_post_ra>
// kernel: tile.23
= control target key start
LH: loop header
LB: loop body
LE: loop exit
PB: predicated region body
PF: predicated region fallthrough
CT: control target
= control target key end

     0   :  { %s64_s0 = inlined_call_operand.vmem [shape: f32[16], index: 0, kind: input, shape index: {}]   ;;  %s65_s1 = inlined_call_operand.vmem [shape: f32[64,16], index: 1, kind: output, shape index: {}]  }
   0x1   :  { %v4_v0 = vld [vmem:[%s64_s0] ss:$0 sm:$0xff] }
   0x2   :  { %5 = vst [vmem:[%s65_s1] sm:$0xff] %v4_v0  ;;  %20 = vst [vmem:[%s65_s1 + $0x8] sm:$0xff] %v4_v0 }
   0x3   :  { %21 = vst [vmem:[%s65_s1 + $0x10] sm:$0xff] %v4_v0  ;;  %22 = vst [vmem:[%s65_s1 + $0x18] sm:$0xff] %v4_v0 }
   0x4   :  { %23 = vst [vmem:[%s65_s1 + $0x20] sm:$0xff] %v4_v0  ;;  %24 = vst [vmem:[%s65_s1 + $0x28] sm:$0xff] %v4_v0 }
   0x5   :  { %25 = vst [vmem:[%s65_s1 + $0x30] sm:$0xff] %v4_v0  ;;  %26 = vst [vmem:[%s65_s1 + $0x38] sm:$0xff] %v4_v0 }

// kernel: tile.24
= control target key start
LH: loop header
LB: loop body
LE: loop exit
PB: predicated region body
PF: predicated region fallthrough
CT: control target
= control target key end

     0   :  { %vm4_vm0 = vcmask 1047556   ;;  %s176_s16 = smov 112   ;;  %s177_s19 = smov 80   ;;  %vm6_vm1 = vcmask 130048   ;;  %vm17_vm2 = vcmask 1048448   ;;  %vm28_vm3 = vcmask 917248   ;;  %s273_s0 = inlined_call_operand.vmem [shape: f32[64,16], index: 0, kind: input, shape index: {}]   ;;  %s274_s1 = inlined_call_operand.vmem [shape: f32[1,1024], index: 1, kind: output, shape index: {}]  }
   0x1   :  { %v148_v0 = vld [vmem:[%s273_s0 + $0x7] ss:$8 sm:$0xf]   ;;  %v152_v2 = vld [vmem:[%s273_s0 + $0x5] ss:$8 sm:$0xf]  }
   0x2   :  { %v149_v1 = vld [vmem:[%s273_s0 + $0x7] ss:$8 sm:$0xf0]   ;;  %v153_v4 = vld [vmem:[%s273_s0 + $0x5] ss:$8 sm:$0xf0]  }
   0x3   :  { %v14_v3 = vsel %vm4_vm0, %v149_v1, %v148_v0  ;;  %v150_v5 = vld [vmem:[%s273_s0 + $0x6] ss:$8 sm:$0xf]   ;;  %v36_v6 = vsel %vm4_vm0, %v153_v4, %v152_v2  ;;  %v154_v9 = vld [vmem:[%s273_s0 + $0x4] ss:$8 sm:$0xf]  }
   0x4   :  { %15 = vrot.lane.b32.xlu0 %v14_v3, %s176_s16  ;;  %v151_v7 = vld [vmem:[%s273_s0 + $0x6] ss:$8 sm:$0xf0]   ;;  %37 = vrot.lane.b32.xlu1 %v36_v6, %s177_s19  ;;  %v155_v10 = vld [vmem:[%s273_s0 + $0x4] ss:$8 sm:$0xf0]  }
   0x5   :  { %v25_v8 = vsel %vm4_vm0, %v151_v7, %v150_v5  ;;  %v47_v11 = vsel %vm4_vm0, %v155_v10, %v154_v9  ;;  %v156_v12 = vld [vmem:[%s273_s0 + $0x3] ss:$8 sm:$0xf]   ;;  %v158_v14 = vld [vmem:[%s273_s0 + $0x2] ss:$8 sm:$0xf]  }
   0x6   :  { %v157_v13 = vld [vmem:[%s273_s0 + $0x3] ss:$8 sm:$0xf0]   ;;  %s178_s30 = smov 96   ;;  %s179_s4 = smov 64   ;;  %vm39_vm4 = vcmask 786048  }
   0x7   :  { %v159_v15 = vld [vmem:[%s273_s0 + $0x2] ss:$8 sm:$0xf0]   ;;  %v58_v16 = vsel %vm4_vm0, %v157_v13, %v156_v12  ;;  %v160_v17 = vld [vmem:[%s273_s0 + $0x1] ss:$8 sm:$0xf]  }
   0x8   :  { %26 = vrot.lane.b32.xlu0 %v25_v8, %s178_s30  ;;  %48 = vrot.lane.b32.xlu1 %v47_v11, %s179_s4  ;;  %v161_v18 = vld [vmem:[%s273_s0 + $0x1] ss:$8 sm:$0xf0]   ;;  %v69_v19 = vsel %vm4_vm0, %v159_v15, %v158_v14  ;;  %v2_v20 = vld [vmem:[%s273_s0] ss:$8 sm:$0xf]  }
   0x9   :  { %v3_v21 = vld [vmem:[%s273_s0] ss:$8 sm:$0xf0]   ;;  %s180_s0 = smov 48   ;;  %s181_s13 = smov 32   ;;  %v80_v23 = vsel %vm4_vm0, %v161_v18, %v160_v17  ;;  %vm50_vm5 = vcmask 654848  }
   0xa   :  { %v5_v22 = vsel %vm4_vm0, %v3_v21, %v2_v20  ;;  %s182_s14 = smov 16   ;;  %vm61_vm6 = vcmask 523648   ;;  %vm72_vm7 = vcmask 392448   ;;  %vm83_vm8 = vcmask 261248  }
   0xb   :  { %7 = vst.msk [vmem:[#allocation0] ss:$8 sm:$0xf] %vm6_vm1, %v5_v22   ;;  %8 = vst.msk [vmem:[#allocation0] ss:$8 sm:$0xf0] %vm6_vm1, %v5_v22  }
   0xc   :  { %59 = vrot.lane.b32.xlu0 %v58_v16, %s180_s0  ;;  %70 = vrot.lane.b32.xlu1 %v69_v19, %s181_s13 }
  0x10   :  { %81 = vrot.lane.b32.xlu0 %v80_v23, %s182_s14 }
  0x76   :  { %v16_v24 = vpop.permute.xlu0 %15   ;;  %v38_v25 = vpop.permute.xlu1 %37  }
  0x77   :  { %18 = vst.msk [vmem:[#allocation0] ss:$8 sm:$0xf] %vm17_vm2, %v16_v24   ;;  %19 = vst.msk [vmem:[#allocation0] ss:$8 sm:$0xf0] %vm17_vm2, %v16_v24  }
  0x7a   :  { %v27_v26 = vpop.permute.xlu0 %26   ;;  %v49_v27 = vpop.permute.xlu1 %48  }
  0x7b   :  { %29 = vst.msk [vmem:[#allocation0] ss:$8 sm:$0xf] %vm28_vm3, %v27_v26   ;;  %30 = vst.msk [vmem:[#allocation0] ss:$8 sm:$0xf0] %vm28_vm3, %v27_v26  }
  0x7c   :  { %40 = vst.msk [vmem:[#allocation0] ss:$8 sm:$0xf] %vm39_vm4, %v38_v25   ;;  %41 = vst.msk [vmem:[#allocation0] ss:$8 sm:$0xf0] %vm39_vm4, %v38_v25  }
  0x7d   :  { %51 = vst.msk [vmem:[#allocation0] ss:$8 sm:$0xf] %vm50_vm5, %v49_v27   ;;  %52 = vst.msk [vmem:[#allocation0] ss:$8 sm:$0xf0] %vm50_vm5, %v49_v27  }
  0x7e   :  { %v60_v28 = vpop.permute.xlu0 %59   ;;  %v71_v29 = vpop.permute.xlu1 %70  }
  0x7f   :  { %62 = vst.msk [vmem:[#allocation0] ss:$8 sm:$0xf] %vm61_vm6, %v60_v28   ;;  %63 = vst.msk [vmem:[#allocation0] ss:$8 sm:$0xf0] %vm61_vm6, %v60_v28  }
  0x80   :  { %73 = vst.msk [vmem:[#allocation0] ss:$8 sm:$0xf] %vm72_vm7, %v71_v29   ;;  %74 = vst.msk [vmem:[#allocation0] ss:$8 sm:$0xf0] %vm72_vm7, %v71_v29  }
  0x82   :  { %v82_v30 = vpop.permute.xlu0 %81  }
  0x83   :  { %84 = vst.msk [vmem:[#allocation0] ss:$8 sm:$0xf] %vm83_vm8, %v82_v30   ;;  %85 = vst.msk [vmem:[#allocation0] ss:$8 sm:$0xf0] %vm83_vm8, %v82_v30  }
  0x8a   :  { %v90_v31 = vld [vmem:[#allocation0] sm:$0x1]  ;;  %v95_v32 = vld [vmem:[#allocation0 + $0x8] sm:$0x1]  ;;  %v101_v33 = vld [vmem:[#allocation0 + $0x10] sm:$0x1] }
  0x8b   :  { %93 = vst [vmem:[%s274_s1] sm:$0x1] %v90_v31  ;;  %162 = vst [vmem:[%s274_s1 + $0x1] sm:$0x1] %v95_v32  ;;  %v108_v34 = vld [vmem:[#allocation0 + $0x18] sm:$0x1] }
  0x8c   :  { %163 = vst [vmem:[%s274_s1 + $0x2] sm:$0x1] %v101_v33  ;;  %v115_v35 = vld [vmem:[#allocation0 + $0x20] sm:$0x1]  ;;  %v122_v36 = vld [vmem:[#allocation0 + $0x28] sm:$0x1] }
  0x8d   :  { %164 = vst [vmem:[%s274_s1 + $0x3] sm:$0x1] %v108_v34  ;;  %165 = vst [vmem:[%s274_s1 + $0x4] sm:$0x1] %v115_v35  ;;  %v129_v37 = vld [vmem:[#allocation0 + $0x30] sm:$0x1] }
  0x8e   :  { %166 = vst [vmem:[%s274_s1 + $0x5] sm:$0x1] %v122_v36  ;;  %v136_v38 = vld [vmem:[#allocation0 + $0x38] sm:$0x1]  ;;  %167 = vst [vmem:[%s274_s1 + $0x6] sm:$0x1] %v129_v37 }
  0x8f   :  { %168 = vst [vmem:[%s274_s1 + $0x7] sm:$0x1] %v136_v38 }

// kernel: layernet_forward.5
= control target key start
LH: loop header
LB: loop body
LE: loop exit
PB: predicated region body
PF: predicated region fallthrough
CT: control target
= control target key end

     0   :  { %v32_v0 = vlaneseq  ;;  %s304_s1 = inlined_call_operand.vmem [shape: f32[1,1024], index: 1, kind: input, shape index: {}]   ;;  %s305_s2 = inlined_call_operand.vmem [shape: f32[1,1024], index: 2, kind: input, shape index: {}]   ;;  %s306_s0 = inlined_call_operand.vmem [shape: f32[16,1024], index: 0, kind: input, shape index: {}, may-alias: {0,3}]   ;;  %s307_s3 = inlined_call_operand.vmem [shape: f32[16,1024], index: 3, kind: output, shape index: {}, may-alias: {0,3}]  }
   0x1   :  { %v30_v2 = vld [vmem:[%s304_s1] sm:$0xff]  ;;  %v15_v9 = vld [vmem:[%s306_s0 + $0x8] sm:$0xff]  ;;  %v16_v18 = vld [vmem:[%s306_s0 + $0x10] sm:$0xff] }
   0x2   :  { %v33_v1 = vshrl.u32 %v32_v0, 7  ;;  %v88_v3 = vld [vmem:[%s305_s2] sm:$0xff]  ;;  %v17_v19 = vld [vmem:[%s306_s0 + $0x18] sm:$0xff]  ;;  %v19_v29 = vld [vmem:[%s306_s0 + $0x28] sm:$0xff] }
   0x3   :  { %v14_v8 = vld [vmem:[%s306_s0] sm:$0xff]  ;;  %v20_v34 = vld [vmem:[%s306_s0 + $0x30] sm:$0xff]  ;;  %v21_v48 = vld [vmem:[%s306_s0 + $0x38] sm:$0xff] }
   0x4   :  { %v34_v4 = vsub.s32 0, %v33_v1  ;;  %v38_v5 = vsub.s32 1, %v33_v1  ;;  %v42_v6 = vsub.s32 2, %v33_v1  ;;  %v46_v7 = vsub.s32 3, %v33_v1  ;;  %v18_v24 = vld [vmem:[%s306_s0 + $0x20] sm:$0xff]  ;;  %v23_v49 = vld [vmem:[%s306_s0 + $0x48] sm:$0xff] }
   0x5   :  { %v50_v10 = vsub.s32 4, %v33_v1  ;;  %v54_v11 = vsub.s32 5, %v33_v1  ;;  %v58_v12 = vsub.s32 6, %v33_v1  ;;  %v62_v13 = vsub.s32 7, %v33_v1  ;;  %v22_v43 = vld [vmem:[%s306_s0 + $0x40] sm:$0xff]  ;;  %v24_v50 = vld [vmem:[%s306_s0 + $0x50] sm:$0xff] }
   0x6   :  { %v35_v14 = vrot.slane %v30_v2, %v34_v4  ;;  %v93_v15 = vrot.slane %v88_v3, %v34_v4  ;;  %v39_v16 = vrot.slane %v30_v2, %v38_v5  ;;  %v97_v17 = vrot.slane %v88_v3, %v38_v5  ;;  %v25_v55 = vld [vmem:[%s306_s0 + $0x58] sm:$0xff]  ;;  %v26_v56 = vld [vmem:[%s306_s0 + $0x60] sm:$0xff] }
   0x7   :  { %v43_v20 = vrot.slane %v30_v2, %v42_v6  ;;  %v101_v21 = vrot.slane %v88_v3, %v42_v6  ;;  %v47_v22 = vrot.slane %v30_v2, %v46_v7  ;;  %v105_v23 = vrot.slane %v88_v3, %v46_v7 }
   0x8   :  { %v72_v25 = vmul.f32 %v35_v14, %v14_v8  ;;  %v73_v26 = vmul.f32 %v39_v16, %v15_v9  ;;  %v51_v27 = vrot.slane %v30_v2, %v50_v10  ;;  %v109_v28 = vrot.slane %v88_v3, %v50_v10 }
   0x9   :  { %v74_v30 = vmul.f32 %v43_v20, %v16_v18  ;;  %v75_v31 = vmul.f32 %v47_v22, %v17_v19  ;;  %v55_v32 = vrot.slane %v30_v2, %v54_v11  ;;  %v113_v33 = vrot.slane %v88_v3, %v54_v11 }
   0xa   :  { %v130_v35 = vadd.f32 %v93_v15, %v72_v25  ;;  %v131_v36 = vadd.f32 %v97_v17, %v73_v26  ;;  %v76_v37 = vmul.f32 %v51_v27, %v18_v24  ;;  %v59_v38 = vrot.slane %v30_v2, %v58_v12 }
   0xb   :  { %v132_v39 = vadd.f32 %v101_v21, %v74_v30  ;;  %v133_v40 = vadd.f32 %v105_v23, %v75_v31  ;;  %v77_v41 = vmul.f32 %v55_v32, %v19_v29  ;;  %v117_v42 = vrot.slane %v88_v3, %v58_v12 }
   0xc   :  { %v146_v44 = vmax.f32 %v130_v35, 0.0  ;;  %v147_v45 = vmax.f32 %v131_v36, 0.0  ;;  %v134_v46 = vadd.f32 %v109_v28, %v76_v37  ;;  %v78_v47 = vmul.f32 %v59_v38, %v20_v34 }
   0xd   :  { %v148_v51 = vmax.f32 %v132_v39, 0.0  ;;  %v149_v52 = vmax.f32 %v133_v40, 0.0  ;;  %v135_v53 = vadd.f32 %v113_v33, %v77_v41  ;;  %v63_v54 = vrot.slane %v30_v2, %v62_v13 }
   0xe   :  { %162 = vst [vmem:[%s307_s3] sm:$0xff] %v146_v44  ;;  %163 = vst [vmem:[%s307_s3 + $0x8] sm:$0xff] %v147_v45  ;;  %v150_v57 = vmax.f32 %v134_v46, 0.0  ;;  %v136_v58 = vadd.f32 %v117_v42, %v78_v47  ;;  %v121_v59 = vrot.slane %v88_v3, %v62_v13  ;;  %v80_v60 = vmul.f32 %v35_v14, %v22_v43 }
   0xf   :  { %v151_v62 = vmax.f32 %v135_v53, 0.0  ;;  %v79_v63 = vmul.f32 %v63_v54, %v21_v48  ;;  %v81_v0 = vmul.f32 %v39_v16, %v23_v49  ;;  %v82_v1 = vmul.f32 %v43_v20, %v24_v50 }
  0x10   :  { %v152_v3 = vmax.f32 %v136_v58, 0.0  ;;  %v138_v4 = vadd.f32 %v93_v15, %v80_v60  ;;  %v83_v5 = vmul.f32 %v47_v22, %v25_v55  ;;  %v84_v6 = vmul.f32 %v51_v27, %v26_v56 }
  0x11   :  { %v137_v7 = vadd.f32 %v121_v59, %v79_v63  ;;  %v139_v8 = vadd.f32 %v97_v17, %v81_v0  ;;  %v140_v9 = vadd.f32 %v101_v21, %v82_v1 }
  0x12   :  { %v154_v12 = vmax.f32 %v138_v4, 0.0  ;;  %v141_v13 = vadd.f32 %v105_v23, %v83_v5  ;;  %v142_v14 = vadd.f32 %v109_v28, %v84_v6 }
  0x13   :  { %v153_v16 = vmax.f32 %v137_v7, 0.0  ;;  %v155_v18 = vmax.f32 %v139_v8, 0.0  ;;  %v156_v19 = vmax.f32 %v140_v9, 0.0 }
  0x14   :  { %v157_v17 = vmax.f32 %v141_v13, 0.0  ;;  %v158_v21 = vmax.f32 %v142_v14, 0.0 }
  0x15   :  { %v27_v61 = vld [vmem:[%s306_s0 + $0x68] sm:$0xff] }
  0x16   :  { %164 = vst [vmem:[%s307_s3 + $0x10] sm:$0xff] %v148_v51  ;;  %165 = vst [vmem:[%s307_s3 + $0x18] sm:$0xff] %v149_v52  ;;  %v85_v10 = vmul.f32 %v55_v32, %v27_v61 }
  0x18   :  { %v143_v20 = vadd.f32 %v113_v33, %v85_v10 }
  0x1a   :  { %v159_v23 = vmax.f32 %v143_v20, 0.0 }
  0x1d   :  { %v28_v2 = vld [vmem:[%s306_s0 + $0x70] sm:$0xff] }
  0x1e   :  { %166 = vst [vmem:[%s307_s3 + $0x20] sm:$0xff] %v150_v57  ;;  %167 = vst [vmem:[%s307_s3 + $0x28] sm:$0xff] %v151_v62  ;;  %v86_v15 = vmul.f32 %v59_v38, %v28_v2 }
  0x20   :  { %v144_v22 = vadd.f32 %v117_v42, %v86_v15 }
  0x22   :  { %v160_v25 = vmax.f32 %v144_v22, 0.0 }
  0x25   :  { %v29_v11 = vld [vmem:[%s306_s0 + $0x78] sm:$0xff] }
  0x26   :  { %168 = vst [vmem:[%s307_s3 + $0x30] sm:$0xff] %v152_v3  ;;  %170 = vst [vmem:[%s307_s3 + $0x40] sm:$0xff] %v154_v12  ;;  %v87_v24 = vmul.f32 %v63_v54, %v29_v11 }
  0x27   :  { %169 = vst [vmem:[%s307_s3 + $0x38] sm:$0xff] %v153_v16  ;;  %171 = vst [vmem:[%s307_s3 + $0x48] sm:$0xff] %v155_v18 }
  0x28   :  { %172 = vst [vmem:[%s307_s3 + $0x50] sm:$0xff] %v156_v19  ;;  %173 = vst [vmem:[%s307_s3 + $0x58] sm:$0xff] %v157_v17  ;;  %v145_v26 = vadd.f32 %v121_v59, %v87_v24 }
  0x29   :  { %174 = vst [vmem:[%s307_s3 + $0x60] sm:$0xff] %v158_v21  ;;  %175 = vst [vmem:[%s307_s3 + $0x68] sm:$0xff] %v159_v23 }
  0x2a   :  { %176 = vst [vmem:[%s307_s3 + $0x70] sm:$0xff] %v160_v25  ;;  %v161_v27 = vmax.f32 %v145_v26, 0.0 }
  0x2c   :  { %177 = vst [vmem:[%s307_s3 + $0x78] sm:$0xff] %v161_v27 }

// kernel: layernet_forward.4
= control target key start
LH: loop header
LB: loop body
LE: loop exit
PB: predicated region body
PF: predicated region fallthrough
CT: control target
= control target key end

     0   :  { %s5257_s18 = smov 0   ;;  %s5259_s19 = smov 0   ;;  %s6473_s0 = inlined_call_operand.vmem [shape: f32[20,10,10,4], index: 0, kind: input, shape index: {}, may-alias: {0,1,2}]   ;;  %s6474_s1 = inlined_call_operand.vmem [shape: f32[20,10,10,4], index: 1, kind: input, shape index: {}, may-alias: {0,1,2}]   ;;  %s6475_s2 = inlined_call_operand.vmem [shape: f32[20,10,10,4], index: 2, kind: input, shape index: {}, may-alias: {0,1,2}]   ;;  %s6476_s3 = inlined_call_operand.vmem [shape: f32[27,4,16], index: 3, kind: input, shape index: {}]   ;;  %s6477_s4 = inlined_call_operand.vmem [shape: f32[2,8,64,16], index: 4, kind: output, shape index: {0}]   ;;  %s6478_s5 = inlined_call_operand.vmem [shape: f32[2,8,2,16], index: 5, kind: output, shape index: {1}]  }
   0x1   :  { %s5261_s20 = smov 0   ;;  %s5263_s21 = smov 0  }
   0x2   :  { %s5265_s22 = smov 0  }
   0x3 LB: > { %s25_s23 = sadd.s32 1, %s5217_s20  ;;  %s28_s24 = sadd.s32 1, %s5221_s21  ;;  %s5225_s22 = sphi %s5265_s22, %s16_s22   ;;  %s5221_s21 = sphi %s5263_s21, %s6503_s21   ;;  %s5217_s20 = sphi %s5261_s20, %s6502_s20   ;;  %s5213_s19 = sphi %s5259_s19, %s6501_s19   ;;  %s5209_s18 = sphi %s5257_s18, %s6500_s18  }
   0x4   : > { %p26_p0 = scmp.ge.s32.totalorder %s25_s23, 8  ;;  %p4241_p1 = scmp.ge.s32.totalorder %s5225_s22, 1 }
   0x5   : > { %p258_p2 = scmp.lt.s32.totalorder %s5225_s22, 17 }
   0x6   : > { %s6505_s23 = smov (%p26_p0, %s25_s23), 0  ;;  %s6507_s24 = smov (!%p26_p0, %s28_s24), %s5221_s21 }
   0x7   : > { %p259_p3 = pnand %p4241_p1, %p258_p2  ;;  %p30_p4 = scmp.ge.s32.totalorder %s6507_s24, 2 }
   0x9   : > { %s6509_s24 = smov (%p30_p4, %s6507_s24), 0  ;;  %262 = sbr.rel (%p259_p3) target bundleno = 463 (0x1cf), region = 36 }
   0xe   : > { %v4250_v0 = vld [vmem:[%s6476_s3 + $0x4] sm:$0xf]  ;;  %vm485_vm0 = vcmask 1043456   ;;  %s316_s27 = smul.u32 10, %s5213_s19  ;;  %v424_v1 = vld [vmem:[%s6476_s3] sm:$0xf] }
   0xf   : > { %5142 = vmatprep.subr.msk.mxu1 %vm485_vm0, %v4250_v0  ;;  %4764 = vmatprep.subr.msk.mxu0 %vm485_vm0, %v4250_v0  ;;  %v4269_v2 = vld [vmem:[%s6476_s3 + $0x8] sm:$0xf]  ;;  %vm441_vm1 = vcmask 1046528   ;;  %vm468_vm2 = vcmask 31744   ;;  %vm718_vm3 = vcmask 1045504   ;;  %p347_p8 = scmp.lt.s32.totalorder %s5213_s19, 1 }
  0x10   : > { %5143 = vmatpush3.msk.msra.mxu1 %vm485_vm0, %v4250_v0  ;;  %4765 = vmatpush3.msk.msra.mxu0 %vm485_vm0, %v4250_v0  ;;  %s5306_s7 = sadd.s32 %s5209_s18, %s316_s27  ;;  %v4279_v28 = vld [vmem:[%s6476_s3 + $0xc] sm:$0xf]  ;;  %v4289_v44 = vld [vmem:[%s6476_s3 + $0x10] sm:$0xf]  ;;  %v4299_v58 = vld [vmem:[%s6476_s3 + $0x14] sm:$0xf] }
  0x11   : > { %p318_p5 = scmp.lt.s32.totalorder %s5306_s7, 19  ;;  %4778 = vmatprep.subr.msk.mxu1 %vm485_vm0, %v424_v1  ;;  %4792 = vmatprep.subr.msk.mxu0 %vm485_vm0, %v4269_v2  ;;  %v4309_v62 = vld [vmem:[%s6476_s3 + $0x18] sm:$0xf]  ;;  %s327_s13 = sadd.s32 1, %s5306_s7  ;;  %vm4017_vm4 = vcmask 130048   ;;  %vm4076_vm5 = vcmask 1040384  }
  0x12   : > { %p328_p6 = scmp.lt.s32.totalorder %s327_s13, 19  ;;  %p349_p9 = scmp.lt.s32.totalorder %s5209_s18, 7  ;;  %vm4078_vm6 = vcmask 123904  }
  0x13   : > { %s319_s8 = scalar_select %p318_p5, %s5306_s7, 19 }
  0x14   : > { %s6511_s13 = smov (!%p328_p6, %s327_s13), 19  ;;  %s6515_s19 = smov (!%p347_p8, %s5213_s19), 1 }
  0x15   : > { %s5144_s9 = smul.u32 160, %s319_s8  ;;  %s6517_s18 = smov (!%p349_p9, %s5209_s18), 7 }
  0x16   : > { %s5145_s14 = smul.u32 160, %s6511_s13  ;;  %s4248_s8 = sshll.u32 %s6515_s19, 3 }
  0x17   : > { %s5315_s12 = scalar_lea.vmem %s6473_s0, %s5144_s9 }
  0x18   : > { %v5318_v3 = vld [vmem:[%s5315_s12] sm:$0xff]  ;;  %v365_v4 = vld [vmem:[%s5315_s12 + $0x8] sm:$0x3]  ;;  %v5331_v12 = vld [vmem:[%s5315_s12 + $0x10] sm:$0xff]  ;;  %s5584_s17 = scalar_lea.vmem %s6474_s1, %s5145_s14 }
  0x19   : > { %v5322_v5 = vld [vmem:[%s5315_s12 + $0x40] sm:$0xff]  ;;  %v442_v6 = vrot.slane %v5318_v3, 1  ;;  %v443_v7 = vrot.slane %v365_v4, 1  ;;  %v720_v8 = vrot.slane %v365_v4, 2  ;;  %v5326_v9 = vld [vmem:[%s5315_s12 + $0x48] sm:$0x3] }
  0x1a   : > { %v454_v10 = vrot.slane %v5322_v5, 1  ;;  %v455_v11 = vrot.slane %v5326_v9, 1  ;;  %v367_v13 = vld [vmem:[%s5315_s12 + $0x18] sm:$0x3]  ;;  %v5335_v14 = vld [vmem:[%s5315_s12 + $0x50] sm:$0xff]  ;;  %v719_v15 = vrot.slane %v5318_v3, 2 }
  0x1b   : > { %v444_v16 = vsel %vm441_vm1, %v442_v6, %v443_v7  ;;  %v445_v17 = vrot.slane %v5331_v12, 1  ;;  %v446_v18 = vrot.slane %v367_v13, 1  ;;  %v723_v19 = vrot.slane %v367_v13, 2  ;;  %v5341_v20 = vld [vmem:[%s5315_s12 + $0x58] sm:$0x3]  ;;  %v5344_v21 = vld [vmem:[%s5315_s12 + $0x20] sm:$0xff] }
  0x1c   : > { %4766 = vmatprep.mubr.msk.f32.mxu0 %vm468_vm2, %v444_v16  ;;  %v5348_v22 = vsel %vm441_vm1, %v454_v10, %v455_v11  ;;  %v457_v23 = vrot.slane %v5335_v14, 1  ;;  %v458_v24 = vrot.slane %v5341_v20, 1  ;;  %v369_v25 = vld [vmem:[%s5315_s12 + $0x28] sm:$0x3]  ;;  %v448_v26 = vrot.slane %v5344_v21, 1  ;;  %v5355_v27 = vld [vmem:[%s5315_s12 + $0x60] sm:$0xff] }
  0x1d   : > { %4772 = vmatprep.mubr.msk.f32.mxu1 %vm468_vm2, %v5348_v22  ;;  %v5363_v29 = vsel %vm441_vm1, %v445_v17, %v446_v18  ;;  %v449_v30 = vrot.slane %v369_v25, 1  ;;  %v5366_v31 = vld [vmem:[%s5315_s12 + $0x68] sm:$0x3]  ;;  %v460_v32 = vrot.slane %v5355_v27, 1  ;;  %v5370_v33 = vld [vmem:[%s5315_s12 + $0x30] sm:$0xff]  ;;  %v721_v46 = vsel %vm718_vm3, %v719_v15, %v720_v8  ;;  %v380_v10 = vld [vmem:[%s5315_s12 + $0x80] sm:$0xff] }
  0x1e   : > { %v5373_v34 = vld [vmem:[%s5315_s12 + $0x70] sm:$0xff]  ;;  %4767 = vmatmul.mubr.msk.f32.vlgmr.msra.gmra.mxu0 %vm468_vm2, %v5363_v29  ;;  %v5378_v35 = vsel %vm441_vm1, %v457_v23, %v458_v24  ;;  %v461_v36 = vrot.slane %v5366_v31, 1  ;;  %v371_v37 = vld [vmem:[%s5315_s12 + $0x38] sm:$0x3]  ;;  %v451_v38 = vrot.slane %v5370_v33, 1  ;;  %v722_v47 = vrot.slane %v5331_v12, 2 }
  0x1f   : > { %v379_v39 = vld [vmem:[%s5315_s12 + $0x78] sm:$0x3]  ;;  %4773 = vmatmul.mubr.msk.f32.vlgmr.msra.gmra.mxu1 %vm468_vm2, %v5378_v35  ;;  %4793 = vmatpush3.msk.msra.mxu0 %vm485_vm0, %v4269_v2  ;;  %v5388_v40 = vsel %vm441_vm1, %v448_v26, %v449_v30  ;;  %v452_v41 = vrot.slane %v371_v37, 1  ;;  %v463_v42 = vrot.slane %v5373_v34, 1  ;;  %v725_v50 = vrot.slane %v5344_v21, 2  ;;  %v5604_v24 = vld [vmem:[%s5584_s17] sm:$0xff] }
  0x20   : > { %v464_v43 = vrot.slane %v379_v39, 1  ;;  %4779 = vmatpush3.msk.msra.mxu1 %vm485_vm0, %v424_v1  ;;  %4769 = vmatprep.mubr.msk.f32.mxu0 %vm468_vm2, %v5388_v40  ;;  %v5398_v45 = vsel %vm441_vm1, %v460_v32, %v461_v36  ;;  %v726_v51 = vrot.slane %v369_v25, 2  ;;  %v5419_v52 = vsel %vm718_vm3, %v722_v47, %v723_v19  ;;  %v4319_v8 = vld [vmem:[%s6476_s3 + $0x1c] sm:$0xf]  ;;  %v381_v11 = vld [vmem:[%s5315_s12 + $0x88] sm:$0x3] }
  0x21   : > { %4775 = vmatprep.mubr.msk.f32.mxu1 %vm468_vm2, %v5398_v45  ;;  %v5405_v48 = vsel %vm441_vm1, %v451_v38, %v452_v41  ;;  %4806 = vmatprep.subr.msk.mxu1 %vm485_vm0, %v4279_v28  ;;  %v728_v53 = vrot.slane %v5370_v33, 2  ;;  %v729_v54 = vrot.slane %v371_v37, 2  ;;  %v731_v55 = vrot.slane %v5322_v5, 2  ;;  %v4339_v16 = vld [vmem:[%s6476_s3 + $0x24] sm:$0xf] }
  0x22   : > { %v5408_v49 = vsel %vm441_vm1, %v463_v42, %v464_v43  ;;  %4770 = vmatmul.mubr.msk.f32.gmra.mxu0 %vm468_vm2, %v5405_v48  ;;  %4820 = vmatprep.subr.msk.mxu0 %vm485_vm0, %v4289_v44  ;;  %v732_v56 = vrot.slane %v5326_v9, 2  ;;  %v5429_v57 = vsel %vm718_vm3, %v725_v50, %v726_v51  ;;  %v734_v60 = vrot.slane %v5335_v14, 2  ;;  %v4329_v9 = vld [vmem:[%s6476_s3 + $0x20] sm:$0xf]  ;;  %v4349_v17 = vld [vmem:[%s6476_s3 + $0x28] sm:$0xf] }
  0x23   : > { %4776 = vmatmul.mubr.msk.f32.gmra.mxu1 %vm468_vm2, %v5408_v49  ;;  %4794 = vmatprep.mubr.msk.f32.mxu0 %vm468_vm2, %v721_v46  ;;  %v5438_v59 = vsel %vm718_vm3, %v728_v53, %v729_v54  ;;  %v735_v61 = vrot.slane %v5341_v20, 2  ;;  %v737_v0 = vrot.slane %v5355_v27, 2  ;;  %v738_v1 = vrot.slane %v5366_v31, 2  ;;  %v5589_v20 = vld [vmem:[%s6476_s3 + $0x2c] sm:$0xf]  ;;  %v5638_v36 = vld [vmem:[%s5584_s17 + $0x20] sm:$0xff] }
  0x24   : > { %4780 = vmatprep.mubr.msk.f32.mxu1 %vm468_vm2, %v5318_v3  ;;  %v5449_v63 = vsel %vm718_vm3, %v731_v55, %v732_v56  ;;  %v740_v3 = vrot.slane %v5373_v34, 2  ;;  %v741_v4 = vrot.slane %v379_v39, 2  ;;  %v1000_v13 = vrot.slane %v381_v11, 1  ;;  %v383_v23 = vld [vmem:[%s5315_s12 + $0x98] sm:$0x3]  ;;  %v5660_v42 = vld [vmem:[%s5584_s17 + $0x40] sm:$0xff] }
  0x25   : > { %v5464_v2 = vsel %vm718_vm3, %v734_v60, %v735_v61  ;;  %v5470_v6 = vsel %vm718_vm3, %v737_v0, %v738_v1  ;;  %v1122_v18 = vrot.slane %v380_v10, 2  ;;  %v1123_v19 = vrot.slane %v381_v11, 2  ;;  %v5607_v25 = vld [vmem:[%s5584_s17 + $0x8] sm:$0x3]  ;;  %v5626_v32 = vld [vmem:[%s5584_s17 + $0x18] sm:$0x3] }
  0x26   : > { %4795 = vmatmul.mubr.msk.f32.vlgmr.msra.gmra.mxu0 %vm468_vm2, %v5419_v52  ;;  %v5479_v7 = vsel %vm718_vm3, %v740_v3, %v741_v4  ;;  %v1763_v30 = vrot.slane %v5604_v24, 1  ;;  %v1764_v31 = vrot.slane %v5607_v25, 1  ;;  %v5641_v37 = vld [vmem:[%s5584_s17 + $0x28] sm:$0x3]  ;;  %v5651_v41 = vld [vmem:[%s5584_s17 + $0x38] sm:$0x3] }
  0x27   : > { %4781 = vmatmul.mubr.msk.f32.vlgmr.msra.gmra.mxu1 %vm468_vm2, %v5331_v12  ;;  %4821 = vmatpush3.msk.msra.mxu0 %vm485_vm0, %v4289_v44  ;;  %v5663_v43 = vld [vmem:[%s5584_s17 + $0x48] sm:$0x3]  ;;  %v1769_v44 = vrot.slane %v5638_v36, 1  ;;  %v5680_v51 = vld [vmem:[%s5584_s17 + $0x50] sm:$0xff]  ;;  %v5692_v53 = vld [vmem:[%s5584_s17 + $0x60] sm:$0xff] }
  0x28   : > { %4807 = vmatpush3.msk.msra.mxu1 %vm485_vm0, %v4279_v28  ;;  %4783 = vmatprep.mubr.msk.f32.mxu1 %vm468_vm2, %v5344_v21  ;;  %v1765_v39 = vsel %vm441_vm1, %v1763_v30, %v1764_v31  ;;  %v1776_v50 = vrot.slane %v5663_v43, 1  ;;  %v5695_v54 = vld [vmem:[%s5584_s17 + $0x68] sm:$0x3]  ;;  %v4379_v56 = vld [vmem:[%s6476_s3 + $0x34] sm:$0xf]  ;;  %v1936_v31 = vrot.slane %v5680_v51, 2 }
  0x29   : > { %4797 = vmatprep.mubr.msk.f32.mxu0 %vm468_vm2, %v5429_v57  ;;  %4834 = vmatprep.subr.msk.mxu1 %vm485_vm0, %v4299_v58  ;;  %v4389_v60 = vld [vmem:[%s6476_s3 + $0x38] sm:$0xf]  ;;  %v5726_v0 = vld [vmem:[%s5584_s17 + $0x70] sm:$0xff] }
  0x2a   : > { %4798 = vmatmul.mubr.msk.f32.gmra.mxu0 %vm468_vm2, %v5438_v59  ;;  %4848 = vmatprep.subr.msk.mxu0 %vm485_vm0, %v4309_v62  ;;  %v5729_v1 = vld [vmem:[%s5584_s17 + $0x78] sm:$0x3]  ;;  %v1784_v3 = vrot.slane %v5726_v0, 1 }
  0x2b   : > { %4784 = vmatmul.mubr.msk.f32.gmra.mxu1 %vm468_vm2, %v5370_v33  ;;  %4800 = vmatprep.mubr.msk.f32.mxu0 %vm468_vm2, %v5449_v63  ;;  %v1785_v4 = vrot.slane %v5729_v1, 1 }
  0x2c   : > { %4786 = vmatprep.mubr.msk.f32.mxu1 %vm468_vm2, %v5322_v5 }
  0x2e   : > { %4801 = vmatmul.mubr.msk.f32.gmra.mxu0 %vm468_vm2, %v5464_v2 }
  0x2f   : > { %4787 = vmatmul.mubr.msk.f32.gmra.mxu1 %vm468_vm2, %v5335_v14  ;;  %4803 = vmatprep.mubr.msk.f32.mxu0 %vm468_vm2, %v5470_v6 }
  0x30   : > { %4789 = vmatprep.mubr.msk.f32.mxu1 %vm468_vm2, %v5355_v27 }
  0x32   : > { %4804 = vmatmul.mubr.msk.f32.gmra.mxu0 %vm468_vm2, %v5479_v7 }
  0x33   : > { %4790 = vmatmul.mubr.msk.f32.gmra.mxu1 %vm468_vm2, %v5373_v34  ;;  %4822 = vmatprep.mubr.msk.f32.mxu0 %vm468_vm2, %v5363_v29  ;;  %v1368_v29 = vrot.slane %v383_v23, 1 }
  0x34   : > { %4808 = vmatprep.mubr.msk.f32.mxu1 %vm468_vm2, %v5331_v12  ;;  %v999_v12 = vrot.slane %v380_v10, 1 }
  0x36   : > { %4823 = vmatmul.mubr.msk.f32.vlgmr.msra.gmra.mxu0 %vm468_vm2, %v5388_v40  ;;  %v5526_v15 = vsel %vm441_vm1, %v999_v12, %v1000_v13  ;;  %v5771_v12 = vsel %vm441_vm1, %v1784_v3, %v1785_v4 }
  0x37   : > { %4809 = vmatmul.mubr.msk.f32.vlgmr.msra.gmra.mxu1 %vm468_vm2, %v5344_v21  ;;  %4849 = vmatpush3.msk.msra.mxu0 %vm485_vm0, %v4309_v62  ;;  %v1781_v62 = vrot.slane %v5692_v53, 1 }
  0x38   : > { %4835 = vmatpush3.msk.msra.mxu1 %vm485_vm0, %v4299_v58  ;;  %4811 = vmatprep.mubr.msk.f32.mxu1 %vm468_vm2, %v5370_v33  ;;  %v1778_v58 = vrot.slane %v5680_v51, 1 }
  0x39   : > { %4825 = vmatprep.mubr.msk.f32.mxu0 %vm468_vm2, %v5405_v48  ;;  %4862 = vmatprep.subr.msk.mxu1 %vm485_vm0, %v4319_v8 }
  0x3a   : > { %4826 = vmatmul.mubr.msk.f32.gmra.mxu0 %vm468_vm2, %v5348_v22  ;;  %4876 = vmatprep.subr.msk.mxu0 %vm485_vm0, %v4329_v9 }
  0x3b   : > { %4812 = vmatmul.mubr.msk.f32.gmra.mxu1 %vm468_vm2, %v5322_v5  ;;  %4828 = vmatprep.mubr.msk.f32.mxu0 %vm468_vm2, %v5378_v35 }
  0x3c   : > { %4814 = vmatprep.mubr.msk.f32.mxu1 %vm468_vm2, %v5335_v14 }
  0x3e   : > { %4829 = vmatmul.mubr.msk.f32.gmra.mxu0 %vm468_vm2, %v5398_v45 }
  0x3f   : > { %4815 = vmatmul.mubr.msk.f32.gmra.mxu1 %vm468_vm2, %v5355_v27  ;;  %4831 = vmatprep.mubr.msk.f32.mxu0 %vm468_vm2, %v5408_v49 }
  0x40   : > { %4817 = vmatprep.mubr.msk.f32.mxu1 %vm468_vm2, %v5373_v34 }
  0x42   : > { %4832 = vmatmul.mubr.msk.f32.gmra.mxu0 %vm468_vm2, %v5526_v15 }
  0x43   : > { %4818 = vmatmul.mubr.msk.f32.gmra.mxu1 %vm468_vm2, %v380_v10  ;;  %4850 = vmatprep.mubr.msk.f32.mxu0 %vm468_vm2, %v5344_v21  ;;  %v4369_v21 = vld [vmem:[%s6476_s3 + $0x30] sm:$0xf] }
  0x44   : > { %4836 = vmatprep.mubr.msk.f32.mxu1 %vm468_vm2, %v5419_v52  ;;  %v5683_v52 = vld [vmem:[%s5584_s17 + $0x58] sm:$0x3] }
  0x46   : > { %4851 = vmatmul.mubr.msk.f32.vlgmr.msra.gmra.mxu0 %vm468_vm2, %v5370_v33 }
  0x47   : > { %4837 = vmatmul.mubr.msk.f32.vlgmr.msra.gmra.mxu1 %vm468_vm2, %v5429_v57  ;;  %4877 = vmatpush3.msk.msra.mxu0 %vm485_vm0, %v4329_v9 }
  0x48   : > { %4863 = vmatpush3.msk.msra.mxu1 %vm485_vm0, %v4319_v8  ;;  %4839 = vmatprep.mubr.msk.f32.mxu1 %vm468_vm2, %v5438_v59  ;;  %v1922_v8 = vrot.slane %v5607_v25, 2  ;;  %v1931_v25 = vrot.slane %v5651_v41, 2 }
  0x49   : > { %4853 = vmatprep.mubr.msk.f32.mxu0 %vm468_vm2, %v5322_v5  ;;  %4890 = vmatprep.subr.msk.mxu1 %vm485_vm0, %v4339_v16  ;;  %v382_v5 = vld [vmem:[%s5315_s12 + $0x90] sm:$0xff]  ;;  %s338_s12 = sadd.s32 2, %s5306_s7 }
  0x4a   : > { %4854 = vmatmul.mubr.msk.f32.gmra.mxu0 %vm468_vm2, %v5335_v14  ;;  %4904 = vmatprep.subr.msk.mxu0 %vm485_vm0, %v4349_v17  ;;  %v1124_v14 = vsel %vm718_vm3, %v1122_v18, %v1123_v19  ;;  %v1490_v26 = vrot.slane %v382_v5, 2  ;;  %v1367_v28 = vrot.slane %v382_v5, 1  ;;  %p5655_p7 = scmp.lt.s32.totalorder %s338_s12, 19 }
  0x4b   : > { %4840 = vmatmul.mubr.msk.f32.gmra.mxu1 %vm468_vm2, %v5449_v63  ;;  %4856 = vmatprep.mubr.msk.f32.mxu0 %vm468_vm2, %v5355_v27  ;;  %v5619_v27 = vld [vmem:[%s5584_s17 + $0x10] sm:$0xff] }
  0x4c   : > { %4842 = vmatprep.mubr.msk.f32.mxu1 %vm468_vm2, %v5464_v2  ;;  %v1369_v38 = vsel %vm441_vm1, %v1367_v28, %v1368_v29  ;;  %s6513_s12 = smov (!%p5655_p7, %s338_s12), 19  ;;  %v1934_v28 = vrot.slane %v5663_v43, 2  ;;  %v4409_v29 = vld [vmem:[%s6476_s3 + $0x40] sm:$0xf] }
  0x4d   : > { %s5146_s9 = smul.u32 160, %s6513_s12  ;;  %v400_v43 = vld [vmem:[%s5584_s17 + $0x80] sm:$0xff]  ;;  %s4246_s12 = sshll.u32 %s6515_s19, 6 }
  0x4e   : > { %4857 = vmatmul.mubr.msk.f32.gmra.mxu0 %vm468_vm2, %v5373_v34  ;;  %v1766_v34 = vrot.slane %v5619_v27, 1 }
  0x4f   : > { %4843 = vmatmul.mubr.msk.f32.gmra.mxu1 %vm468_vm2, %v5470_v6  ;;  %4859 = vmatprep.mubr.msk.f32.mxu0 %vm468_vm2, %v380_v10  ;;  %s5755_s13 = scalar_lea.vmem %s6475_s2, %s5146_s9  ;;  %s361_s9 = sadd.s32 %s4248_s8, %s6517_s18 }
  0x50   : > { %4845 = vmatprep.mubr.msk.f32.mxu1 %vm468_vm2, %v5479_v7  ;;  %v5760_v9 = vld [vmem:[%s5755_s13 + $0x90] sm:$0xff]  ;;  %v423_v13 = vld [vmem:[%s5755_s13 + $0x98] sm:$0x3]  ;;  %v5994_v3 = vld [vmem:[%s5755_s13 + $0x60] sm:$0xff]  ;;  %s4249_s10 = sshll.u32 %s361_s9, 1 }
  0x51   : > { %v3771_v10 = vrot.slane %v5760_v9, 1  ;;  %v3894_v11 = vrot.slane %v5760_v9, 2  ;;  %v3895_v18 = vrot.slane %v423_v13, 2  ;;  %s363_s15 = scalar_lea.vmem %s6478_s5, %s4249_s10 }
  0x52   : > { %4860 = vmatmul.mubr.msk.f32.gmra.mxu0 %vm468_vm2, %v382_v5  ;;  %v1927_v5 = vrot.slane %v5638_v36, 2 }
  0x53   : > { %4846 = vmatmul.mubr.msk.f32.gmra.mxu1 %vm468_vm2, %v1124_v14  ;;  %4878 = vmatprep.mubr.msk.f32.mxu0 %vm468_vm2, %v5429_v57 }
  0x54   : > { %4864 = vmatprep.mubr.msk.f32.mxu1 %vm468_vm2, %v5388_v40  ;;  %v5648_v40 = vld [vmem:[%s5584_s17 + $0x30] sm:$0xff] }
  0x55   : > { %v1772_v47 = vrot.slane %v5648_v40, 1 }
  0x56   : > { %4879 = vmatmul.mubr.msk.f32.vlgmr.msra.gmra.mxu0 %vm468_vm2, %v5438_v59  ;;  %v1779_v59 = vrot.slane %v5683_v52, 1 }
  0x57   : > { %4865 = vmatmul.mubr.msk.f32.vlgmr.msra.gmra.mxu1 %vm468_vm2, %v5405_v48  ;;  %4905 = vmatpush3.msk.msra.mxu0 %vm485_vm0, %v4349_v17  ;;  %v1773_v48 = vrot.slane %v5651_v41, 1  ;;  %v3772_v17 = vrot.slane %v423_v13, 1  ;;  %v409_v13 = vld [vmem:[%s5755_s13 + $0x28] sm:$0x3] }
  0x58   : > { %4891 = vmatpush3.msk.msra.mxu1 %vm485_vm0, %v4339_v16  ;;  %4867 = vmatprep.mubr.msk.f32.mxu1 %vm468_vm2, %v5348_v22  ;;  %v1491_v22 = vrot.slane %v383_v23, 2  ;;  %v1925_v16 = vrot.slane %v5626_v32, 2 }
  0x59   : > { %4881 = vmatprep.mubr.msk.f32.mxu0 %vm468_vm2, %v5449_v63  ;;  %4918 = vmatprep.subr.msk.mxu1 %vm485_vm0, %v5589_v20  ;;  %v5709_v57 = vsel %vm441_vm1, %v1772_v47, %v1773_v48  ;;  %v1782_v63 = vrot.slane %v5695_v54, 1  ;;  %v4429_v47 = vld [vmem:[%s6476_s3 + $0x48] sm:$0xf]  ;;  %v2324_v48 = vrot.slane %v400_v43, 2 }
  0x5a   : > { %4882 = vmatmul.mubr.msk.f32.gmra.mxu0 %vm468_vm2, %v5464_v2  ;;  %4932 = vmatprep.subr.msk.mxu0 %vm485_vm0, %v4369_v21  ;;  %v1492_v33 = vsel %vm718_vm3, %v1490_v26, %v1491_v22  ;;  %v5743_v2 = vsel %vm441_vm1, %v1778_v58, %v1779_v59  ;;  %v1933_v22 = vrot.slane %v5660_v42, 2  ;;  %v4439_v58 = vld [vmem:[%s6476_s3 + $0x4c] sm:$0xf]  ;;  %v4449_v59 = vld [vmem:[%s6476_s3 + $0x50] sm:$0xf] }
  0x5b   : > { %4868 = vmatmul.mubr.msk.f32.gmra.mxu1 %vm468_vm2, %v5378_v35  ;;  %4884 = vmatprep.mubr.msk.f32.mxu0 %vm468_vm2, %v5470_v6  ;;  %v1767_v35 = vrot.slane %v5626_v32, 1  ;;  %v5750_v6 = vsel %vm441_vm1, %v1781_v62, %v1782_v63  ;;  %v1937_v32 = vrot.slane %v5683_v52, 2  ;;  %v5967_v62 = vld [vmem:[%s5755_s13 + $0x30] sm:$0xff]  ;;  %v4469_v63 = vld [vmem:[%s6476_s3 + $0x58] sm:$0xf] }
  0x5c   : > { %4870 = vmatprep.mubr.msk.f32.mxu1 %vm468_vm2, %v5398_v45  ;;  %v1770_v45 = vrot.slane %v5641_v37, 1 }
  0x5d   : > { %v5671_v46 = vsel %vm441_vm1, %v1766_v34, %v1767_v35  ;;  %v1939_v34 = vrot.slane %v5692_v53, 2  ;;  %v1940_v35 = vrot.slane %v5695_v54, 2 }
  0x5e   : > { %4885 = vmatmul.mubr.msk.f32.gmra.mxu0 %vm468_vm2, %v5479_v7  ;;  %v5700_v55 = vsel %vm441_vm1, %v1769_v44, %v1770_v45  ;;  %v1921_v7 = vrot.slane %v5604_v24, 2  ;;  %v4419_v45 = vld [vmem:[%s6476_s3 + $0x44] sm:$0xf] }
  0x5f   : > { %4871 = vmatmul.mubr.msk.f32.gmra.mxu1 %vm468_vm2, %v5408_v49  ;;  %4887 = vmatprep.mubr.msk.f32.mxu0 %vm468_vm2, %v1124_v14  ;;  %v1775_v49 = vrot.slane %v5660_v42, 1  ;;  %v1928_v14 = vrot.slane %v5641_v37, 2  ;;  %v5838_v37 = vsel %vm718_vm3, %v1936_v31, %v1937_v32  ;;  %v5843_v41 = vsel %vm718_vm3, %v1939_v34, %v1940_v35 }
  0x60   : > { %4873 = vmatprep.mubr.msk.f32.mxu1 %vm468_vm2, %v5526_v15  ;;  %v1924_v15 = vrot.slane %v5619_v27, 2  ;;  %v1923_v19 = vsel %vm718_vm3, %v1921_v7, %v1922_v8  ;;  %v3132_v32 = vrot.slane %v5967_v62, 2 }
  0x61   : > { %v5721_v61 = vsel %vm441_vm1, %v1775_v49, %v1776_v50  ;;  %v5798_v26 = vsel %vm718_vm3, %v1927_v5, %v1928_v14  ;;  %v2201_v50 = vrot.slane %v400_v43, 1 }
  0x62   : > { %4888 = vmatmul.mubr.msk.f32.gmra.mxu0 %vm468_vm2, %v1492_v33  ;;  %v1926_v23 = vsel %vm718_vm3, %v1924_v15, %v1925_v16  ;;  %v5823_v33 = vsel %vm718_vm3, %v1933_v22, %v1934_v28  ;;  %v6008_v16 = vld [vmem:[%s5755_s13 + $0x70] sm:$0xff]  ;;  %v413_v22 = vld [vmem:[%s5755_s13 + $0x48] sm:$0x3] }
  0x63   : > { %4874 = vmatmul.mubr.msk.f32.gmra.mxu1 %vm468_vm2, %v1369_v38  ;;  %4906 = vmatprep.mubr.msk.f32.mxu0 %vm468_vm2, %v1765_v39  ;;  %v1942_v38 = vrot.slane %v5726_v0, 2  ;;  %v1943_v39 = vrot.slane %v5729_v1, 2  ;;  %v405_v1 = vld [vmem:[%s5755_s13 + $0x8] sm:$0x3] }
  0x64   : > { %4892 = vmatprep.mubr.msk.f32.mxu1 %vm468_vm2, %v5604_v24  ;;  %v1930_v24 = vrot.slane %v5648_v40, 2  ;;  %v3124_v8 = vrot.slane %v405_v1, 2 }
  0x65   : > { %v5855_v44 = vsel %vm718_vm3, %v1942_v38, %v1943_v39  ;;  %v415_v38 = vld [vmem:[%s5755_s13 + $0x58] sm:$0x3] }
  0x66   : > { %4907 = vmatmul.mubr.msk.f32.vlgmr.msra.gmra.mxu0 %vm468_vm2, %v5671_v46  ;;  %v5816_v30 = vsel %vm718_vm3, %v1930_v24, %v1931_v25 }
  0x67   : > { %4893 = vmatmul.mubr.msk.f32.vlgmr.msra.gmra.mxu1 %vm468_vm2, %v5619_v27  ;;  %4933 = vmatpush3.msk.msra.mxu0 %vm485_vm0, %v4369_v21  ;;  %v5787_v21 = vsel %vm718_vm3, %v3894_v11, %v3895_v18  ;;  %v411_v18 = vld [vmem:[%s5755_s13 + $0x38] sm:$0x3] }
  0x68   : > { %4919 = vmatpush3.msk.msra.mxu1 %vm485_vm0, %v5589_v20  ;;  %4895 = vmatprep.mubr.msk.f32.mxu1 %vm468_vm2, %v5638_v36  ;;  %v5784_v20 = vsel %vm441_vm1, %v3771_v10, %v3772_v17  ;;  %v407_v10 = vld [vmem:[%s5755_s13 + $0x18] sm:$0x3] }
  0x69   : > { %4909 = vmatprep.mubr.msk.f32.mxu0 %vm468_vm2, %v5700_v55  ;;  %4946 = vmatprep.subr.msk.mxu1 %vm485_vm0, %v4379_v56  ;;  %v3127_v17 = vrot.slane %v407_v10, 2 }
  0x6a   : > { %4910 = vmatmul.mubr.msk.f32.gmra.mxu0 %vm468_vm2, %v5709_v57  ;;  %4960 = vmatprep.subr.msk.mxu0 %vm485_vm0, %v4389_v60 }
  0x6b   : > { %4896 = vmatmul.mubr.msk.f32.gmra.mxu1 %vm468_vm2, %v5648_v40  ;;  %4912 = vmatprep.mubr.msk.f32.mxu0 %vm468_vm2, %v5721_v61 }
  0x6c   : > { %4898 = vmatprep.mubr.msk.f32.mxu1 %vm468_vm2, %v5660_v42 }
  0x6e   : > { %4913 = vmatmul.mubr.msk.f32.gmra.mxu0 %vm468_vm2, %v5743_v2 }
  0x6f   : > { %4899 = vmatmul.mubr.msk.f32.gmra.mxu1 %vm468_vm2, %v5680_v51  ;;  %4915 = vmatprep.mubr.msk.f32.mxu0 %vm468_vm2, %v5750_v6 }
  0x70   : > { %4901 = vmatprep.mubr.msk.f32.mxu1 %vm468_vm2, %v5692_v53 }
  0x72   : > { %4916 = vmatmul.mubr.msk.f32.gmra.mxu0 %vm468_vm2, %v5771_v12 }
  0x73   : > { %4902 = vmatmul.mubr.msk.f32.gmra.mxu1 %vm468_vm2, %v5726_v0  ;;  %4934 = vmatprep.mubr.msk.f32.mxu0 %vm468_vm2, %v5619_v27  ;;  %v4399_v27 = vld [vmem:[%s6476_s3 + $0x3c] sm:$0xf] }
  0x74   : > { %4920 = vmatprep.mubr.msk.f32.mxu1 %vm468_vm2, %v1923_v19 }
  0x76   : > { %4935 = vmatmul.mubr.msk.f32.vlgmr.msra.gmra.mxu0 %vm468_vm2, %v5638_v36 }
  0x77   : > { %4921 = vmatmul.mubr.msk.f32.vlgmr.msra.gmra.mxu1 %vm468_vm2, %v1926_v23  ;;  %4961 = vmatpush3.msk.msra.mxu0 %vm485_vm0, %v4389_v60  ;;  %v5956_v60 = vld [vmem:[%s5755_s13 + $0x20] sm:$0xff] }
  0x78   : > { %4947 = vmatpush3.msk.msra.mxu1 %vm485_vm0, %v4379_v56  ;;  %4923 = vmatprep.mubr.msk.f32.mxu1 %vm468_vm2, %v5798_v26  ;;  %v2971_v25 = vrot.slane %v5956_v60, 1  ;;  %v3129_v28 = vrot.slane %v5956_v60, 2 }
  0x79   : > { %4937 = vmatprep.mubr.msk.f32.mxu0 %vm468_vm2, %v5648_v40  ;;  %4974 = vmatprep.subr.msk.mxu1 %vm485_vm0, %v4399_v27 }
  0x7a   : > { %4938 = vmatmul.mubr.msk.f32.gmra.mxu0 %vm468_vm2, %v5660_v42  ;;  %4988 = vmatprep.subr.msk.mxu0 %vm485_vm0, %v4409_v29 }
  0x7b   : > { %4924 = vmatmul.mubr.msk.f32.gmra.mxu1 %vm468_vm2, %v5816_v30  ;;  %4940 = vmatprep.mubr.msk.f32.mxu0 %vm468_vm2, %v5680_v51 }
  0x7c   : > { %4926 = vmatprep.mubr.msk.f32.mxu1 %vm468_vm2, %v5823_v33 }
  0x7e   : > { %4941 = vmatmul.mubr.msk.f32.gmra.mxu0 %vm468_vm2, %v5692_v53 }
  0x7f   : > { %4927 = vmatmul.mubr.msk.f32.gmra.mxu1 %vm468_vm2, %v5838_v37  ;;  %4943 = vmatprep.mubr.msk.f32.mxu0 %vm468_vm2, %v5726_v0 }
  0x80   : > { %4929 = vmatprep.mubr.msk.f32.mxu1 %vm468_vm2, %v5843_v41 }
  0x82   : > { %4944 = vmatmul.mubr.msk.f32.gmra.mxu0 %vm468_vm2, %v400_v43 }
  0x83   : > { %4930 = vmatmul.mubr.msk.f32.gmra.mxu1 %vm468_vm2, %v5855_v44  ;;  %4962 = vmatprep.mubr.msk.f32.mxu0 %vm468_vm2, %v1926_v23  ;;  %v2969_v23 = vrot.slane %v407_v10, 1 }
  0x84   : > { %4948 = vmatprep.mubr.msk.f32.mxu1 %vm468_vm2, %v5671_v46  ;;  %v401_v46 = vld [vmem:[%s5584_s17 + $0x88] sm:$0x3] }
  0x85   : > { %v2325_v49 = vrot.slane %v401_v46, 2  ;;  %v2202_v52 = vrot.slane %v401_v46, 1  ;;  %v4479_v46 = vld [vmem:[%s6476_s3 + $0x5c] sm:$0xf] }
  0x86   : > { %4963 = vmatmul.mubr.msk.f32.vlgmr.msra.gmra.mxu0 %vm468_vm2, %v5798_v26 }
  0x87   : > { %4949 = vmatmul.mubr.msk.f32.vlgmr.msra.gmra.mxu1 %vm468_vm2, %v5700_v55  ;;  %4989 = vmatpush3.msk.msra.mxu0 %vm485_vm0, %v4409_v29  ;;  %v5897_v54 = vsel %vm718_vm3, %v2324_v48, %v2325_v49  ;;  %v2203_v56 = vsel %vm441_vm1, %v2201_v50, %v2202_v52  ;;  %v2974_v29 = vrot.slane %v5967_v62, 1  ;;  %v3139_v52 = vrot.slane %v415_v38, 2 }
  0x88   : > { %4975 = vmatpush3.msk.msra.mxu1 %vm485_vm0, %v4399_v27  ;;  %4951 = vmatprep.mubr.msk.f32.mxu1 %vm468_vm2, %v5709_v57  ;;  %v3130_v27 = vrot.slane %v409_v13, 2 }
  0x89   : > { %4965 = vmatprep.mubr.msk.f32.mxu0 %vm468_vm2, %v5816_v30  ;;  %5002 = vmatprep.subr.msk.mxu1 %vm485_vm0, %v4419_v45 }
  0x8a   : > { %4966 = vmatmul.mubr.msk.f32.gmra.mxu0 %vm468_vm2, %v5823_v33  ;;  %5016 = vmatprep.subr.msk.mxu0 %vm485_vm0, %v4429_v47 }
  0x8b   : > { %4952 = vmatmul.mubr.msk.f32.gmra.mxu1 %vm468_vm2, %v5721_v61  ;;  %4968 = vmatprep.mubr.msk.f32.mxu0 %vm468_vm2, %v5838_v37 }
  0x8c   : > { %4954 = vmatprep.mubr.msk.f32.mxu1 %vm468_vm2, %v5743_v2 }
  0x8e   : > { %4969 = vmatmul.mubr.msk.f32.gmra.mxu0 %vm468_vm2, %v5843_v41 }
  0x8f   : > { %4955 = vmatmul.mubr.msk.f32.gmra.mxu1 %vm468_vm2, %v5750_v6  ;;  %4971 = vmatprep.mubr.msk.f32.mxu0 %vm468_vm2, %v5855_v44 }
  0x90   : > { %4957 = vmatprep.mubr.msk.f32.mxu1 %vm468_vm2, %v5771_v12 }
  0x92   : > { %4972 = vmatmul.mubr.msk.f32.gmra.mxu0 %vm468_vm2, %v5897_v54 }
  0x93   : > { %4958 = vmatmul.mubr.msk.f32.gmra.mxu1 %vm468_vm2, %v2203_v56  ;;  %4990 = vmatprep.mubr.msk.f32.mxu0 %vm468_vm2, %v5700_v55  ;;  %v403_v55 = vld [vmem:[%s5584_s17 + $0x98] sm:$0x3] }
  0x94   : > { %4976 = vmatprep.mubr.msk.f32.mxu1 %vm468_vm2, %v5638_v36  ;;  %v402_v36 = vld [vmem:[%s5584_s17 + $0x90] sm:$0xff]  ;;  %v2693_v7 = vrot.slane %v403_v55, 2 }
  0x95   : > { %v2692_v4 = vrot.slane %v402_v36, 2 }
  0x96   : > { %4991 = vmatmul.mubr.msk.f32.vlgmr.msra.gmra.mxu0 %vm468_vm2, %v5709_v57  ;;  %v404_v57 = vld [vmem:[%s5755_s13] sm:$0xff] }
  0x97   : > { %4977 = vmatmul.mubr.msk.f32.vlgmr.msra.gmra.mxu1 %vm468_vm2, %v5648_v40  ;;  %5017 = vmatpush3.msk.msra.mxu0 %vm485_vm0, %v4429_v47  ;;  %v2569_v40 = vrot.slane %v402_v36, 1  ;;  %v2965_v11 = vrot.slane %v404_v57, 1  ;;  %v2694_v5 = vsel %vm718_vm3, %v2692_v4, %v2693_v7 }
  0x98   : > { %5003 = vmatpush3.msk.msra.mxu1 %vm485_vm0, %v4419_v45  ;;  %4979 = vmatprep.mubr.msk.f32.mxu1 %vm468_vm2, %v5660_v42  ;;  %v2570_v42 = vrot.slane %v403_v55, 1  ;;  %v6041_v45 = vsel %vm718_vm3, %v3129_v28, %v3130_v27  ;;  %v419_v55 = vld [vmem:[%s5755_s13 + $0x78] sm:$0x3] }
  0x99   : > { %4993 = vmatprep.mubr.msk.f32.mxu0 %vm468_vm2, %v5721_v61  ;;  %5030 = vmatprep.subr.msk.mxu1 %vm485_vm0, %v4439_v58  ;;  %v5961_v61 = vld [vmem:[%s6476_s3 + $0x54] sm:$0xf]  ;;  %v2987_v7 = vrot.slane %v419_v55, 1 }
  0x9a   : > { %4994 = vmatmul.mubr.msk.f32.gmra.mxu0 %vm468_vm2, %v5743_v2  ;;  %5044 = vmatprep.subr.msk.mxu0 %vm485_vm0, %v4449_v59  ;;  %v5991_v2 = vld [vmem:[%s5755_s13 + $0x50] sm:$0xff] }
  0x9b   : > { %4980 = vmatmul.mubr.msk.f32.gmra.mxu1 %vm468_vm2, %v5680_v51  ;;  %4996 = vmatprep.mubr.msk.f32.mxu0 %vm468_vm2, %v5750_v6  ;;  %v2571_v51 = vsel %vm441_vm1, %v2569_v40, %v2570_v42  ;;  %v3123_v6 = vrot.slane %v404_v57, 2  ;;  %v2980_v49 = vrot.slane %v5991_v2, 1  ;;  %v3138_v50 = vrot.slane %v5991_v2, 2 }
  0x9c   : > { %4982 = vmatprep.mubr.msk.f32.mxu1 %vm468_vm2, %v5692_v53  ;;  %v5949_v53 = vld [vmem:[%s5755_s13 + $0x10] sm:$0xff]  ;;  %v2983_v42 = vrot.slane %v5994_v3, 1 }
  0x9d   : > { %v3126_v15 = vrot.slane %v5949_v53, 2  ;;  %v2968_v19 = vrot.slane %v5949_v53, 1  ;;  %v3125_v14 = vsel %vm718_vm3, %v3123_v6, %v3124_v8  ;;  %v2986_v6 = vrot.slane %v6008_v16, 1 }
  0x9e   : > { %4997 = vmatmul.mubr.msk.f32.gmra.mxu0 %vm468_vm2, %v5771_v12  ;;  %v2966_v12 = vrot.slane %v405_v1, 1 }
  0x9f   : > { %4983 = vmatmul.mubr.msk.f32.gmra.mxu1 %vm468_vm2, %v5726_v0  ;;  %4999 = vmatprep.mubr.msk.f32.mxu0 %vm468_vm2, %v2203_v56  ;;  %v5976_v0 = vld [vmem:[%s5755_s13 + $0x40] sm:$0xff]  ;;  %v6026_v31 = vsel %vm718_vm3, %v3126_v15, %v3127_v17  ;;  %v2970_v34 = vsel %vm441_vm1, %v2968_v19, %v2969_v23  ;;  %v421_v15 = vld [vmem:[%s5755_s13 + $0x88] sm:$0x3] }
  0xa0   : > { %4985 = vmatprep.mubr.msk.f32.mxu1 %vm468_vm2, %v400_v43  ;;  %v2967_v24 = vsel %vm441_vm1, %v2965_v11, %v2966_v12  ;;  %v3135_v35 = vrot.slane %v5976_v0, 2  ;;  %v2978_v43 = vrot.slane %v413_v22, 1  ;;  %v6110_v11 = vsel %vm441_vm1, %v2986_v6, %v2987_v7  ;;  %v4499_v12 = vld [vmem:[%s6476_s3 + $0x64] sm:$0xf] }
  0xa2   : > { %5000 = vmatmul.mubr.msk.f32.gmra.mxu0 %vm468_vm2, %v2571_v51 }
  0xa3   : > { %4986 = vmatmul.mubr.msk.f32.gmra.mxu1 %vm468_vm2, %v402_v36  ;;  %5018 = vmatprep.mubr.msk.f32.mxu0 %vm468_vm2, %v404_v57  ;;  %v6083_v57 = vsel %vm718_vm3, %v3138_v50, %v3139_v52 }
  0xa4   : > { %5004 = vmatprep.mubr.msk.f32.mxu1 %vm468_vm2, %v5798_v26  ;;  %v2972_v26 = vrot.slane %v409_v13, 1  ;;  %v4509_v13 = vld [vmem:[%s6476_s3 + $0x68] sm:$0xf] }
  0xa6   : > { %5019 = vmatmul.mubr.msk.f32.vlgmr.msra.gmra.mxu0 %vm468_vm2, %v5949_v53  ;;  %v6034_v39 = vsel %vm441_vm1, %v2971_v25, %v2972_v26 }
  0xa7   : > { %5005 = vmatmul.mubr.msk.f32.vlgmr.msra.gmra.mxu1 %vm468_vm2, %v5816_v30  ;;  %5045 = vmatpush3.msk.msra.mxu0 %vm485_vm0, %v4449_v59  ;;  %v2975_v30 = vrot.slane %v411_v18, 1  ;;  %v3141_v59 = vrot.slane %v5994_v3, 2 }
  0xa8   : > { %5031 = vmatpush3.msk.msra.mxu1 %vm485_vm0, %v4439_v58  ;;  %5007 = vmatprep.mubr.msk.f32.mxu1 %vm468_vm2, %v5823_v33  ;;  %v3133_v33 = vrot.slane %v411_v18, 2  ;;  %v2981_v58 = vrot.slane %v415_v38, 1  ;;  %v3404_v18 = vrot.slane %v421_v15, 1 }
  0xa9   : > { %5021 = vmatprep.mubr.msk.f32.mxu0 %vm468_vm2, %v5956_v60  ;;  %5058 = vmatprep.subr.msk.mxu1 %vm485_vm0, %v5961_v61  ;;  %v6044_v47 = vsel %vm441_vm1, %v2974_v29, %v2975_v30 }
  0xaa   : > { %5022 = vmatmul.mubr.msk.f32.gmra.mxu0 %vm468_vm2, %v5967_v62  ;;  %5072 = vmatprep.subr.msk.mxu0 %vm485_vm0, %v4469_v63  ;;  %v6052_v48 = vsel %vm718_vm3, %v3132_v32, %v3133_v33  ;;  %v6089_v1 = vsel %vm441_vm1, %v2980_v49, %v2981_v58 }
  0xab   : > { %5008 = vmatmul.mubr.msk.f32.gmra.mxu1 %vm468_vm2, %v5838_v37  ;;  %5024 = vmatprep.mubr.msk.f32.mxu0 %vm468_vm2, %v5976_v0  ;;  %v3136_v37 = vrot.slane %v413_v22, 2 }
  0xac   : > { %5010 = vmatprep.mubr.msk.f32.mxu1 %vm468_vm2, %v5843_v41  ;;  %v2977_v41 = vrot.slane %v5976_v0, 1 }
  0xad   : > { %v6064_v56 = vsel %vm718_vm3, %v3135_v35, %v3136_v37 }
  0xae   : > { %5025 = vmatmul.mubr.msk.f32.gmra.mxu0 %vm468_vm2, %v5991_v2  ;;  %v6071_v40 = vsel %vm441_vm1, %v2977_v41, %v2978_v43 }
  0xaf   : > { %5011 = vmatmul.mubr.msk.f32.gmra.mxu1 %vm468_vm2, %v5855_v44  ;;  %5027 = vmatprep.mubr.msk.f32.mxu0 %vm468_vm2, %v5994_v3  ;;  %v417_v44 = vld [vmem:[%s5755_s13 + $0x68] sm:$0x3] }
  0xb0   : > { %5013 = vmatprep.mubr.msk.f32.mxu1 %vm468_vm2, %v5897_v54  ;;  %v4489_v54 = vld [vmem:[%s6476_s3 + $0x60] sm:$0xf]  ;;  %v3142_v36 = vrot.slane %v417_v44, 2  ;;  %v2984_v51 = vrot.slane %v417_v44, 1 }
  0xb2   : > { %5028 = vmatmul.mubr.msk.f32.gmra.mxu0 %vm468_vm2, %v6008_v16  ;;  %v6092_v4 = vsel %vm718_vm3, %v3141_v59, %v3142_v36  ;;  %v6096_v8 = vsel %vm441_vm1, %v2983_v42, %v2984_v51 }
  0xb3   : > { %5014 = vmatmul.mubr.msk.f32.gmra.mxu1 %vm468_vm2, %v2694_v5  ;;  %5046 = vmatprep.mubr.msk.f32.mxu0 %vm468_vm2, %v3125_v14 }
  0xb4   : > { %5032 = vmatprep.mubr.msk.f32.mxu1 %vm468_vm2, %v2967_v24 }
  0xb6   : > { %5047 = vmatmul.mubr.msk.f32.vlgmr.msra.gmra.mxu0 %vm468_vm2, %v6026_v31 }
  0xb7   : > { %5033 = vmatmul.mubr.msk.f32.vlgmr.msra.gmra.mxu1 %vm468_vm2, %v2970_v34  ;;  %5073 = vmatpush3.msk.msra.mxu0 %vm485_vm0, %v4469_v63  ;;  %v3145_v63 = vrot.slane %v419_v55, 2 }
  0xb8   : > { %5059 = vmatpush3.msk.msra.mxu1 %vm485_vm0, %v5961_v61  ;;  %5035 = vmatprep.mubr.msk.f32.mxu1 %vm468_vm2, %v6034_v39  ;;  %v3144_v61 = vrot.slane %v6008_v16, 2 }
  0xb9   : > { %5049 = vmatprep.mubr.msk.f32.mxu0 %vm468_vm2, %v6041_v45  ;;  %5086 = vmatprep.subr.msk.mxu1 %vm485_vm0, %v4479_v46 }
  0xba   : > { %5050 = vmatmul.mubr.msk.f32.gmra.mxu0 %vm468_vm2, %v6052_v48  ;;  %5100 = vmatprep.subr.msk.mxu0 %vm485_vm0, %v4489_v54  ;;  %v6105_v10 = vsel %vm718_vm3, %v3144_v61, %v3145_v63 }
  0xbb   : > { %5036 = vmatmul.mubr.msk.f32.gmra.mxu1 %vm468_vm2, %v6044_v47  ;;  %5052 = vmatprep.mubr.msk.f32.mxu0 %vm468_vm2, %v6064_v56 }
  0xbc   : > { %5038 = vmatprep.mubr.msk.f32.mxu1 %vm468_vm2, %v6071_v40 }
  0xbe   : > { %5053 = vmatmul.mubr.msk.f32.gmra.mxu0 %vm468_vm2, %v6083_v57 }
  0xbf   : > { %5039 = vmatmul.mubr.msk.f32.gmra.mxu1 %vm468_vm2, %v6089_v1  ;;  %5055 = vmatprep.mubr.msk.f32.mxu0 %vm468_vm2, %v6092_v4 }
  0xc0   : > { %5041 = vmatprep.mubr.msk.f32.mxu1 %vm468_vm2, %v6096_v8 }
  0xc2   : > { %5056 = vmatmul.mubr.msk.f32.gmra.mxu0 %vm468_vm2, %v6105_v10 }
  0xc3   : > { %5042 = vmatmul.mubr.msk.f32.gmra.mxu1 %vm468_vm2, %v6110_v11  ;;  %5074 = vmatprep.mubr.msk.f32.mxu0 %vm468_vm2, %v2970_v34 }
  0xc4   : > { %5060 = vmatprep.mubr.msk.f32.mxu1 %vm468_vm2, %v5949_v53  ;;  %v420_v53 = vld [vmem:[%s5755_s13 + $0x80] sm:$0xff]  ;;  %s4245_s13 = sshll.u32 %s6517_s18, 3 }
  0xc5   : > { %v3403_v17 = vrot.slane %v420_v53, 1  ;;  %s353_s29 = sadd.s32 %s4246_s12, %s4245_s13 }
  0xc6   : > { %5075 = vmatmul.mubr.msk.f32.vlgmr.msra.gmra.mxu0 %vm468_vm2, %v6034_v39  ;;  %s4247_s30 = sshll.u32 %s353_s29, 3 }
  0xc7   : > { %5061 = vmatmul.mubr.msk.f32.vlgmr.msra.gmra.mxu1 %vm468_vm2, %v5956_v60  ;;  %5101 = vmatpush3.msk.msra.mxu0 %vm485_vm0, %v4489_v54  ;;  %v6154_v19 = vsel %vm441_vm1, %v3403_v17, %v3404_v18  ;;  %s6410_s17 = scalar_lea.vmem %s6477_s4, %s4247_s30 }
  0xc8   : > { %5087 = vmatpush3.msk.msra.mxu1 %vm485_vm0, %v4479_v46  ;;  %5063 = vmatprep.mubr.msk.f32.mxu1 %vm468_vm2, %v5967_v62 }
  0xc9   : > { %5077 = vmatprep.mubr.msk.f32.mxu0 %vm468_vm2, %v6044_v47  ;;  %5114 = vmatprep.subr.msk.mxu1 %vm485_vm0, %v4499_v12 }
  0xca   : > { %5078 = vmatmul.mubr.msk.f32.gmra.mxu0 %vm468_vm2, %v6071_v40  ;;  %5128 = vmatprep.subr.msk.mxu0 %vm485_vm0, %v4509_v13 }
  0xcb   : > { %5064 = vmatmul.mubr.msk.f32.gmra.mxu1 %vm468_vm2, %v5976_v0  ;;  %5080 = vmatprep.mubr.msk.f32.mxu0 %vm468_vm2, %v6089_v1 }
  0xcc   : > { %5066 = vmatprep.mubr.msk.f32.mxu1 %vm468_vm2, %v5991_v2 }
  0xce   : > { %5081 = vmatmul.mubr.msk.f32.gmra.mxu0 %vm468_vm2, %v6096_v8 }
  0xcf   : > { %5067 = vmatmul.mubr.msk.f32.gmra.mxu1 %vm468_vm2, %v5994_v3  ;;  %5083 = vmatprep.mubr.msk.f32.mxu0 %vm468_vm2, %v6110_v11 }
  0xd0   : > { %5069 = vmatprep.mubr.msk.f32.mxu1 %vm468_vm2, %v6008_v16 }
  0xd2   : > { %5084 = vmatmul.mubr.msk.f32.gmra.mxu0 %vm468_vm2, %v6154_v19 }
  0xd3   : > { %5070 = vmatmul.mubr.msk.f32.gmra.mxu1 %vm468_vm2, %v420_v53  ;;  %5102 = vmatprep.mubr.msk.f32.mxu0 %vm468_vm2, %v5956_v60  ;;  %v3526_v60 = vrot.slane %v420_v53, 2 }
  0xd4   : > { %5088 = vmatprep.mubr.msk.f32.mxu1 %vm468_vm2, %v6026_v31 }
  0xd6   : > { %5103 = vmatmul.mubr.msk.f32.vlgmr.msra.gmra.mxu0 %vm468_vm2, %v5967_v62  ;;  %v3527_v62 = vrot.slane %v421_v15, 2 }
  0xd7   : > { %5089 = vmatmul.mubr.msk.f32.vlgmr.msra.gmra.mxu1 %vm468_vm2, %v6041_v45  ;;  %5129 = vmatpush3.msk.msra.mxu0 %vm485_vm0, %v4509_v13 }
  0xd8   : > { %5115 = vmatpush3.msk.msra.mxu1 %vm485_vm0, %v4499_v12  ;;  %5091 = vmatprep.mubr.msk.f32.mxu1 %vm468_vm2, %v6052_v48 }
  0xd9   : > { %5105 = vmatprep.mubr.msk.f32.mxu0 %vm468_vm2, %v5976_v0 }
  0xda   : > { %5106 = vmatmul.mubr.msk.f32.gmra.mxu0 %vm468_vm2, %v5991_v2  ;;  %v3528_v2 = vsel %vm718_vm3, %v3526_v60, %v3527_v62 }
  0xdb   : > { %5092 = vmatmul.mubr.msk.f32.gmra.mxu1 %vm468_vm2, %v6064_v56  ;;  %5108 = vmatprep.mubr.msk.f32.mxu0 %vm468_vm2, %v5994_v3 }
  0xdc   : > { %5094 = vmatprep.mubr.msk.f32.mxu1 %vm468_vm2, %v6083_v57 }
  0xde   : > { %v4768_v5 = vpop.f32.mrf.mxu0  ;;  %5109 = vmatmul.mubr.msk.f32.gmra.mxu0 %vm468_vm2, %v6008_v16 }
  0xdf   : > { %v4774_v14 = vpop.f32.mrf.mxu1  ;;  %5095 = vmatmul.mubr.msk.f32.gmra.mxu1 %vm468_vm2, %v6092_v4  ;;  %5111 = vmatprep.mubr.msk.f32.mxu0 %vm468_vm2, %v420_v53 }
  0xe0   : > { %v555_v0 = vpop.f32.mrf.mxu0  ;;  %5097 = vmatprep.mubr.msk.f32.mxu1 %vm468_vm2, %v6105_v10 }
  0xe1   : > { %v575_v3 = vpop.f32.mrf.mxu1 }
  0xe2   : > { %v4771_v23 = vpop.f32.mrf.mxu0  ;;  %5112 = vmatmul.mubr.msk.f32.gmra.mxu0 %vm468_vm2, %v5760_v9 }
  0xe3   : > { %v4777_v24 = vpop.f32.mrf.mxu1  ;;  %5098 = vmatmul.mubr.msk.f32.gmra.mxu1 %vm468_vm2, %v3528_v2  ;;  %5130 = vmatprep.mubr.msk.f32.mxu0 %vm468_vm2, %v6041_v45 }
  0xe4   : > { %v565_v16 = vpop.f32.mrf.mxu0  ;;  %5116 = vmatprep.mubr.msk.f32.mxu1 %vm468_vm2, %v6034_v39 }
  0xe5   : > { %v585_v25 = vpop.f32.mrf.mxu1 }
  0xe6   : > { %v4796_v26 = vpop.f32.mrf.mxu0  ;;  %5131 = vmatmul.mubr.msk.f32.vlgmr.msra.gmra.mxu0 %vm468_vm2, %v6052_v48 }
  0xe7   : > { %v4782_v22 = vpop.f32.mrf.mxu1  ;;  %5117 = vmatmul.mubr.msk.f32.vlgmr.msra.gmra.mxu1 %vm468_vm2, %v6044_v47  ;;  %5133 = vmatprep.mubr.msk.f32.mxu0 %vm468_vm2, %v6064_v56 }
  0xe8   : > { %v685_v9 = vadd.f32 %v4782_v22, %v4768_v5  ;;  %v830_v28 = vpop.f32.mrf.mxu0  ;;  %5119 = vmatprep.mubr.msk.f32.mxu1 %vm468_vm2, %v6071_v40 }
  0xe9   : > { %v679_v27 = vpop.f32.mrf.mxu1 }
  0xea   : > { %v870_v29 = vadd.f32 %v4796_v26, %v685_v9  ;;  %v680_v30 = vadd.f32 %v679_v27, %v555_v0  ;;  %v4799_v31 = vpop.f32.mrf.mxu0  ;;  %5134 = vmatmul.mubr.msk.f32.gmra.mxu0 %vm468_vm2, %v6083_v57 }
  0xeb   : > { %v4785_v32 = vpop.f32.mrf.mxu1  ;;  %5120 = vmatmul.mubr.msk.f32.gmra.mxu1 %vm468_vm2, %v6089_v1  ;;  %5136 = vmatprep.mubr.msk.f32.mxu0 %vm468_vm2, %v6092_v4 }
  0xec   : > { %v869_v33 = vadd.f32 %v830_v28, %v680_v30  ;;  %v695_v34 = vadd.f32 %v4785_v32, %v4771_v23  ;;  %v840_v35 = vpop.f32.mrf.mxu0  ;;  %5122 = vmatprep.mubr.msk.f32.mxu1 %vm468_vm2, %v6096_v8 }
  0xed   : > { %v689_v37 = vpop.f32.mrf.mxu1 }
  0xee   : > { %v872_v38 = vadd.f32 %v4799_v31, %v695_v34  ;;  %v690_v39 = vadd.f32 %v689_v37, %v565_v16  ;;  %v4802_v41 = vpop.f32.mrf.mxu0  ;;  %5137 = vmatmul.mubr.msk.f32.gmra.mxu0 %vm468_vm2, %v6105_v10 }
  0xef   : > { %v4788_v43 = vpop.f32.mrf.mxu1  ;;  %5123 = vmatmul.mubr.msk.f32.gmra.mxu1 %vm468_vm2, %v6110_v11  ;;  %5139 = vmatprep.mubr.msk.f32.mxu0 %vm468_vm2, %v3528_v2 }
  0xf0   : > { %v871_v44 = vadd.f32 %v840_v35, %v690_v39  ;;  %v705_v45 = vadd.f32 %v4788_v43, %v4774_v14  ;;  %v850_v47 = vpop.f32.mrf.mxu0  ;;  %5125 = vmatprep.mubr.msk.f32.mxu1 %vm468_vm2, %v6154_v19 }
  0xf1   : > { %v699_v46 = vpop.f32.mrf.mxu1 }
  0xf2   : > { %v874_v48 = vadd.f32 %v4802_v41, %v705_v45  ;;  %v700_v49 = vadd.f32 %v699_v46, %v575_v3  ;;  %v4805_v50 = vpop.f32.mrf.mxu0  ;;  %5140 = vmatmul.mubr.msk.f32.gmra.mxu0 %vm468_vm2, %v5787_v21 }
  0xf3   : > { %v4791_v52 = vpop.f32.mrf.mxu1  ;;  %5126 = vmatmul.mubr.msk.f32.gmra.mxu1 %vm468_vm2, %v5784_v20 }
  0xf4   : > { %v873_v54 = vadd.f32 %v850_v47, %v700_v49  ;;  %v715_v56 = vadd.f32 %v4791_v52, %v4777_v24  ;;  %v860_v58 = vpop.f32.mrf.mxu0 }
  0xf5   : > { %v709_v59 = vpop.f32.mrf.mxu1 }
  0xf6   : > { %v876_v36 = vadd.f32 %v4805_v50, %v715_v56  ;;  %v710_v55 = vadd.f32 %v709_v59, %v585_v25  ;;  %v4824_v40 = vpop.f32.mrf.mxu0 }
  0xf7   : > { %v4810_v42 = vpop.f32.mrf.mxu1 }
  0xf8   : > { %v875_v51 = vadd.f32 %v860_v58, %v710_v55  ;;  %v991_v57 = vadd.f32 %v4810_v42, %v870_v29  ;;  %v1075_v61 = vpop.f32.mrf.mxu0 }
  0xf9   : > { %v951_v63 = vpop.f32.mrf.mxu1 }
  0xfa   : > { %v1115_v1 = vadd.f32 %v4824_v40, %v991_v57  ;;  %v990_v4 = vadd.f32 %v951_v63, %v869_v33  ;;  %v4827_v6 = vpop.f32.mrf.mxu0 }
  0xfb   : > { %v4813_v21 = vpop.f32.mrf.mxu1 }
  0xfc   : > { %v1114_v7 = vadd.f32 %v1075_v61, %v990_v4  ;;  %v993_v8 = vadd.f32 %v4813_v21, %v872_v38  ;;  %v1085_v10 = vpop.f32.mrf.mxu0 }
  0xfd   : > { %v961_v20 = vpop.f32.mrf.mxu1 }
  0xfe   : > { %v1117_v11 = vadd.f32 %v4827_v6, %v993_v8  ;;  %v992_v12 = vadd.f32 %v961_v20, %v871_v44  ;;  %v4830_v13 = vpop.f32.mrf.mxu0 }
  0xff   : > { %v4816_v53 = vpop.f32.mrf.mxu1 }
 0x100   : > { %v1116_v15 = vadd.f32 %v1085_v10, %v992_v12  ;;  %v995_v17 = vadd.f32 %v4816_v53, %v874_v48  ;;  %v1095_v18 = vpop.f32.mrf.mxu0 }
 0x101   : > { %v971_v19 = vpop.f32.mrf.mxu1 }
 0x102   : > { %v1119_v60 = vadd.f32 %v4830_v13, %v995_v17  ;;  %v994_v62 = vadd.f32 %v971_v19, %v873_v54  ;;  %v4833_v5 = vpop.f32.mrf.mxu0 }
 0x103   : > { %v4819_v14 = vpop.f32.mrf.mxu1 }
 0x104   : > { %v1118_v0 = vadd.f32 %v1095_v18, %v994_v62  ;;  %v997_v2 = vadd.f32 %v4819_v14, %v876_v36  ;;  %v1105_v3 = vpop.f32.mrf.mxu0 }
 0x105   : > { %v981_v23 = vpop.f32.mrf.mxu1 }
 0x106   : > { %v1121_v24 = vadd.f32 %v4833_v5, %v997_v2  ;;  %v996_v16 = vadd.f32 %v981_v23, %v875_v51  ;;  %v4852_v25 = vpop.f32.mrf.mxu0 }
 0x107   : > { %v4838_v26 = vpop.f32.mrf.mxu1 }
 0x108   : > { %v1120_v22 = vadd.f32 %v1105_v3, %v996_v16  ;;  %v1238_v9 = vadd.f32 %v4838_v26, %v1115_v1  ;;  %v1319_v28 = vpop.f32.mrf.mxu0 }
 0x109   : > { %v1198_v27 = vpop.f32.mrf.mxu1 }
 0x10a   : > { %v1359_v29 = vadd.f32 %v4852_v25, %v1238_v9  ;;  %v1237_v30 = vadd.f32 %v1198_v27, %v1114_v7  ;;  %v4855_v31 = vpop.f32.mrf.mxu0 }
 0x10b   : > { %v4841_v32 = vpop.f32.mrf.mxu1 }
 0x10c   : > { %v1358_v33 = vadd.f32 %v1319_v28, %v1237_v30  ;;  %v1240_v34 = vadd.f32 %v4841_v32, %v1117_v11  ;;  %v1329_v35 = vpop.f32.mrf.mxu0 }
 0x10d   : > { %v1208_v37 = vpop.f32.mrf.mxu1 }
 0x10e   : > { %v1361_v38 = vadd.f32 %v4855_v31, %v1240_v34  ;;  %v1239_v39 = vadd.f32 %v1208_v37, %v1116_v15  ;;  %v4858_v41 = vpop.f32.mrf.mxu0 }
 0x10f   : > { %v4844_v43 = vpop.f32.mrf.mxu1 }
 0x110   : > { %v1360_v44 = vadd.f32 %v1329_v35, %v1239_v39  ;;  %v1242_v45 = vadd.f32 %v4844_v43, %v1119_v60  ;;  %v1339_v47 = vpop.f32.mrf.mxu0 }
 0x111   : > { %v1218_v46 = vpop.f32.mrf.mxu1 }
 0x112   : > { %v1363_v48 = vadd.f32 %v4858_v41, %v1242_v45  ;;  %v1241_v49 = vadd.f32 %v1218_v46, %v1118_v0  ;;  %v4861_v50 = vpop.f32.mrf.mxu0 }
 0x113   : > { %v4847_v52 = vpop.f32.mrf.mxu1 }
 0x114   : > { %v1362_v54 = vadd.f32 %v1339_v47, %v1241_v49  ;;  %v1244_v56 = vadd.f32 %v4847_v52, %v1121_v24  ;;  %v1349_v58 = vpop.f32.mrf.mxu0 }
 0x115   : > { %v1228_v59 = vpop.f32.mrf.mxu1 }
 0x116   : > { %v1365_v36 = vadd.f32 %v4861_v50, %v1244_v56  ;;  %v1243_v55 = vadd.f32 %v1228_v59, %v1120_v22  ;;  %v4880_v40 = vpop.f32.mrf.mxu0 }
 0x117   : > { %v4866_v42 = vpop.f32.mrf.mxu1 }
 0x118   : > { %v1364_v51 = vadd.f32 %v1349_v58, %v1243_v55  ;;  %v1483_v57 = vadd.f32 %v4866_v42, %v1359_v29  ;;  %v1566_v61 = vpop.f32.mrf.mxu0 }
 0x119   : > { %v1443_v63 = vpop.f32.mrf.mxu1 }
 0x11a   : > { %v1606_v1 = vadd.f32 %v4880_v40, %v1483_v57  ;;  %v1482_v4 = vadd.f32 %v1443_v63, %v1358_v33  ;;  %v4883_v6 = vpop.f32.mrf.mxu0 }
 0x11b   : > { %v4869_v21 = vpop.f32.mrf.mxu1 }
 0x11c   : > { %v1605_v7 = vadd.f32 %v1566_v61, %v1482_v4  ;;  %v1485_v8 = vadd.f32 %v4869_v21, %v1361_v38  ;;  %v1576_v10 = vpop.f32.mrf.mxu0 }
 0x11d   : > { %v1453_v20 = vpop.f32.mrf.mxu1 }
 0x11e   : > { %v1608_v11 = vadd.f32 %v4883_v6, %v1485_v8  ;;  %v1484_v12 = vadd.f32 %v1453_v20, %v1360_v44  ;;  %v4886_v13 = vpop.f32.mrf.mxu0 }
 0x11f   : > { %v4872_v53 = vpop.f32.mrf.mxu1 }
 0x120   : > { %v1607_v15 = vadd.f32 %v1576_v10, %v1484_v12  ;;  %v1487_v17 = vadd.f32 %v4872_v53, %v1363_v48  ;;  %v1586_v18 = vpop.f32.mrf.mxu0 }
 0x121   : > { %v1463_v19 = vpop.f32.mrf.mxu1 }
 0x122   : > { %v1610_v60 = vadd.f32 %v4886_v13, %v1487_v17  ;;  %v1486_v62 = vadd.f32 %v1463_v19, %v1362_v54  ;;  %v4889_v5 = vpop.f32.mrf.mxu0 }
 0x123   : > { %v4875_v14 = vpop.f32.mrf.mxu1 }
 0x124   : > { %v1609_v0 = vadd.f32 %v1586_v18, %v1486_v62  ;;  %v1489_v2 = vadd.f32 %v4875_v14, %v1365_v36  ;;  %v1596_v3 = vpop.f32.mrf.mxu0 }
 0x125   : > { %v1473_v23 = vpop.f32.mrf.mxu1 }
 0x126   : > { %v1612_v24 = vadd.f32 %v4889_v5, %v1489_v2  ;;  %v1488_v16 = vadd.f32 %v1473_v23, %v1364_v51  ;;  %v4908_v25 = vpop.f32.mrf.mxu0 }
 0x127   : > { %v4894_v26 = vpop.f32.mrf.mxu1 }
 0x128   : > { %v1611_v22 = vadd.f32 %v1596_v3, %v1488_v16  ;;  %v1748_v9 = vadd.f32 %v4894_v26, %v1606_v1  ;;  %v1874_v28 = vpop.f32.mrf.mxu0 }
 0x129   : > { %v1708_v27 = vpop.f32.mrf.mxu1 }
 0x12a   : > { %v1914_v29 = vadd.f32 %v4908_v25, %v1748_v9  ;;  %v1747_v30 = vadd.f32 %v1708_v27, %v1605_v7  ;;  %v4911_v31 = vpop.f32.mrf.mxu0 }
 0x12b   : > { %v4897_v32 = vpop.f32.mrf.mxu1 }
 0x12c   : > { %v1913_v33 = vadd.f32 %v1874_v28, %v1747_v30  ;;  %v1750_v34 = vadd.f32 %v4897_v32, %v1608_v11  ;;  %v1884_v35 = vpop.f32.mrf.mxu0 }
 0x12d   : > { %v1718_v37 = vpop.f32.mrf.mxu1 }
 0x12e   : > { %v1916_v38 = vadd.f32 %v4911_v31, %v1750_v34  ;;  %v1749_v39 = vadd.f32 %v1718_v37, %v1607_v15  ;;  %v4914_v41 = vpop.f32.mrf.mxu0 }
 0x12f   : > { %v4900_v43 = vpop.f32.mrf.mxu1 }
 0x130   : > { %v1915_v44 = vadd.f32 %v1884_v35, %v1749_v39  ;;  %v1752_v45 = vadd.f32 %v4900_v43, %v1610_v60  ;;  %v1894_v47 = vpop.f32.mrf.mxu0 }
 0x131   : > { %v1728_v46 = vpop.f32.mrf.mxu1 }
 0x132   : > { %v1918_v48 = vadd.f32 %v4914_v41, %v1752_v45  ;;  %v1751_v49 = vadd.f32 %v1728_v46, %v1609_v0  ;;  %v4917_v50 = vpop.f32.mrf.mxu0 }
 0x133   : > { %v4903_v52 = vpop.f32.mrf.mxu1 }
 0x134   : > { %v1917_v54 = vadd.f32 %v1894_v47, %v1751_v49  ;;  %v1754_v56 = vadd.f32 %v4903_v52, %v1612_v24  ;;  %v1904_v58 = vpop.f32.mrf.mxu0 }
 0x135   : > { %v1738_v59 = vpop.f32.mrf.mxu1 }
 0x136   : > { %v1920_v36 = vadd.f32 %v4917_v50, %v1754_v56  ;;  %v1753_v55 = vadd.f32 %v1738_v59, %v1611_v22  ;;  %v4936_v40 = vpop.f32.mrf.mxu0 }
 0x137   : > { %v4922_v42 = vpop.f32.mrf.mxu1 }
 0x138   : > { %v1919_v51 = vadd.f32 %v1904_v58, %v1753_v55  ;;  %v2072_v57 = vadd.f32 %v4922_v42, %v1914_v29  ;;  %v2153_v61 = vpop.f32.mrf.mxu0 }
 0x139   : > { %v2032_v63 = vpop.f32.mrf.mxu1 }
 0x13a   : > { %v2193_v1 = vadd.f32 %v4936_v40, %v2072_v57  ;;  %v2071_v4 = vadd.f32 %v2032_v63, %v1913_v33  ;;  %v4939_v6 = vpop.f32.mrf.mxu0 }
 0x13b   : > { %v4925_v21 = vpop.f32.mrf.mxu1 }
 0x13c   : > { %v2192_v7 = vadd.f32 %v2153_v61, %v2071_v4  ;;  %v2074_v8 = vadd.f32 %v4925_v21, %v1916_v38  ;;  %v2163_v10 = vpop.f32.mrf.mxu0 }
 0x13d   : > { %v2042_v20 = vpop.f32.mrf.mxu1 }
 0x13e   : > { %v2195_v11 = vadd.f32 %v4939_v6, %v2074_v8  ;;  %v2073_v12 = vadd.f32 %v2042_v20, %v1915_v44  ;;  %v4942_v13 = vpop.f32.mrf.mxu0 }
 0x13f   : > { %v4928_v53 = vpop.f32.mrf.mxu1 }
 0x140   : > { %v2194_v15 = vadd.f32 %v2163_v10, %v2073_v12  ;;  %v2076_v17 = vadd.f32 %v4928_v53, %v1918_v48  ;;  %v2173_v18 = vpop.f32.mrf.mxu0 }
 0x141   : > { %v2052_v19 = vpop.f32.mrf.mxu1 }
 0x142   : > { %v2197_v60 = vadd.f32 %v4942_v13, %v2076_v17  ;;  %v2075_v62 = vadd.f32 %v2052_v19, %v1917_v54  ;;  %v4945_v5 = vpop.f32.mrf.mxu0 }
 0x143   : > { %v4931_v14 = vpop.f32.mrf.mxu1 }
 0x144   : > { %v2196_v0 = vadd.f32 %v2173_v18, %v2075_v62  ;;  %v2078_v2 = vadd.f32 %v4931_v14, %v1920_v36  ;;  %v2183_v3 = vpop.f32.mrf.mxu0 }
 0x145   : > { %v2062_v23 = vpop.f32.mrf.mxu1 }
 0x146   : > { %v2199_v24 = vadd.f32 %v4945_v5, %v2078_v2  ;;  %v2077_v16 = vadd.f32 %v2062_v23, %v1919_v51  ;;  %v4964_v25 = vpop.f32.mrf.mxu0 }
 0x147   : > { %v4950_v26 = vpop.f32.mrf.mxu1 }
 0x148   : > { %v2198_v22 = vadd.f32 %v2183_v3, %v2077_v16  ;;  %v2317_v9 = vadd.f32 %v4950_v26, %v2193_v1  ;;  %v2400_v28 = vpop.f32.mrf.mxu0 }
 0x149   : > { %v2277_v27 = vpop.f32.mrf.mxu1 }
 0x14a   : > { %v6225_v29 = vadd.f32 %v4964_v25, %v2317_v9  ;;  %v2316_v30 = vadd.f32 %v2277_v27, %v2192_v7  ;;  %v4967_v31 = vpop.f32.mrf.mxu0 }
 0x14b   : > { %v4953_v32 = vpop.f32.mrf.mxu1 }
 0x14c   : > { %v6227_v33 = vadd.f32 %v2400_v28, %v2316_v30  ;;  %v2319_v34 = vadd.f32 %v4953_v32, %v2195_v11  ;;  %v2410_v35 = vpop.f32.mrf.mxu0 }
 0x14d   : > { %v2287_v37 = vpop.f32.mrf.mxu1 }
 0x14e   : > { %v6229_v38 = vadd.f32 %v4967_v31, %v2319_v34  ;;  %v2318_v39 = vadd.f32 %v2287_v37, %v2194_v15  ;;  %v4970_v41 = vpop.f32.mrf.mxu0 }
 0x14f   : > { %v4956_v43 = vpop.f32.mrf.mxu1 }
 0x150   : > { %v6231_v44 = vadd.f32 %v2410_v35, %v2318_v39  ;;  %v2321_v45 = vadd.f32 %v4956_v43, %v2197_v60  ;;  %v2420_v47 = vpop.f32.mrf.mxu0 }
 0x151   : > { %v2297_v46 = vpop.f32.mrf.mxu1 }
 0x152   : > { %v6233_v48 = vadd.f32 %v4970_v41, %v2321_v45  ;;  %v2320_v49 = vadd.f32 %v2297_v46, %v2196_v0  ;;  %v4973_v50 = vpop.f32.mrf.mxu0 }
 0x153   : > { %v4959_v52 = vpop.f32.mrf.mxu1 }
 0x154   : > { %v6235_v54 = vadd.f32 %v2420_v47, %v2320_v49  ;;  %v2323_v56 = vadd.f32 %v4959_v52, %v2199_v24  ;;  %v2430_v58 = vpop.f32.mrf.mxu0 }
 0x155   : > { %v2307_v59 = vpop.f32.mrf.mxu1 }
 0x156   : > { %v6237_v36 = vadd.f32 %v4973_v50, %v2323_v56  ;;  %v2322_v55 = vadd.f32 %v2307_v59, %v2198_v22  ;;  %v4992_v40 = vpop.f32.mrf.mxu0 }
 0x157   : > { %v4978_v42 = vpop.f32.mrf.mxu1 }
 0x158   : > { %v6239_v51 = vadd.f32 %v2430_v58, %v2322_v55  ;;  %v2645_v57 = vpop.f32.mrf.mxu0  ;;  %v2561_v56 = vadd.f32 %v4978_v42, %v6225_v29 }
 0x159   : > { %v2521_v61 = vpop.f32.mrf.mxu1 }
 0x15a   : > { %v6241_v63 = vpop.f32.mrf.mxu0  ;;  %v2560_v55 = vadd.f32 %v2521_v61, %v6227_v33 }
 0x15b   : > { %v4981_v1 = vpop.f32.mrf.mxu1 }
 0x15c   : > { %v6243_v4 = vpop.f32.mrf.mxu0 }
 0x15d   : > { %v2531_v6 = vpop.f32.mrf.mxu1 }
 0x15e   : > { %v6245_v21 = vpop.f32.mrf.mxu0  ;;  %v2562_v42 = vadd.f32 %v2531_v6, %v6231_v44 }
 0x15f   : > { %v4984_v7 = vpop.f32.mrf.mxu1 }
 0x160   : > { %v6247_v8 = vpop.f32.mrf.mxu0  ;;  %v2686_v44 = vadd.f32 %v6243_v4, %v2562_v42 }
 0x161   : > { %v2541_v10 = vpop.f32.mrf.mxu1 }
 0x162   : > { %v6249_v20 = vpop.f32.mrf.mxu0 }
 0x163   : > { %v6251_v11 = vpop.f32.mrf.mxu1 }
 0x164   : > { %v6253_v12 = vpop.f32.mrf.mxu0 }
 0x165   : > { %v6255_v13 = vpop.f32.mrf.mxu1 }
 0x166   : > { %v5020_v53 = vpop.f32.mrf.mxu0 }
 0x167   : > { %v5006_v15 = vpop.f32.mrf.mxu1 }
 0x168   : > { %v2910_v17 = vpop.f32.mrf.mxu0 }
 0x169   : > { %v2768_v18 = vpop.f32.mrf.mxu1 }
 0x16a   : > { %v6257_v19 = vpop.f32.mrf.mxu0 }
 0x16b   : > { %v5009_v60 = vpop.f32.mrf.mxu1 }
 0x16c   : > { %v6259_v62 = vpop.f32.mrf.mxu0 }
 0x16d   : > { %v2778_v5 = vpop.f32.mrf.mxu1 }
 0x16e   : > { %v6261_v14 = vpop.f32.mrf.mxu0 }
 0x16f   : > { %v5012_v0 = vpop.f32.mrf.mxu1 }
 0x170   : > { %v6263_v2 = vpop.f32.mrf.mxu0 }
 0x171   : > { %v6265_v3 = vpop.f32.mrf.mxu1 }
 0x172   : > { %v6267_v23 = vpop.f32.mrf.mxu0 }
 0x173   : > { %v6269_v24 = vpop.f32.mrf.mxu1 }
 0x174   : > { %v6271_v16 = vpop.f32.mrf.mxu0 }
 0x175   : > { %6480 = vst [vmem:[#allocation2_spill] sm:$0xff] %v6271_v16  ;;  %v6273_v25 = vpop.f32.mrf.mxu1 }
 0x176   : > { %v6275_v26 = vpop.f32.mrf.mxu0 }
 0x177   : > { %v5034_v22 = vpop.f32.mrf.mxu1 }
 0x178   : > { %v6277_v9 = vpop.f32.mrf.mxu0 }
 0x179   : > { %v3076_v28 = vpop.f32.mrf.mxu1 }
 0x17a   : > { %v6279_v27 = vpop.f32.mrf.mxu0 }
 0x17b   : > { %v5037_v30 = vpop.f32.mrf.mxu1 }
 0x17c   : > { %v6281_v31 = vpop.f32.mrf.mxu0 }
 0x17d   : > { %v6283_v32 = vpop.f32.mrf.mxu1 }
 0x17e   : > { %v6285_v34 = vpop.f32.mrf.mxu0 }
 0x17f   : > { %6481 = vst [vmem:[#allocation3_spill] sm:$0xff] %v6285_v34  ;;  %v6287_v35 = vpop.f32.mrf.mxu1 }
 0x180   : > { %v6289_v37 = vpop.f32.mrf.mxu0 }
 0x181   : > { %6482 = vst [vmem:[#allocation4_spill] sm:$0xff] %v6289_v37  ;;  %v6291_v39 = vpop.f32.mrf.mxu1  ;;  %v2563_v37 = vadd.f32 %v4981_v1, %v6229_v38  ;;  %v2564_v1 = vadd.f32 %v2541_v10, %v6235_v54 }
 0x182   : > { %v6293_v41 = vpop.f32.mrf.mxu0 }
 0x183   : > { %6483 = vst [vmem:[#allocation5_spill] sm:$0xff] %v6293_v41  ;;  %v6295_v43 = vpop.f32.mrf.mxu1  ;;  %v2687_v61 = vadd.f32 %v6241_v63, %v2563_v37  ;;  %v2567_v37 = vadd.f32 %v6251_v11, %v6237_v36 }
 0x184   : > { %6484 = vst [vmem:[#allocation6_spill] sm:$0xff] %v6295_v43  ;;  %v6297_v45 = vpop.f32.mrf.mxu0 }
 0x185   : > { %6485 = vst [vmem:[#allocation7_spill] sm:$0xff] %v6297_v45  ;;  %v6299_v47 = vpop.f32.mrf.mxu1 }
 0x186   : > { %6486 = vst [vmem:[#allocation8_spill] sm:$0xff] %v6299_v47  ;;  %v6301_v46 = vpop.f32.mrf.mxu0  ;;  %v2685_v47 = vadd.f32 %v4992_v40, %v2561_v56 }
 0x187   : > { %v5062_v49 = vpop.f32.mrf.mxu1 }
 0x188   : > { %v6303_v50 = vpop.f32.mrf.mxu0  ;;  %v2808_v34 = vadd.f32 %v5006_v15, %v2685_v47  ;;  %v2810_v15 = vadd.f32 %v5009_v60, %v2687_v61 }
 0x189   : > { %6487 = vst [vmem:[#allocation9_spill] sm:$0xff] %v6303_v50  ;;  %v6305_v52 = vpop.f32.mrf.mxu1  ;;  %v2684_v50 = vadd.f32 %v2645_v57, %v2560_v55 }
 0x18a   : > { %v6308_v58 = vpop.f32.mrf.mxu0  ;;  %v2950_v57 = vadd.f32 %v5020_v53, %v2808_v34  ;;  %v2688_v53 = vadd.f32 %v6247_v8, %v2564_v1  ;;  %v2952_v4 = vadd.f32 %v6257_v19, %v2810_v15  ;;  %v2691_v8 = vadd.f32 %v6249_v20, %v2567_v37 }
 0x18b   : > { %6488 = vst [vmem:[#allocation10_spill] sm:$0xff] %v6308_v58  ;;  %v6310_v59 = vpop.f32.mrf.mxu1  ;;  %v2565_v58 = vadd.f32 %v4984_v7, %v6233_v48 }
 0x18c   : > { %v6313_v41 = vpop.f32.mrf.mxu0  ;;  %v3116_v7 = vadd.f32 %v5034_v22, %v2950_v57  ;;  %v2811_v36 = vadd.f32 %v6265_v3, %v2688_v53  ;;  %v2814_v20 = vadd.f32 %v6269_v24, %v2691_v8 }
 0x18d   : > { %6489 = vst [vmem:[#allocation11_spill] sm:$0xff] %v6313_v41  ;;  %v6315_v45 = vpop.f32.mrf.mxu1  ;;  %v2807_v41 = vadd.f32 %v2768_v18, %v2684_v50  ;;  %v2689_v48 = vadd.f32 %v6245_v21, %v2565_v58  ;;  %v2809_v50 = vadd.f32 %v2778_v5, %v2686_v44  ;;  %v3118_v5 = vadd.f32 %v5037_v30, %v2952_v4  ;;  %v6493_v44 = vld [vmem:[#allocation6_spill] sm:$0xff] }
 0x18e   : > { %v6318_v43 = vpop.f32.mrf.mxu0  ;;  %v3274_v11 = vadd.f32 %v6275_v26, %v3116_v7  ;;  %v2953_v30 = vadd.f32 %v6263_v2, %v2811_v36  ;;  %v2956_v2 = vadd.f32 %v6267_v23, %v2814_v20  ;;  %v6494_v23 = vld [vmem:[#allocation4_spill] sm:$0xff]  ;;  %v6499_v20 = vld [vmem:[#allocation7_spill] sm:$0xff] }
 0x18f   : > { %v6320_v16 = vpop.f32.mrf.mxu1  ;;  %v2949_v63 = vadd.f32 %v2910_v17, %v2807_v41  ;;  %v2812_v54 = vadd.f32 %v5012_v0, %v2689_v48  ;;  %v2566_v17 = vadd.f32 %v6255_v13, %v6239_v51  ;;  %v2951_v19 = vadd.f32 %v6259_v62, %v2809_v50 }
 0x190   : > { %v6322_v29 = vpop.f32.mrf.mxu0  ;;  %v3395_v13 = vadd.f32 %v5062_v49, %v3274_v11  ;;  %v6491_v1 = vld [vmem:[#allocation9_spill] sm:$0xff] }
 0x191   : > { %v6326_v33 = vpop.f32.mrf.mxu1  ;;  %v3115_v21 = vadd.f32 %v3076_v28, %v2949_v63  ;;  %v2954_v28 = vadd.f32 %v6261_v14, %v2812_v54  ;;  %v2690_v3 = vadd.f32 %v6253_v12, %v2566_v17  ;;  %v3117_v62 = vadd.f32 %v6283_v32, %v2951_v19 }
 0x192   : > { %v6329_v40 = vpop.f32.mrf.mxu0  ;;  %v3119_v12 = vadd.f32 %v6291_v39, %v2953_v30  ;;  %v3519_v42 = vadd.f32 %v6301_v46, %v3395_v13  ;;  %v6492_v39 = vld [vmem:[#allocation2_spill] sm:$0xff] }
 0x193   : > { %v6331_v38 = vpop.f32.mrf.mxu1  ;;  %v3273_v51 = vadd.f32 %v6277_v9, %v3115_v21  ;;  %v3120_v14 = vadd.f32 %v6287_v35, %v2954_v28  ;;  %v3276_v9 = vadd.f32 %v6279_v27, %v3118_v5  ;;  %v2813_v58 = vadd.f32 %v6273_v25, %v2690_v3  ;;  %v6490_v35 = vld [vmem:[#allocation3_spill] sm:$0xff]  ;;  %v6495_v37 = vld [vmem:[#allocation10_spill] sm:$0xff] }
 0x194   : > { %v6334_v47 = vpop.f32.mrf.mxu0  ;;  %v3275_v27 = vadd.f32 %v6281_v31, %v3117_v62  ;;  %v3277_v31 = vadd.f32 %v6494_v23, %v3119_v12  ;;  %v6498_v8 = vld [vmem:[#allocation11_spill] sm:$0xff] }
 0x195   : > { %v6338_v6 = vpop.f32.mrf.mxu1  ;;  %v3394_v49 = vadd.f32 %v6305_v52, %v3273_v51  ;;  %v3397_v24 = vadd.f32 %v6310_v59, %v3276_v9  ;;  %v3278_v52 = vadd.f32 %v6490_v35, %v3120_v14  ;;  %v2955_v46 = vadd.f32 %v6492_v39, %v2813_v58 }
 0x196   : > { %v6340_v18 = vpop.f32.mrf.mxu0  ;;  %v3122_v59 = vadd.f32 %v6493_v44, %v2956_v2  ;;  %v3396_v48 = vadd.f32 %v6315_v45, %v3275_v27  ;;  %v3398_v17 = vadd.f32 %v6326_v33, %v3277_v31 }
 0x197   : > { %v5090_v10 = vpop.f32.mrf.mxu1  ;;  %v3518_v25 = vadd.f32 %v6491_v1, %v3394_v49  ;;  %v3399_v63 = vadd.f32 %v6320_v16, %v3278_v52  ;;  %v3521_v50 = vadd.f32 %v6495_v37, %v3397_v24  ;;  %v6497_v16 = vld [vmem:[#allocation5_spill] sm:$0xff] }
 0x198   : > { %v3723_v60 = vpop.f32.mrf.mxu0  ;;  %v3642_v57 = vadd.f32 %v5090_v10, %v3519_v42  ;;  %v6496_v10 = vld [vmem:[#allocation8_spill] sm:$0xff]  ;;  %v3280_v5 = vadd.f32 %v6497_v16, %v3122_v59  ;;  %v3520_v19 = vadd.f32 %v6498_v8, %v3396_v48 }
 0x199   : > { %v3602_v22 = vpop.f32.mrf.mxu1  ;;  %v3121_v4 = vadd.f32 %v6496_v10, %v2955_v46  ;;  %v3523_v28 = vadd.f32 %v6318_v43, %v3399_v63  ;;  %v3522_v43 = vadd.f32 %v6322_v29, %v3398_v17 }
 0x19a   : > { %v6352_v0 = vpop.f32.mrf.mxu0  ;;  %v3641_v54 = vadd.f32 %v3602_v22, %v3518_v25  ;;  %v3763_v36 = vadd.f32 %v6340_v18, %v3642_v57  ;;  %v3401_v33 = vadd.f32 %v6331_v38, %v3280_v5 }
 0x19b   : > { %v5093_v34 = vpop.f32.mrf.mxu1  ;;  %v3279_v62 = vadd.f32 %v6499_v20, %v3121_v4 }
 0x19c   : > { %v6363_v41 = vpop.f32.mrf.mxu0  ;;  %v3644_v11 = vadd.f32 %v5093_v34, %v3521_v50  ;;  %v3762_v22 = vadd.f32 %v3723_v60, %v3641_v54  ;;  %v3525_v2 = vadd.f32 %v6329_v40, %v3401_v33 }
 0x19d   : > { %v3612_v26 = vpop.f32.mrf.mxu1  ;;  %v3400_v58 = vadd.f32 %v6338_v6, %v3279_v62 }
 0x19e   : > { %v5110_v56 = vpop.f32.mrf.mxu0  ;;  %v3643_v14 = vadd.f32 %v3612_v26, %v3520_v19  ;;  %v3765_v60 = vadd.f32 %v6352_v0, %v3644_v11 }
 0x19f   : > { %v5096_v55 = vpop.f32.mrf.mxu1  ;;  %v3524_v25 = vadd.f32 %v6334_v47, %v3400_v58 }
 0x1a0   : > { %v6381_v32 = vpop.f32.mrf.mxu0  ;;  %v3646_v18 = vadd.f32 %v5096_v55, %v3523_v28  ;;  %v3764_v29 = vadd.f32 %v6363_v41, %v3643_v14 }
 0x1a1   : > { %v3622_v61 = vpop.f32.mrf.mxu1 }
 0x1a2   : > { %v6389_v15 = vpop.f32.mrf.mxu0  ;;  %v3645_v26 = vadd.f32 %v3622_v61, %v3522_v43  ;;  %v3767_v27 = vadd.f32 %v5110_v56, %v3646_v18 }
 0x1a3   : > { %v5099_v7 = vpop.f32.mrf.mxu1 }
 0x1a4   : > { %v6397_v53 = vpop.f32.mrf.mxu0  ;;  %v3648_v57 = vadd.f32 %v5099_v7, %v3525_v2  ;;  %v3766_v41 = vadd.f32 %v6381_v32, %v3645_v26 }
 0x1a5   : > { %v3632_v21 = vpop.f32.mrf.mxu1 }
 0x1a6   : > { %v5132_v45 = vpop.f32.mrf.mxu0  ;;  %v3647_v63 = vadd.f32 %v3632_v21, %v3524_v25  ;;  %v3769_v54 = vadd.f32 %v6389_v15, %v3648_v57 }
 0x1a7   : > { %v5118_v51 = vpop.f32.mrf.mxu1 }
 0x1a8   : > { %v3887_v13 = vadd.f32 %v5118_v51, %v3763_v36  ;;  %v3970_v3 = vpop.f32.mrf.mxu0  ;;  %v3768_v11 = vadd.f32 %v6397_v53, %v3647_v63 }
 0x1a9   : > { %v3847_v34 = vpop.f32.mrf.mxu1 }
 0x1aa   : > { %v4010_v30 = vadd.f32 %v5132_v45, %v3887_v13  ;;  %v3886_v9 = vadd.f32 %v3847_v34, %v3762_v22  ;;  %v5135_v49 = vpop.f32.mrf.mxu0 }
 0x1ab   : > { %v5121_v38 = vpop.f32.mrf.mxu1 }
 0x1ac   : > { %4019 = vst.msk [vmem:[%s6410_s17 + $0x8] sm:$0xff] %vm4017_vm4, %v4010_v30  ;;  %v4048_v55 = vmul.f32 %v4010_v30, %v4010_v30  ;;  %v4009_v12 = vadd.f32 %v3970_v3, %v3886_v9  ;;  %v3889_v42 = vadd.f32 %v5121_v38, %v3765_v60  ;;  %v3980_v24 = vpop.f32.mrf.mxu0  ;;  %v4027_v35 = vsel %vm4017_vm4, %v4010_v30, 0.0 }
 0x1ad   : > { %v3857_v0 = vpop.f32.mrf.mxu1 }
 0x1ae   : > { %4018 = vst.msk [vmem:[%s6410_s17] sm:$0xff] %vm4017_vm4, %v4009_v12  ;;  %v4026_v6 = vsel %vm4017_vm4, %v4009_v12, 0.0  ;;  %v4047_v52 = vmul.f32 %v4009_v12, %v4009_v12  ;;  %v4012_v61 = vadd.f32 %v5135_v49, %v3889_v42  ;;  %v5138_v1 = vpop.f32.mrf.mxu0  ;;  %v3888_v46 = vadd.f32 %v3857_v0, %v3764_v29 }
 0x1af   : > { %v4028_v39 = vadd.f32 %v4027_v35, %v4026_v6  ;;  %v5124_v40 = vpop.f32.mrf.mxu1  ;;  %v4056_v56 = vsel %vm4017_vm4, %v4048_v55, 0.0 }
 0x1b0   : > { %v4055_v44 = vsel %vm4017_vm4, %v4047_v52, 0.0  ;;  %4021 = vst.msk [vmem:[%s6410_s17 + $0x18] sm:$0xff] %vm4017_vm4, %v4012_v61  ;;  %v3891_v59 = vadd.f32 %v5124_v40, %v3767_v27  ;;  %v3990_v48 = vpop.f32.mrf.mxu0  ;;  %v4011_v31 = vadd.f32 %v3980_v24, %v3888_v46  ;;  %v4050_v7 = vmul.f32 %v4012_v61, %v4012_v61 }
 0x1b1   : > { %v4057_v23 = vadd.f32 %v4056_v56, %v4055_v44  ;;  %v3867_v47 = vpop.f32.mrf.mxu1  ;;  %v4031_v45 = vsel %vm4017_vm4, %v4012_v61, 0.0 }
 0x1b2   : > { %v4014_v37 = vadd.f32 %v5138_v1, %v3891_v59  ;;  %v3890_v50 = vadd.f32 %v3867_v47, %v3766_v41  ;;  %4020 = vst.msk [vmem:[%s6410_s17 + $0x10] sm:$0xff] %vm4017_vm4, %v4011_v31  ;;  %v4029_v32 = vsel %vm4017_vm4, %v4011_v31, 0.0  ;;  %v4049_v10 = vmul.f32 %v4011_v31, %v4011_v31  ;;  %v5141_v21 = vpop.f32.mrf.mxu0 }
 0x1b3   : > { %v5127_v4 = vpop.f32.mrf.mxu1  ;;  %v4030_v17 = vadd.f32 %v4029_v32, %v4028_v39  ;;  %v4060_v8 = vsel %vm4017_vm4, %v4050_v7, 0.0 }
 0x1b4   : > { %4023 = vst.msk [vmem:[%s6410_s17 + $0x28] sm:$0xff] %vm4017_vm4, %v4014_v37  ;;  %v4013_v36 = vadd.f32 %v3990_v48, %v3890_v50  ;;  %v4058_v16 = vsel %vm4017_vm4, %v4049_v10, 0.0  ;;  %v3893_v5 = vadd.f32 %v5127_v4, %v3769_v54  ;;  %v4052_v22 = vmul.f32 %v4014_v37, %v4014_v37  ;;  %v4000_v33 = vpop.f32.mrf.mxu0 }
 0x1b5   : > { %v3877_v15 = vpop.f32.mrf.mxu1  ;;  %v4059_v19 = vadd.f32 %v4058_v16, %v4057_v23  ;;  %v4032_v28 = vadd.f32 %v4031_v45, %v4030_v17  ;;  %v4035_v14 = vsel %vm4017_vm4, %v4014_v37, 0.0 }
 0x1b6   : > { %4022 = vst.msk [vmem:[%s6410_s17 + $0x20] sm:$0xff] %vm4017_vm4, %v4013_v36  ;;  %v4033_v51 = vsel %vm4017_vm4, %v4013_v36, 0.0  ;;  %v4051_v13 = vmul.f32 %v4013_v36, %v4013_v36  ;;  %v4016_v3 = vadd.f32 %v5141_v21, %v3893_v5  ;;  %v3892_v53 = vadd.f32 %v3877_v15, %v3768_v11 }
 0x1b7   : > { %v4034_v20 = vadd.f32 %v4033_v51, %v4032_v28  ;;  %v4061_v62 = vadd.f32 %v4060_v8, %v4059_v19  ;;  %v4064_v30 = vsel %vm4017_vm4, %v4052_v22, 0.0 }
 0x1b8   : > { %v4062_v18 = vsel %vm4017_vm4, %v4051_v13, 0.0  ;;  %4025 = vst.msk [vmem:[%s6410_s17 + $0x38] sm:$0xff] %vm4017_vm4, %v4016_v3  ;;  %v4015_v34 = vadd.f32 %v4000_v33, %v3892_v53  ;;  %v4054_v9 = vmul.f32 %v4016_v3, %v4016_v3  ;;  %v4039_v55 = vsel %vm4017_vm4, %v4016_v3, 0.0 }
 0x1b9   : > { %v4063_v43 = vadd.f32 %v4062_v18, %v4061_v62  ;;  %v4036_v60 = vadd.f32 %v4035_v14, %v4034_v20 }
 0x1ba   : > { %4024 = vst.msk [vmem:[%s6410_s17 + $0x30] sm:$0xff] %vm4017_vm4, %v4015_v34  ;;  %v4037_v49 = vsel %vm4017_vm4, %v4015_v34, 0.0  ;;  %v4053_v58 = vmul.f32 %v4015_v34, %v4015_v34  ;;  %v4068_v2 = vsel %vm4017_vm4, %v4054_v9, 0.0 }
 0x1bb   : > { %v4038_v38 = vadd.f32 %v4037_v49, %v4036_v60  ;;  %v4065_v26 = vadd.f32 %v4064_v30, %v4063_v43 }
 0x1bc   : > { %v4066_v12 = vsel %vm4017_vm4, %v4053_v58, 0.0 }
 0x1bd   : > { %v4040_v42 = vadd.f32 %v4039_v55, %v4038_v38  ;;  %v4067_v24 = vadd.f32 %v4066_v12, %v4065_v26 }
 0x1bf   : > { %v4041_v29 = vrot.slane %v4040_v42, 4  ;;  %v4069_v27 = vadd.f32 %v4068_v2, %v4067_v24 }
 0x1c1   : > { %v4042_v0 = vadd.f32 %v4041_v29, %v4040_v42  ;;  %v4070_v35 = vrot.slane %v4069_v27, 4 }
 0x1c3   : > { %v4043_v6 = vrot.slane %v4042_v0, 2  ;;  %v4071_v52 = vadd.f32 %v4070_v35, %v4069_v27 }
 0x1c5   : > { %v4044_v61 = vadd.f32 %v4043_v6, %v4042_v0  ;;  %v4072_v1 = vrot.slane %v4071_v52, 2 }
 0x1c7   : > { %v4045_v25 = vrot.slane %v4044_v61, 1  ;;  %v4073_v57 = vadd.f32 %v4072_v1, %v4071_v52 }
 0x1c9   : > { %v4074_v39 = vrot.slane %v4073_v57, 1  ;;  %v4046_v46 = vadd.f32 %v4045_v25, %v4044_v61 }
 0x1cb   : > { %v4075_v40 = vadd.f32 %v4074_v39, %v4073_v57 }
 0x1cd   : > { %v4077_v41 = vsel %vm4076_vm5, %v4046_v46, %v4075_v40 }
 0x1ce   : > { %4079 = vst.msk [vmem:[%s363_s15] sm:$0x3] %vm4078_vm6, %v4077_v41 }
 0x1cf PF: > { %s16_s22 = sadd.s32 1, %s5225_s22   ;;  %s6500_s18 = smov %s5217_s20 }
 0x1d0   : > { %p13_p10 = scmp.ge.s32.totalorder %s16_s22, 18   ;;  %s6501_s19 = smov %s5221_s21 }
 0x1d1   : > { %s6502_s20 = smov %s6505_s23  ;;  %s6503_s21 = smov %s6509_s24 }
 0x1d2   :  { %15 = sbr.rel (!%p13_p10) target bundleno = 3 (0x3), region = 110 }

// kernel: tile.33
= control target key start
LH: loop header
LB: loop body
LE: loop exit
PB: predicated region body
PF: predicated region fallthrough
CT: control target
= control target key end

     0   :  { %s64_s0 = inlined_call_operand.vmem [shape: f32[8], index: 0, kind: input, shape index: {}]   ;;  %s65_s1 = inlined_call_operand.vmem [shape: f32[64,8], index: 1, kind: output, shape index: {}]  }
   0x1   :  { %v4_v0 = vld [vmem:[%s64_s0] ss:$0 sm:$0xff] }
   0x2   :  { %5 = vst [vmem:[%s65_s1] sm:$0xff] %v4_v0  ;;  %20 = vst [vmem:[%s65_s1 + $0x8] sm:$0xff] %v4_v0 }
   0x3   :  { %21 = vst [vmem:[%s65_s1 + $0x10] sm:$0xff] %v4_v0  ;;  %22 = vst [vmem:[%s65_s1 + $0x18] sm:$0xff] %v4_v0 }
   0x4   :  { %23 = vst [vmem:[%s65_s1 + $0x20] sm:$0xff] %v4_v0  ;;  %24 = vst [vmem:[%s65_s1 + $0x28] sm:$0xff] %v4_v0 }
   0x5   :  { %25 = vst [vmem:[%s65_s1 + $0x30] sm:$0xff] %v4_v0  ;;  %26 = vst [vmem:[%s65_s1 + $0x38] sm:$0xff] %v4_v0 }

// kernel: tile.34
= control target key start
LH: loop header
LB: loop body
LE: loop exit
PB: predicated region body
PF: predicated region fallthrough
CT: control target
= control target key end

     0   :  { %vm6_vm0 = vcmask 1043458   ;;  %s11_s6 = smov 3  ;;  %s14_s7 = smov 12  ;;  %vm8_vm1 = vcmask 64512   ;;  %vm20_vm2 = vcmask 1048512   ;;  %vm32_vm3 = vcmask 982912   ;;  %s417_s0 = inlined_call_operand.vmem [shape: f32[64,8], index: 0, kind: input, shape index: {}]   ;;  %s418_s1 = inlined_call_operand.vmem [shape: f32[1,512], index: 1, kind: output, shape index: {}]  }
   0x1   :  { %v220_v0 = vld [vmem:[%s417_s0 + $0xf] ss:$16 sm:%s11_s6]   ;;  %s35_s12 = smov 3  ;;  %s38_s15 = smov 12  ;;  %vm44_vm4 = vcmask 917312   ;;  %vm56_vm5 = vcmask 851712  }
   0x2   :  { %v221_v1 = vld [vmem:[%s417_s0 + $0xf] ss:$16 sm:%s14_s7]   ;;  %v224_v3 = vld [vmem:[%s417_s0 + $0xd] ss:$16 sm:%s35_s12]   ;;  %s268_s16 = smov 120   ;;  %s23_s19 = smov 3 }
   0x3   :  { %v17_v2 = vsel %vm6_vm0, %v221_v1, %v220_v0  ;;  %v225_v4 = vld [vmem:[%s417_s0 + $0xd] ss:$16 sm:%s38_s15]   ;;  %s26_s20 = smov 12  ;;  %v222_v6 = vld [vmem:[%s417_s0 + $0xe] ss:$16 sm:%s23_s19]   ;;  %s47_s25 = smov 3 }
   0x4   :  { %18 = vrot.lane.b32.xlu0 %v17_v2, %s268_s16  ;;  %v41_v5 = vsel %vm6_vm0, %v225_v4, %v224_v3  ;;  %v223_v7 = vld [vmem:[%s417_s0 + $0xe] ss:$16 sm:%s26_s20]   ;;  %s269_s26 = smov 104   ;;  %s50_s29 = smov 12  ;;  %vm68_vm6 = vcmask 786112   ;;  %vm80_vm7 = vcmask 720512  }
   0x5   :  { %42 = vrot.lane.b32.xlu1 %v41_v5, %s269_s26  ;;  %v29_v8 = vsel %vm6_vm0, %v223_v7, %v222_v6  ;;  %v226_v9 = vld [vmem:[%s417_s0 + $0xc] ss:$16 sm:%s47_s25]   ;;  %s59_s3 = smov 3  ;;  %s62_s4 = smov 12  ;;  %vm92_vm8 = vcmask 654912   ;;  %vm104_vm9 = vcmask 589312  }
   0x6   :  { %v227_v10 = vld [vmem:[%s417_s0 + $0xc] ss:$16 sm:%s50_s29]   ;;  %s270_s5 = smov 112   ;;  %v228_v12 = vld [vmem:[%s417_s0 + $0xb] ss:$16 sm:%s59_s3]   ;;  %s71_s8 = smov 3 }
   0x7   :  { %v53_v11 = vsel %vm6_vm0, %v227_v10, %v226_v9  ;;  %v229_v13 = vld [vmem:[%s417_s0 + $0xb] ss:$16 sm:%s62_s4]   ;;  %v230_v14 = vld [vmem:[%s417_s0 + $0xa] ss:$16 sm:%s71_s8]   ;;  %s74_s13 = smov 12  ;;  %s271_s14 = smov 96  }
   0x8   :  { %30 = vrot.lane.b32.xlu0 %v29_v8, %s270_s5  ;;  %v65_v15 = vsel %vm6_vm0, %v229_v13, %v228_v12  ;;  %v231_v16 = vld [vmem:[%s417_s0 + $0xa] ss:$16 sm:%s74_s13]   ;;  %s83_s17 = smov 3  ;;  %s86_s18 = smov 12  ;;  %vm116_vm10 = vcmask 523712   ;;  %vm128_vm11 = vcmask 458112  }
   0x9   :  { %54 = vrot.lane.b32.xlu1 %v53_v11, %s271_s14  ;;  %v77_v17 = vsel %vm6_vm0, %v231_v16, %v230_v14  ;;  %v232_v18 = vld [vmem:[%s417_s0 + $0x9] ss:$16 sm:%s83_s17]   ;;  %s95_s23 = smov 3  ;;  %s272_s24 = smov 88   ;;  %vm140_vm12 = vcmask 392512   ;;  %vm152_vm13 = vcmask 326912  }
   0xa   :  { %v233_v19 = vld [vmem:[%s417_s0 + $0x9] ss:$16 sm:%s86_s18]   ;;  %v234_v20 = vld [vmem:[%s417_s0 + $0x8] ss:$16 sm:%s95_s23]   ;;  %s98_s27 = smov 12  ;;  %s107_s30 = smov 3 }
   0xb   :  { %v89_v21 = vsel %vm6_vm0, %v233_v19, %v232_v18  ;;  %v235_v22 = vld [vmem:[%s417_s0 + $0x8] ss:$16 sm:%s98_s27]   ;;  %s110_s2 = smov 12  ;;  %s273_s3 = smov 80   ;;  %v236_v23 = vld [vmem:[%s417_s0 + $0x7] ss:$16 sm:%s107_s30]  }
   0xc   :  { %66 = vrot.lane.b32.xlu0 %v65_v15, %s272_s24  ;;  %s119_s6 = smov 3  ;;  %v101_v24 = vsel %vm6_vm0, %v235_v22, %v234_v20  ;;  %v237_v25 = vld [vmem:[%s417_s0 + $0x7] ss:$16 sm:%s110_s2]   ;;  %s122_s11 = smov 12  ;;  %vm164_vm14 = vcmask 261312   ;;  %vm176_vm15 = vcmask 195712  }
   0xd   :  { %78 = vrot.lane.b32.xlu1 %v77_v17, %s273_s3  ;;  %v238_v26 = vld [vmem:[%s417_s0 + $0x6] ss:$16 sm:%s119_s6]   ;;  %s274_s12 = smov 72   ;;  %s131_s15 = smov 3  ;;  %v113_v28 = vsel %vm6_vm0, %v237_v25, %v236_v23 }
   0xe   :  { %v239_v27 = vld [vmem:[%s417_s0 + $0x6] ss:$16 sm:%s122_s11]   ;;  %s134_s16 = smov 12  ;;  %v240_v29 = vld [vmem:[%s417_s0 + $0x5] ss:$16 sm:%s131_s15]   ;;  %s143_s19 = smov 3 }
   0xf   :  { %s275_s20 = smov 64   ;;  %v241_v30 = vld [vmem:[%s417_s0 + $0x5] ss:$16 sm:%s134_s16]   ;;  %s146_s23 = smov 12  ;;  %v125_v31 = vsel %vm6_vm0, %v239_v27, %v238_v26  ;;  %v242_v32 = vld [vmem:[%s417_s0 + $0x4] ss:$16 sm:%s143_s19]  }
  0x10   :  { %90 = vrot.lane.b32.xlu0 %v89_v21, %s274_s12  ;;  %s155_s26 = smov 3  ;;  %s158_s27 = smov 12  ;;  %v243_v33 = vld [vmem:[%s417_s0 + $0x4] ss:$16 sm:%s146_s23]   ;;  %v137_v34 = vsel %vm6_vm0, %v241_v30, %v240_v29 }
  0x11   :  { %102 = vrot.lane.b32.xlu1 %v101_v24, %s275_s20  ;;  %s276_s28 = smov 56   ;;  %s167_s2 = smov 3  ;;  %v244_v35 = vld [vmem:[%s417_s0 + $0x3] ss:$16 sm:%s155_s26]   ;;  %v149_v37 = vsel %vm6_vm0, %v243_v33, %v242_v32 }
  0x12   :  { %s170_s5 = smov 12  ;;  %s277_s6 = smov 48   ;;  %v245_v36 = vld [vmem:[%s417_s0 + $0x3] ss:$16 sm:%s158_s27]   ;;  %v246_v38 = vld [vmem:[%s417_s0 + $0x2] ss:$16 sm:%s167_s2]  }
  0x13   :  { %s179_s9 = smov 3  ;;  %v247_v39 = vld [vmem:[%s417_s0 + $0x2] ss:$16 sm:%s170_s5]   ;;  %s182_s14 = smov 12  ;;  %v161_v41 = vsel %vm6_vm0, %v245_v36, %v244_v35 }
  0x14   :  { %114 = vrot.lane.b32.xlu0 %v113_v28, %s276_s28  ;;  %s2_s15 = smov 3  ;;  %s278_s16 = smov 40   ;;  %v248_v42 = vld [vmem:[%s417_s0 + $0x1] ss:$16 sm:%s179_s9]   ;;  %v173_v46 = vsel %vm6_vm0, %v247_v39, %v246_v38 }
  0x15   :  { %126 = vrot.lane.b32.xlu1 %v125_v31, %s277_s6  ;;  %v3_v40 = vld [vmem:[%s417_s0] ss:$16 sm:%s2_s15]   ;;  %s4_s19 = smov 12  ;;  %s279_s24 = smov 32  }
  0x16   :  { %v5_v43 = vld [vmem:[%s417_s0] ss:$16 sm:%s4_s19]   ;;  %v249_v44 = vld [vmem:[%s417_s0 + $0x1] ss:$16 sm:%s182_s14]   ;;  %s280_s0 = smov 24   ;;  %s281_s27 = smov 16  }
  0x17   :  { %v7_v45 = vsel %vm6_vm0, %v5_v43, %v3_v40  ;;  %v185_v47 = vsel %vm6_vm0, %v249_v44, %v248_v42  ;;  %s282_s28 = smov 8   ;;  %vm188_vm0 = vcmask 130112  }
  0x18   :  { %138 = vrot.lane.b32.xlu0 %v137_v34, %s278_s16  ;;  %9 = vst.msk [vmem:[#allocation0] ss:$8 sm:$0xf] %vm8_vm1, %v7_v45  }
  0x19   :  { %150 = vrot.lane.b32.xlu1 %v149_v37, %s279_s24 }
  0x1c   :  { %162 = vrot.lane.b32.xlu0 %v161_v41, %s280_s0 }
  0x1d   :  { %174 = vrot.lane.b32.xlu1 %v173_v46, %s281_s27 }
  0x20   :  { %186 = vrot.lane.b32.xlu0 %v185_v47, %s282_s28 }
  0x76   :  { %v19_v48 = vpop.permute.xlu0 %18  }
  0x77   :  { %21 = vst.msk [vmem:[#allocation0] ss:$8 sm:$0xf] %vm20_vm2, %v19_v48   ;;  %v43_v49 = vpop.permute.xlu1 %42  }
  0x7a   :  { %v31_v50 = vpop.permute.xlu0 %30  }
  0x7b   :  { %33 = vst.msk [vmem:[#allocation0] ss:$8 sm:$0xf] %vm32_vm3, %v31_v50   ;;  %v55_v51 = vpop.permute.xlu1 %54  }
  0x7c   :  { %45 = vst.msk [vmem:[#allocation0] ss:$8 sm:$0xf] %vm44_vm4, %v43_v49  }
  0x7d   :  { %57 = vst.msk [vmem:[#allocation0] ss:$8 sm:$0xf] %vm56_vm5, %v55_v51  }
  0x7e   :  { %v67_v52 = vpop.permute.xlu0 %66  }
  0x7f   :  { %69 = vst.msk [vmem:[#allocation0] ss:$8 sm:$0xf] %vm68_vm6, %v67_v52   ;;  %v79_v53 = vpop.permute.xlu1 %78  }
  0x80   :  { %81 = vst.msk [vmem:[#allocation0] ss:$8 sm:$0xf] %vm80_vm7, %v79_v53  }
  0x82   :  { %v91_v54 = vpop.permute.xlu0 %90  }
  0x83   :  { %93 = vst.msk [vmem:[#allocation0] ss:$8 sm:$0xf] %vm92_vm8, %v91_v54   ;;  %v103_v55 = vpop.permute.xlu1 %102  }
  0x84   :  { %105 = vst.msk [vmem:[#allocation0] ss:$8 sm:$0xf] %vm104_vm9, %v103_v55  }
  0x86   :  { %v115_v56 = vpop.permute.xlu0 %114  }
  0x87   :  { %117 = vst.msk [vmem:[#allocation0] ss:$8 sm:$0xf] %vm116_vm10, %v115_v56   ;;  %v127_v57 = vpop.permute.xlu1 %126  }
  0x88   :  { %129 = vst.msk [vmem:[#allocation0] ss:$8 sm:$0xf] %vm128_vm11, %v127_v57  }
  0x8a   :  { %v139_v58 = vpop.permute.xlu0 %138  }
  0x8b   :  { %141 = vst.msk [vmem:[#allocation0] ss:$8 sm:$0xf] %vm140_vm12, %v139_v58   ;;  %v151_v59 = vpop.permute.xlu1 %150  }
  0x8c   :  { %153 = vst.msk [vmem:[#allocation0] ss:$8 sm:$0xf] %vm152_vm13, %v151_v59  }
  0x8e   :  { %v163_v60 = vpop.permute.xlu0 %162  }
  0x8f   :  { %165 = vst.msk [vmem:[#allocation0] ss:$8 sm:$0xf] %vm164_vm14, %v163_v60   ;;  %v175_v61 = vpop.permute.xlu1 %174  }
  0x90   :  { %177 = vst.msk [vmem:[#allocation0] ss:$8 sm:$0xf] %vm176_vm15, %v175_v61  }
  0x92   :  { %v187_v62 = vpop.permute.xlu0 %186  }
  0x93   :  { %189 = vst.msk [vmem:[#allocation0] ss:$8 sm:$0xf] %vm188_vm0, %v187_v62  }
  0x9a   :  { %v194_v63 = vld [vmem:[#allocation0] sm:$0x1]  ;;  %v199_v0 = vld [vmem:[#allocation0 + $0x8] sm:$0x1]  ;;  %v205_v1 = vld [vmem:[#allocation0 + $0x10] sm:$0x1] }
  0x9b   :  { %197 = vst [vmem:[%s418_s1] sm:$0x1] %v194_v63  ;;  %250 = vst [vmem:[%s418_s1 + $0x1] sm:$0x1] %v199_v0  ;;  %v212_v2 = vld [vmem:[#allocation0 + $0x18] sm:$0x1] }
  0x9c   :  { %251 = vst [vmem:[%s418_s1 + $0x2] sm:$0x1] %v205_v1  ;;  %252 = vst [vmem:[%s418_s1 + $0x3] sm:$0x1] %v212_v2 }

// kernel: layernet_forward.7
= control target key start
LH: loop header
LB: loop body
LE: loop exit
PB: predicated region body
PF: predicated region fallthrough
CT: control target
= control target key end

     0   :  { %v24_v0 = vlaneseq  ;;  %s176_s1 = inlined_call_operand.vmem [shape: f32[1,512], index: 1, kind: input, shape index: {}]   ;;  %s177_s2 = inlined_call_operand.vmem [shape: f32[1,512], index: 2, kind: input, shape index: {}]   ;;  %s178_s0 = inlined_call_operand.vmem [shape: f32[16,512], index: 0, kind: input, shape index: {}, may-alias: {0,3}]   ;;  %s179_s3 = inlined_call_operand.vmem [shape: f32[16,512], index: 3, kind: output, shape index: {}, may-alias: {0,3}]  }
   0x1   :  { %v22_v2 = vld [vmem:[%s176_s1] sm:$0xf]  ;;  %v15_v6 = vld [vmem:[%s178_s0 + $0x8] sm:$0xff]  ;;  %v16_v10 = vld [vmem:[%s178_s0 + $0x10] sm:$0xff] }
   0x2   :  { %v25_v1 = vshrl.u32 %v24_v0, 7  ;;  %v52_v3 = vld [vmem:[%s177_s2] sm:$0xf]  ;;  %v19_v12 = vld [vmem:[%s178_s0 + $0x28] sm:$0xff]  ;;  %v17_v17 = vld [vmem:[%s178_s0 + $0x18] sm:$0xff] }
   0x3   :  { %v14_v4 = vld [vmem:[%s178_s0] sm:$0xff]  ;;  %v20_v18 = vld [vmem:[%s178_s0 + $0x30] sm:$0xff]  ;;  %v21_v19 = vld [vmem:[%s178_s0 + $0x38] sm:$0xff] }
   0x4   :  { %v26_v5 = vsub.s32 0, %v25_v1  ;;  %v30_v7 = vsub.s32 1, %v25_v1  ;;  %v34_v8 = vsub.s32 2, %v25_v1  ;;  %v38_v9 = vsub.s32 3, %v25_v1  ;;  %v18_v11 = vld [vmem:[%s178_s0 + $0x20] sm:$0xff] }
   0x6   :  { %v27_v13 = vrot.slane %v22_v2, %v26_v5  ;;  %v57_v14 = vrot.slane %v52_v3, %v26_v5  ;;  %v31_v15 = vrot.slane %v22_v2, %v30_v7  ;;  %v61_v16 = vrot.slane %v52_v3, %v30_v7 }
   0x7   :  { %v35_v20 = vrot.slane %v22_v2, %v34_v8  ;;  %v65_v21 = vrot.slane %v52_v3, %v34_v8  ;;  %v39_v22 = vrot.slane %v22_v2, %v38_v9  ;;  %v69_v23 = vrot.slane %v52_v3, %v38_v9 }
   0x8   :  { %v44_v24 = vmul.f32 %v27_v13, %v14_v4  ;;  %v45_v25 = vmul.f32 %v31_v15, %v15_v6  ;;  %v48_v26 = vmul.f32 %v27_v13, %v18_v11  ;;  %v49_v27 = vmul.f32 %v31_v15, %v19_v12 }
   0x9   :  { %v46_v28 = vmul.f32 %v35_v20, %v16_v10  ;;  %v47_v29 = vmul.f32 %v39_v22, %v17_v17  ;;  %v50_v30 = vmul.f32 %v35_v20, %v20_v18  ;;  %v51_v31 = vmul.f32 %v39_v22, %v21_v19 }
   0xa   :  { %v74_v32 = vadd.f32 %v57_v14, %v44_v24  ;;  %v75_v33 = vadd.f32 %v61_v16, %v45_v25  ;;  %v78_v34 = vadd.f32 %v57_v14, %v48_v26  ;;  %v79_v35 = vadd.f32 %v61_v16, %v49_v27 }
   0xb   :  { %v76_v36 = vadd.f32 %v65_v21, %v46_v28  ;;  %v77_v37 = vadd.f32 %v69_v23, %v47_v29  ;;  %v80_v38 = vadd.f32 %v65_v21, %v50_v30  ;;  %v81_v39 = vadd.f32 %v69_v23, %v51_v31 }
   0xc   :  { %v82_v40 = vmax.f32 %v74_v32, 0.0  ;;  %v83_v41 = vmax.f32 %v75_v33, 0.0  ;;  %v86_v42 = vmax.f32 %v78_v34, 0.0  ;;  %v87_v43 = vmax.f32 %v79_v35, 0.0 }
   0xd   :  { %v84_v44 = vmax.f32 %v76_v36, 0.0  ;;  %v85_v45 = vmax.f32 %v77_v37, 0.0  ;;  %v88_v46 = vmax.f32 %v80_v38, 0.0  ;;  %v89_v47 = vmax.f32 %v81_v39, 0.0 }
   0xe   :  { %90 = vst [vmem:[%s179_s3] sm:$0xff] %v82_v40  ;;  %91 = vst [vmem:[%s179_s3 + $0x8] sm:$0xff] %v83_v41 }
   0xf   :  { %94 = vst [vmem:[%s179_s3 + $0x20] sm:$0xff] %v86_v42  ;;  %95 = vst [vmem:[%s179_s3 + $0x28] sm:$0xff] %v87_v43 }
  0x10   :  { %92 = vst [vmem:[%s179_s3 + $0x10] sm:$0xff] %v84_v44  ;;  %93 = vst [vmem:[%s179_s3 + $0x18] sm:$0xff] %v85_v45 }
  0x11   :  { %96 = vst [vmem:[%s179_s3 + $0x30] sm:$0xff] %v88_v46  ;;  %97 = vst [vmem:[%s179_s3 + $0x38] sm:$0xff] %v89_v47 }

// kernel: layernet_forward.6
= control target key start
LH: loop header
LB: loop body
LE: loop exit
PB: predicated region body
PF: predicated region fallthrough
CT: control target
= control target key end

     0   :  { %s5284_s18 = smov 0   ;;  %s5286_s19 = smov 0   ;;  %s6540_s0 = inlined_call_operand.vmem [shape: f32[20,10,10,16], index: 0, kind: input, shape index: {}, may-alias: {0,1,2}]   ;;  %s6541_s1 = inlined_call_operand.vmem [shape: f32[20,10,10,16], index: 1, kind: input, shape index: {}, may-alias: {0,1,2}]   ;;  %s6542_s2 = inlined_call_operand.vmem [shape: f32[20,10,10,16], index: 2, kind: input, shape index: {}, may-alias: {0,1,2}]   ;;  %s6543_s3 = inlined_call_operand.vmem [shape: f32[27,16,8], index: 3, kind: input, shape index: {}]   ;;  %s6544_s4 = inlined_call_operand.vmem [shape: f32[2,8,64,8], index: 4, kind: output, shape index: {0}]   ;;  %s6545_s5 = inlined_call_operand.vmem [shape: f32[2,8,2,8], index: 5, kind: output, shape index: {1}]  }
   0x1   :  { %s5288_s20 = smov 0   ;;  %s5290_s21 = smov 0  }
   0x2   :  { %s5292_s22 = smov 0  }
   0x3 LB: > { %s25_s23 = sadd.s32 1, %s5244_s20  ;;  %s28_s24 = sadd.s32 1, %s5248_s21  ;;  %s5252_s22 = sphi %s5292_s22, %s16_s22   ;;  %s5248_s21 = sphi %s5290_s21, %s6570_s21   ;;  %s5244_s20 = sphi %s5288_s20, %s6569_s20   ;;  %s5240_s19 = sphi %s5286_s19, %s6568_s19   ;;  %s5236_s18 = sphi %s5284_s18, %s6567_s18  }
   0x4   : > { %p26_p0 = scmp.ge.s32.totalorder %s25_s23, 8  ;;  %p4186_p1 = scmp.ge.s32.totalorder %s5252_s22, 1 }
   0x5   : > { %p258_p2 = scmp.lt.s32.totalorder %s5252_s22, 17 }
   0x6   : > { %s6572_s23 = smov (%p26_p0, %s25_s23), 0  ;;  %s6574_s24 = smov (!%p26_p0, %s28_s24), %s5248_s21 }
   0x7   : > { %p259_p3 = pnand %p4186_p1, %p258_p2  ;;  %p30_p4 = scmp.ge.s32.totalorder %s6574_s24, 2 }
   0x9   : > { %s6576_s24 = smov (%p30_p4, %s6574_s24), 0  ;;  %262 = sbr.rel (%p259_p3) target bundleno = 463 (0x1cf), region = 36 }
   0xe   : > { %v4196_v0 = vld [vmem:[%s6543_s3 + $0x18] sm:$0xff]  ;;  %v4195_v1 = vld [vmem:[%s6543_s3 + $0x10] sm:$0xff]  ;;  %s316_s29 = smul.u32 10, %s5240_s19  ;;  %v425_v2 = vld [vmem:[%s6543_s3 + $0x8] sm:$0xff]  ;;  %vm442_vm0 = vcmask 1046528   ;;  %vm470_vm1 = vcmask 130048  }
   0xf   : > { %5167 = vmatprep.subr.mxu1 %v4196_v0  ;;  %4735 = vmatprep.subr.mxu0 %v4196_v0  ;;  %v4214_v3 = vld [vmem:[%s6543_s3 + $0x28] sm:$0xff]  ;;  %vm713_vm2 = vcmask 1045504   ;;  %v424_v29 = vld [vmem:[%s6543_s3] sm:$0xff]  ;;  %v4224_v51 = vld [vmem:[%s6543_s3 + $0x38] sm:$0xff]  ;;  %p347_p8 = scmp.lt.s32.totalorder %s5240_s19, 1  ;;  %p349_p9 = scmp.lt.s32.totalorder %s5236_s18, 7 }
  0x10   : > { %5169 = vmatpush3.msra.mxu1 %v4196_v0  ;;  %4736 = vmatpush3.msra.mxu0 %v4196_v0  ;;  %s5326_s30 = sadd.s32 %s5236_s18, %s316_s29  ;;  %v4213_v46 = vld [vmem:[%s6543_s3 + $0x20] sm:$0xff]  ;;  %v4234_v55 = vld [vmem:[%s6543_s3 + $0x48] sm:$0xff]  ;;  %v4223_v61 = vld [vmem:[%s6543_s3 + $0x30] sm:$0xff]  ;;  %vm3962_vm3 = vcmask 64512   ;;  %vm4021_vm4 = vcmask 1040384   ;;  %vm4023_vm5 = vcmask 58368  }
  0x11   : > { %5168 = vmatprep.subr.mxu1 %v4195_v1  ;;  %4737 = vmatprep.subr.mxu0 %v4195_v1  ;;  %p318_p5 = scmp.lt.s32.totalorder %s5326_s30, 19  ;;  %s327_s8 = sadd.s32 1, %s5326_s30 }
  0x12   : > { %5170 = vmatpush3.msra.mxu1 %v4195_v1  ;;  %4738 = vmatpush3.msra.mxu0 %v4195_v1  ;;  %p328_p6 = scmp.lt.s32.totalorder %s327_s8, 19  ;;  %s6582_s19 = smov (!%p347_p8, %s5240_s19), 1 }
  0x13   : > { %s319_s10 = scalar_select %p318_p5, %s5326_s30, 19  ;;  %4751 = vmatprep.subr.mxu1 %v425_v2  ;;  %4767 = vmatprep.subr.mxu0 %v4214_v3 }
  0x14   : > { %s6578_s8 = smov (!%p328_p6, %s327_s8), 19  ;;  %s6584_s18 = smov (!%p349_p9, %s5236_s18), 7 }
  0x15   : > { %s5171_s11 = smul.u32 160, %s319_s10  ;;  %s338_s10 = sadd.s32 2, %s5326_s30 }
  0x16   : > { %s5172_s16 = smul.u32 160, %s6578_s8  ;;  %p5690_p7 = scmp.lt.s32.totalorder %s338_s10, 19 }
  0x17   : > { %s5339_s14 = scalar_lea.vmem %s6540_s0, %s5171_s11  ;;  %s4191_s9 = sshll.u32 %s6582_s19, 6 }
  0x18   : > { %v5342_v4 = vld [vmem:[%s5339_s14] sm:$0xff]  ;;  %v365_v5 = vld [vmem:[%s5339_s14 + $0x8] sm:$0x3]  ;;  %v5355_v13 = vld [vmem:[%s5339_s14 + $0x10] sm:$0xff]  ;;  %s5623_s28 = scalar_lea.vmem %s6541_s1, %s5172_s16  ;;  %s6580_s10 = smov (!%p5690_p7, %s338_s10), 19 }
  0x19   : > { %v5346_v6 = vld [vmem:[%s5339_s14 + $0x40] sm:$0xff]  ;;  %v443_v7 = vrot.slane %v5342_v4, 1  ;;  %v444_v8 = vrot.slane %v365_v5, 1  ;;  %v715_v9 = vrot.slane %v365_v5, 2  ;;  %v5350_v10 = vld [vmem:[%s5339_s14 + $0x48] sm:$0x3] }
  0x1a   : > { %v455_v11 = vrot.slane %v5346_v6, 1  ;;  %v456_v12 = vrot.slane %v5350_v10, 1  ;;  %v367_v14 = vld [vmem:[%s5339_s14 + $0x18] sm:$0x3]  ;;  %v5359_v15 = vld [vmem:[%s5339_s14 + $0x50] sm:$0xff]  ;;  %v714_v16 = vrot.slane %v5342_v4, 2 }
  0x1b   : > { %v445_v17 = vsel %vm442_vm0, %v443_v7, %v444_v8  ;;  %v446_v18 = vrot.slane %v5355_v13, 1  ;;  %v447_v19 = vrot.slane %v367_v14, 1  ;;  %v718_v20 = vrot.slane %v367_v14, 2  ;;  %v5365_v21 = vld [vmem:[%s5339_s14 + $0x58] sm:$0x3]  ;;  %v5368_v22 = vld [vmem:[%s5339_s14 + $0x20] sm:$0xff] }
  0x1c   : > { %4739 = vmatprep.mubr.msk.f32.mxu0 %vm470_vm1, %v445_v17  ;;  %v5372_v23 = vsel %vm442_vm0, %v455_v11, %v456_v12  ;;  %v458_v24 = vrot.slane %v5359_v15, 1  ;;  %v459_v25 = vrot.slane %v5365_v21, 1  ;;  %v369_v26 = vld [vmem:[%s5339_s14 + $0x28] sm:$0x3]  ;;  %v449_v27 = vrot.slane %v5368_v22, 1  ;;  %v5379_v28 = vld [vmem:[%s5339_s14 + $0x60] sm:$0xff] }
  0x1d   : > { %4745 = vmatprep.mubr.msk.f32.mxu1 %vm470_vm1, %v5372_v23  ;;  %v5387_v30 = vsel %vm442_vm0, %v446_v18, %v447_v19  ;;  %v450_v31 = vrot.slane %v369_v26, 1  ;;  %v5390_v32 = vld [vmem:[%s5339_s14 + $0x68] sm:$0x3]  ;;  %v461_v33 = vrot.slane %v5379_v28, 1  ;;  %v5394_v34 = vld [vmem:[%s5339_s14 + $0x30] sm:$0xff]  ;;  %v717_v47 = vrot.slane %v5355_v13, 2 }
  0x1e   : > { %v5397_v35 = vld [vmem:[%s5339_s14 + $0x70] sm:$0xff]  ;;  %4740 = vmatmul.mubr.msk.f32.vlgmr.msra.gmra.mxu0 %vm470_vm1, %v5387_v30  ;;  %v5402_v36 = vsel %vm442_vm0, %v458_v24, %v459_v25  ;;  %v462_v37 = vrot.slane %v5390_v32, 1  ;;  %v371_v38 = vld [vmem:[%s5339_s14 + $0x38] sm:$0x3]  ;;  %v452_v39 = vrot.slane %v5394_v34, 1  ;;  %v716_v50 = vsel %vm713_vm2, %v714_v16, %v715_v9  ;;  %v380_v16 = vld [vmem:[%s5339_s14 + $0x80] sm:$0xff] }
  0x1f   : > { %v5408_v40 = vld [vmem:[%s5339_s14 + $0x78] sm:$0x3]  ;;  %4746 = vmatmul.mubr.msk.f32.vlgmr.msra.gmra.mxu1 %vm470_vm1, %v5402_v36  ;;  %4768 = vmatpush3.msra.mxu0 %v4214_v3  ;;  %v5413_v41 = vsel %vm442_vm0, %v449_v27, %v450_v31  ;;  %v453_v42 = vrot.slane %v371_v38, 1  ;;  %v464_v43 = vrot.slane %v5397_v35, 1  ;;  %v720_v52 = vrot.slane %v5368_v22, 2  ;;  %v4243_v14 = vld [vmem:[%s6543_s3 + $0x50] sm:$0xff] }
  0x20   : > { %v465_v44 = vrot.slane %v5408_v40, 1  ;;  %4752 = vmatpush3.msra.mxu1 %v425_v2  ;;  %4742 = vmatprep.mubr.msk.f32.mxu0 %vm470_vm1, %v5413_v41  ;;  %v5420_v45 = vsel %vm442_vm0, %v461_v33, %v462_v37  ;;  %v721_v53 = vrot.slane %v369_v26, 2  ;;  %v5444_v54 = vsel %vm713_vm2, %v717_v47, %v718_v20  ;;  %v4244_v5 = vld [vmem:[%s6543_s3 + $0x58] sm:$0xff]  ;;  %v381_v17 = vld [vmem:[%s5339_s14 + $0x88] sm:$0x3]  ;;  %v4263_v25 = vld [vmem:[%s6543_s3 + $0x70] sm:$0xff] }
  0x21   : > { %4748 = vmatprep.mubr.msk.f32.mxu1 %vm470_vm1, %v5420_v45  ;;  %4753 = vmatprep.subr.mxu1 %v424_v29  ;;  %v5429_v48 = vsel %vm442_vm0, %v452_v39, %v453_v42  ;;  %v723_v56 = vrot.slane %v5394_v34, 2  ;;  %v724_v57 = vrot.slane %v371_v38, 2  ;;  %v726_v58 = vrot.slane %v5346_v6, 2  ;;  %v4264_v18 = vld [vmem:[%s6543_s3 + $0x78] sm:$0xff]  ;;  %v5636_v33 = vld [vmem:[%s5623_s28] sm:$0xff]  ;;  %v5651_v38 = vld [vmem:[%s5623_s28 + $0x10] sm:$0xff] }
  0x22   : > { %v5432_v49 = vsel %vm442_vm0, %v464_v43, %v465_v44  ;;  %4743 = vmatmul.mubr.msk.f32.gmra.mxu0 %vm470_vm1, %v5429_v48  ;;  %4754 = vmatpush3.msra.mxu1 %v424_v29  ;;  %v727_v59 = vrot.slane %v5350_v10, 2  ;;  %v5458_v60 = vsel %vm713_vm2, %v720_v52, %v721_v53  ;;  %v729_v63 = vrot.slane %v5359_v15, 2  ;;  %v4254_v10 = vld [vmem:[%s6543_s3 + $0x68] sm:$0xff]  ;;  %v4284_v26 = vld [vmem:[%s6543_s3 + $0x98] sm:$0xff]  ;;  %v5673_v47 = vld [vmem:[%s5623_s28 + $0x20] sm:$0xff]  ;;  %s5173_s30 = smul.u32 160, %s6580_s10 }
  0x23   : > { %4749 = vmatmul.mubr.msk.f32.gmra.mxu1 %vm470_vm1, %v5432_v49  ;;  %4769 = vmatprep.subr.mxu0 %v4213_v46  ;;  %v5466_v62 = vsel %vm713_vm2, %v723_v56, %v724_v57  ;;  %v730_v0 = vrot.slane %v5365_v21, 2  ;;  %v732_v2 = vrot.slane %v5379_v28, 2  ;;  %v733_v3 = vrot.slane %v5390_v32, 2  ;;  %v4274_v21 = vld [vmem:[%s6543_s3 + $0x88] sm:$0xff]  ;;  %v383_v31 = vld [vmem:[%s5339_s14 + $0x98] sm:$0x3] }
  0x24   : > { %4770 = vmatpush3.msra.mxu0 %v4213_v46  ;;  %4755 = vmatprep.mubr.msk.f32.mxu1 %vm470_vm1, %v5342_v4  ;;  %v5473_v1 = vsel %vm713_vm2, %v726_v58, %v727_v59  ;;  %v4233_v4 = vld [vmem:[%s6543_s3 + $0x40] sm:$0xff]  ;;  %v735_v8 = vrot.slane %v5397_v35, 2  ;;  %v736_v9 = vrot.slane %v5408_v40, 2  ;;  %v990_v19 = vrot.slane %v380_v16, 1  ;;  %v4314_v39 = vld [vmem:[%s6543_s3 + $0xc8] sm:$0xff]  ;;  %s5791_s7 = scalar_lea.vmem %s6542_s2, %s5173_s30  ;;  %s4193_s30 = sshll.u32 %s6582_s19, 3 }
  0x25   : > { %4771 = vmatprep.mubr.msk.f32.mxu0 %vm470_vm1, %v716_v50  ;;  %4783 = vmatprep.subr.mxu1 %v4224_v51  ;;  %v5492_v7 = vsel %vm713_vm2, %v729_v63, %v730_v0  ;;  %v5502_v11 = vsel %vm713_vm2, %v732_v2, %v733_v3  ;;  %v991_v20 = vrot.slane %v381_v17, 1  ;;  %v1111_v27 = vrot.slane %v380_v16, 2  ;;  %v4293_v32 = vld [vmem:[%s6543_s3 + $0xa0] sm:$0xff]  ;;  %v5661_v43 = vld [vmem:[%s5623_s28 + $0x18] sm:$0x3]  ;;  %v4303_v3 = vld [vmem:[%s6543_s3 + $0xb0] sm:$0xff]  ;;  %s361_s15 = sadd.s32 %s4193_s30, %s6584_s18 }
  0x26   : > { %4772 = vmatmul.mubr.msk.f32.vlgmr.msra.gmra.mxu0 %vm470_vm1, %v5444_v54  ;;  %4799 = vmatprep.subr.mxu0 %v4234_v55  ;;  %v5511_v12 = vsel %vm713_vm2, %v735_v8, %v736_v9  ;;  %v1474_v37 = vrot.slane %v383_v31, 2  ;;  %v1746_v46 = vrot.slane %v5661_v43, 1  ;;  %v5686_v52 = vld [vmem:[%s5623_s28 + $0x38] sm:$0x3]  ;;  %v5695_v53 = vld [vmem:[%s5623_s28 + $0x40] sm:$0xff]  ;;  %s4194_s16 = sshll.u32 %s361_s15, 1 }
  0x27   : > { %4756 = vmatmul.mubr.msk.f32.vlgmr.msra.gmra.mxu1 %vm470_vm1, %v5355_v13  ;;  %4800 = vmatpush3.msra.mxu0 %v4234_v55  ;;  %v5560_v24 = vsel %vm442_vm0, %v990_v19, %v991_v20  ;;  %v1748_v55 = vrot.slane %v5673_v47, 1  ;;  %v1752_v59 = vrot.slane %v5686_v52, 1  ;;  %v5718_v63 = vld [vmem:[%s5623_s28 + $0x58] sm:$0x3]  ;;  %v5727_v0 = vld [vmem:[%s5623_s28 + $0x60] sm:$0xff]  ;;  %v4334_v19 = vld [vmem:[%s6543_s3 + $0xe8] sm:$0xff] }
  0x28   : > { %4784 = vmatpush3.msra.mxu1 %v4224_v51  ;;  %4758 = vmatprep.mubr.msk.f32.mxu1 %vm470_vm1, %v5368_v22  ;;  %v1760_v9 = vrot.slane %v5727_v0, 1 }
  0x29   : > { %4774 = vmatprep.mubr.msk.f32.mxu0 %vm470_vm1, %v5458_v60  ;;  %4785 = vmatprep.subr.mxu1 %v4223_v61 }
  0x2a   : > { %4775 = vmatmul.mubr.msk.f32.gmra.mxu0 %vm470_vm1, %v5466_v62  ;;  %4786 = vmatpush3.msra.mxu1 %v4223_v61 }
  0x2b   : > { %4759 = vmatmul.mubr.msk.f32.gmra.mxu1 %vm470_vm1, %v5394_v34  ;;  %4777 = vmatprep.mubr.msk.f32.mxu0 %vm470_vm1, %v5473_v1 }
  0x2c   : > { %4761 = vmatprep.mubr.msk.f32.mxu1 %vm470_vm1, %v5346_v6  ;;  %4801 = vmatprep.subr.mxu0 %v4233_v4 }
  0x2d   : > { %4802 = vmatpush3.msra.mxu0 %v4233_v4  ;;  %4815 = vmatprep.subr.mxu1 %v4244_v5 }
  0x2e   : > { %4778 = vmatmul.mubr.msk.f32.gmra.mxu0 %vm470_vm1, %v5492_v7  ;;  %4831 = vmatprep.subr.mxu0 %v4254_v10 }
  0x2f   : > { %4762 = vmatmul.mubr.msk.f32.gmra.mxu1 %vm470_vm1, %v5359_v15  ;;  %4780 = vmatprep.mubr.msk.f32.mxu0 %vm470_vm1, %v5502_v11 }
  0x30   : > { %4764 = vmatprep.mubr.msk.f32.mxu1 %vm470_vm1, %v5379_v28 }
  0x32   : > { %4781 = vmatmul.mubr.msk.f32.gmra.mxu0 %vm470_vm1, %v5511_v12 }
  0x33   : > { %4765 = vmatmul.mubr.msk.f32.gmra.mxu1 %vm470_vm1, %v5397_v35  ;;  %4803 = vmatprep.mubr.msk.f32.mxu0 %vm470_vm1, %v5387_v30  ;;  %v4283_v30 = vld [vmem:[%s6543_s3 + $0x90] sm:$0xff] }
  0x34   : > { %4787 = vmatprep.mubr.msk.f32.mxu1 %vm470_vm1, %v5355_v13  ;;  %v4253_v13 = vld [vmem:[%s6543_s3 + $0x60] sm:$0xff] }
  0x36   : > { %4804 = vmatmul.mubr.msk.f32.vlgmr.msra.gmra.mxu0 %vm470_vm1, %v5413_v41 }
  0x37   : > { %4788 = vmatmul.mubr.msk.f32.vlgmr.msra.gmra.mxu1 %vm470_vm1, %v5368_v22  ;;  %4832 = vmatpush3.msra.mxu0 %v4254_v10 }
  0x38   : > { %4816 = vmatpush3.msra.mxu1 %v4244_v5  ;;  %4790 = vmatprep.mubr.msk.f32.mxu1 %vm470_vm1, %v5394_v34 }
  0x39   : > { %4806 = vmatprep.mubr.msk.f32.mxu0 %vm470_vm1, %v5429_v48  ;;  %4817 = vmatprep.subr.mxu1 %v4243_v14 }
  0x3a   : > { %4807 = vmatmul.mubr.msk.f32.gmra.mxu0 %vm470_vm1, %v5372_v23  ;;  %4818 = vmatpush3.msra.mxu1 %v4243_v14  ;;  %v4313_v14 = vld [vmem:[%s6543_s3 + $0xc0] sm:$0xff] }
  0x3b   : > { %4791 = vmatmul.mubr.msk.f32.gmra.mxu1 %vm470_vm1, %v5346_v6  ;;  %4809 = vmatprep.mubr.msk.f32.mxu0 %vm470_vm1, %v5402_v36 }
  0x3c   : > { %4793 = vmatprep.mubr.msk.f32.mxu1 %vm470_vm1, %v5359_v15  ;;  %4833 = vmatprep.subr.mxu0 %v4253_v13 }
  0x3d   : > { %4834 = vmatpush3.msra.mxu0 %v4253_v13  ;;  %4847 = vmatprep.subr.mxu1 %v4264_v18 }
  0x3e   : > { %4810 = vmatmul.mubr.msk.f32.gmra.mxu0 %vm470_vm1, %v5420_v45  ;;  %4863 = vmatprep.subr.mxu0 %v4274_v21 }
  0x3f   : > { %4794 = vmatmul.mubr.msk.f32.gmra.mxu1 %vm470_vm1, %v5379_v28  ;;  %4812 = vmatprep.mubr.msk.f32.mxu0 %vm470_vm1, %v5432_v49 }
  0x40   : > { %4796 = vmatprep.mubr.msk.f32.mxu1 %vm470_vm1, %v5397_v35 }
  0x42   : > { %4813 = vmatmul.mubr.msk.f32.gmra.mxu0 %vm470_vm1, %v5560_v24 }
  0x43   : > { %4797 = vmatmul.mubr.msk.f32.gmra.mxu1 %vm470_vm1, %v380_v16  ;;  %4835 = vmatprep.mubr.msk.f32.mxu0 %vm470_vm1, %v5368_v22  ;;  %v4273_v22 = vld [vmem:[%s6543_s3 + $0x80] sm:$0xff] }
  0x44   : > { %4819 = vmatprep.mubr.msk.f32.mxu1 %vm470_vm1, %v5444_v54  ;;  %v5698_v54 = vld [vmem:[%s5623_s28 + $0x48] sm:$0x3] }
  0x45   : > { %v1755_v61 = vrot.slane %v5698_v54, 1 }
  0x46   : > { %4836 = vmatmul.mubr.msk.f32.vlgmr.msra.gmra.mxu0 %vm470_vm1, %v5394_v34  ;;  %v5639_v34 = vld [vmem:[%s5623_s28 + $0x8] sm:$0x3] }
  0x47   : > { %4820 = vmatmul.mubr.msk.f32.vlgmr.msra.gmra.mxu1 %vm470_vm1, %v5458_v60  ;;  %4864 = vmatpush3.msra.mxu0 %v4274_v21  ;;  %v1743_v42 = vrot.slane %v5639_v34, 1  ;;  %v1898_v21 = vrot.slane %v5636_v33, 2 }
  0x48   : > { %4848 = vmatpush3.msra.mxu1 %v4264_v18  ;;  %4822 = vmatprep.mubr.msk.f32.mxu1 %vm470_vm1, %v5466_v62 }
  0x49   : > { %4838 = vmatprep.mubr.msk.f32.mxu0 %vm470_vm1, %v5346_v6  ;;  %4849 = vmatprep.subr.mxu1 %v4263_v25  ;;  %v4294_v6 = vld [vmem:[%s6543_s3 + $0xa8] sm:$0xff] }
  0x4a   : > { %4839 = vmatmul.mubr.msk.f32.gmra.mxu0 %vm470_vm1, %v5359_v15  ;;  %4850 = vmatpush3.msra.mxu1 %v4263_v25  ;;  %v1112_v15 = vrot.slane %v381_v17, 2  ;;  %v5796_v25 = vld [vmem:[%s5791_s7 + $0x90] sm:$0xff] }
  0x4b   : > { %4823 = vmatmul.mubr.msk.f32.gmra.mxu1 %vm470_vm1, %v5473_v1  ;;  %4841 = vmatprep.mubr.msk.f32.mxu0 %vm470_vm1, %v5379_v28  ;;  %v382_v28 = vld [vmem:[%s5339_s14 + $0x90] sm:$0xff]  ;;  %s4190_s14 = sshll.u32 %s6584_s18, 3 }
  0x4c   : > { %4825 = vmatprep.mubr.msk.f32.mxu1 %vm470_vm1, %v5492_v7  ;;  %4865 = vmatprep.subr.mxu0 %v4273_v22  ;;  %v1113_v29 = vsel %vm713_vm2, %v1111_v27, %v1112_v15  ;;  %v1352_v40 = vrot.slane %v382_v28, 1  ;;  %v423_v27 = vld [vmem:[%s5791_s7 + $0x98] sm:$0x3]  ;;  %v1901_v15 = vrot.slane %v5651_v38, 2  ;;  %s353_s10 = sadd.s32 %s4191_s9, %s4190_s14 }
  0x4d   : > { %4866 = vmatpush3.msra.mxu0 %v4273_v22  ;;  %4879 = vmatprep.subr.mxu1 %v4284_v26  ;;  %v3720_v22 = vrot.slane %v5796_v25, 1  ;;  %s4192_s11 = sshll.u32 %s353_s10, 3 }
  0x4e   : > { %4842 = vmatmul.mubr.msk.f32.gmra.mxu0 %vm470_vm1, %v5397_v35  ;;  %4895 = vmatprep.subr.mxu0 %v4294_v6  ;;  %v1473_v35 = vrot.slane %v382_v28, 2  ;;  %s6477_s13 = scalar_lea.vmem %s6544_s4, %s4192_s11 }
  0x4f   : > { %4826 = vmatmul.mubr.msk.f32.gmra.mxu1 %vm470_vm1, %v5502_v11  ;;  %4844 = vmatprep.mubr.msk.f32.mxu0 %vm470_vm1, %v380_v16  ;;  %v4324_v16 = vld [vmem:[%s6543_s3 + $0xd8] sm:$0xff] }
  0x50   : > { %4828 = vmatprep.mubr.msk.f32.mxu1 %vm470_vm1, %v5511_v12  ;;  %v1475_v44 = vsel %vm713_vm2, %v1473_v35, %v1474_v37 }
  0x52   : > { %4845 = vmatmul.mubr.msk.f32.gmra.mxu0 %vm470_vm1, %v382_v28  ;;  %v1902_v28 = vrot.slane %v5661_v43, 2 }
  0x53   : > { %4829 = vmatmul.mubr.msk.f32.gmra.mxu1 %vm470_vm1, %v1113_v29  ;;  %4867 = vmatprep.mubr.msk.f32.mxu0 %vm470_vm1, %v5458_v60  ;;  %v1754_v60 = vrot.slane %v5695_v53, 1 }
  0x54   : > { %4851 = vmatprep.mubr.msk.f32.mxu1 %vm470_vm1, %v5413_v41  ;;  %v1353_v41 = vrot.slane %v383_v31, 1  ;;  %v1903_v35 = vsel %vm713_vm2, %v1901_v15, %v1902_v28  ;;  %v6053_v28 = vld [vmem:[%s5791_s7 + $0x60] sm:$0xff] }
  0x55   : > { %v5750_v8 = vsel %vm442_vm0, %v1754_v60, %v1755_v61  ;;  %v4343_v61 = vld [vmem:[%s6543_s3 + $0xf0] sm:$0xff] }
  0x56   : > { %4868 = vmatmul.mubr.msk.f32.vlgmr.msra.gmra.mxu0 %vm470_vm1, %v5466_v62  ;;  %v1354_v50 = vsel %vm442_vm0, %v1352_v40, %v1353_v41  ;;  %v5715_v62 = vld [vmem:[%s5623_s28 + $0x50] sm:$0xff]  ;;  %v1910_v41 = vrot.slane %v5695_v53, 2 }
  0x57   : > { %4852 = vmatmul.mubr.msk.f32.vlgmr.msra.gmra.mxu1 %vm470_vm1, %v5429_v48  ;;  %4896 = vmatpush3.msra.mxu0 %v4294_v6  ;;  %v5676_v48 = vld [vmem:[%s5623_s28 + $0x28] sm:$0x3]  ;;  %v1757_v5 = vrot.slane %v5715_v62, 1  ;;  %v1913_v43 = vrot.slane %v5715_v62, 2 }
  0x58   : > { %4880 = vmatpush3.msra.mxu1 %v4284_v26  ;;  %4854 = vmatprep.mubr.msk.f32.mxu1 %vm470_vm1, %v5372_v23  ;;  %v4304_v23 = vld [vmem:[%s6543_s3 + $0xb8] sm:$0xff]  ;;  %v1749_v56 = vrot.slane %v5676_v48, 1  ;;  %v3841_v26 = vrot.slane %v5796_v25, 2 }
  0x59   : > { %4870 = vmatprep.mubr.msk.f32.mxu0 %vm470_vm1, %v5473_v1  ;;  %4881 = vmatprep.subr.mxu1 %v4283_v30  ;;  %v5730_v1 = vld [vmem:[%s5623_s28 + $0x68] sm:$0x3] }
  0x5a   : > { %4871 = vmatmul.mubr.msk.f32.gmra.mxu0 %vm470_vm1, %v5492_v7  ;;  %4882 = vmatpush3.msra.mxu1 %v4283_v30  ;;  %v5735_v2 = vsel %vm442_vm0, %v1748_v55, %v1749_v56  ;;  %v1758_v7 = vrot.slane %v5718_v63, 1  ;;  %v1761_v10 = vrot.slane %v5730_v1, 1  ;;  %v3842_v30 = vrot.slane %v423_v27, 2 }
  0x5b   : > { %4855 = vmatmul.mubr.msk.f32.gmra.mxu1 %vm470_vm1, %v5402_v36  ;;  %4873 = vmatprep.mubr.msk.f32.mxu0 %vm470_vm1, %v5502_v11  ;;  %v1742_v36 = vrot.slane %v5636_v33, 1  ;;  %v5755_v11 = vld [vmem:[%s5623_s28 + $0x70] sm:$0xff] }
  0x5c   : > { %4857 = vmatprep.mubr.msk.f32.mxu1 %vm470_vm1, %v5420_v45  ;;  %4897 = vmatprep.subr.mxu0 %v4293_v32  ;;  %v1745_v45 = vrot.slane %v5651_v38, 1  ;;  %v5776_v17 = vsel %vm442_vm0, %v1757_v5, %v1758_v7  ;;  %v1763_v13 = vrot.slane %v5755_v11, 1  ;;  %v5786_v20 = vsel %vm442_vm0, %v1760_v9, %v1761_v10  ;;  %v4374_v7 = vld [vmem:[%s6543_s3 + $0x128] sm:$0xff] }
  0x5d   : > { %4898 = vmatpush3.msra.mxu0 %v4293_v32  ;;  %4911 = vmatprep.subr.mxu1 %v4304_v23  ;;  %v1744_v51 = vsel %vm442_vm0, %v1742_v36, %v1743_v42  ;;  %v1904_v32 = vrot.slane %v5673_v47, 2  ;;  %v1911_v36 = vrot.slane %v5698_v54, 2  ;;  %v1919_v55 = vrot.slane %v5755_v11, 2 }
  0x5e   : > { %4874 = vmatmul.mubr.msk.f32.gmra.mxu0 %vm470_vm1, %v5511_v12  ;;  %4927 = vmatprep.subr.mxu0 %v4314_v39  ;;  %v5706_v57 = vsel %vm442_vm0, %v1745_v45, %v1746_v46  ;;  %v5758_v12 = vld [vmem:[%s5623_s28 + $0x78] sm:$0x3]  ;;  %v4333_v46 = vld [vmem:[%s6543_s3 + $0xe0] sm:$0xff] }
  0x5f   : > { %4858 = vmatmul.mubr.msk.f32.gmra.mxu1 %vm470_vm1, %v5432_v49  ;;  %4876 = vmatprep.mubr.msk.f32.mxu0 %vm470_vm1, %v1113_v29  ;;  %v5683_v49 = vld [vmem:[%s5623_s28 + $0x30] sm:$0xff]  ;;  %v1764_v18 = vrot.slane %v5758_v12, 1  ;;  %v3721_v29 = vrot.slane %v423_v27, 1  ;;  %v5854_v45 = vsel %vm713_vm2, %v1910_v41, %v1911_v36  ;;  %v1920_v56 = vrot.slane %v5758_v12, 2  ;;  %v4414_v27 = vld [vmem:[%s6543_s3 + $0x168] sm:$0xff] }
  0x60   : > { %4860 = vmatprep.mubr.msk.f32.mxu1 %vm470_vm1, %v5560_v24  ;;  %v1751_v58 = vrot.slane %v5683_v49, 1  ;;  %v1899_v24 = vrot.slane %v5639_v34, 2  ;;  %v1907_v37 = vrot.slane %v5683_v49, 2  ;;  %v411_v41 = vld [vmem:[%s5791_s7 + $0x38] sm:$0x3] }
  0x61   : > { %v5807_v6 = vsel %vm442_vm0, %v1763_v13, %v1764_v18  ;;  %v5820_v34 = vsel %vm442_vm0, %v3720_v22, %v3721_v29  ;;  %v5895_v60 = vsel %vm713_vm2, %v1919_v55, %v1920_v56  ;;  %v5964_v13 = vld [vmem:[%s5623_s28 + $0x90] sm:$0xff]  ;;  %v6037_v22 = vld [vmem:[%s6543_s3 + $0x158] sm:$0xff] }
  0x62   : > { %4877 = vmatmul.mubr.msk.f32.gmra.mxu0 %vm470_vm1, %v1475_v44  ;;  %v5743_v4 = vsel %vm442_vm0, %v1751_v58, %v1752_v59  ;;  %v1900_v31 = vsel %vm713_vm2, %v1898_v21, %v1899_v24  ;;  %v1914_v44 = vrot.slane %v5718_v63, 2  ;;  %v5890_v59 = vld [vmem:[%s5623_s28 + $0x80] sm:$0xff]  ;;  %v401_v63 = vld [vmem:[%s5623_s28 + $0x88] sm:$0x3]  ;;  %v4383_v18 = vld [vmem:[%s6543_s3 + $0x130] sm:$0xff] }
  0x63   : > { %4861 = vmatmul.mubr.msk.f32.gmra.mxu1 %vm470_vm1, %v1354_v50  ;;  %4899 = vmatprep.mubr.msk.f32.mxu0 %vm470_vm1, %v1744_v51  ;;  %v1917_v50 = vrot.slane %v5730_v1, 2  ;;  %v4344_v51 = vld [vmem:[%s6543_s3 + $0xf8] sm:$0xff]  ;;  %v2296_v5 = vrot.slane %v401_v63, 2  ;;  %v2174_v9 = vrot.slane %v5890_v59, 1  ;;  %v2175_v10 = vrot.slane %v401_v63, 1  ;;  %v4393_v21 = vld [vmem:[%s6543_s3 + $0x140] sm:$0xff] }
  0x64   : > { %4883 = vmatprep.mubr.msk.f32.mxu1 %vm470_vm1, %v5636_v33  ;;  %v1905_v33 = vrot.slane %v5676_v48, 2  ;;  %v1916_v48 = vrot.slane %v5727_v0, 2  ;;  %v5876_v54 = vsel %vm713_vm2, %v1913_v43, %v1914_v44  ;;  %v4364_v1 = vld [vmem:[%s6543_s3 + $0x118] sm:$0xff]  ;;  %v405_v24 = vld [vmem:[%s5791_s7 + $0x8] sm:$0x3] }
  0x65   : > { %v415_v63 = vld [vmem:[%s5791_s7 + $0x58] sm:$0x3] }
  0x66   : > { %4900 = vmatmul.mubr.msk.f32.vlgmr.msra.gmra.mxu0 %vm470_vm1, %v5706_v57  ;;  %v5834_v40 = vsel %vm713_vm2, %v1904_v32, %v1905_v33  ;;  %v5881_v58 = vsel %vm713_vm2, %v1916_v48, %v1917_v50  ;;  %v2927_v33 = vrot.slane %v405_v24, 1  ;;  %v413_v48 = vld [vmem:[%s5791_s7 + $0x48] sm:$0x3] }
  0x67   : > { %4884 = vmatmul.mubr.msk.f32.vlgmr.msra.gmra.mxu1 %vm470_vm1, %v5651_v38  ;;  %4928 = vmatpush3.msra.mxu0 %v4314_v39  ;;  %v1908_v39 = vrot.slane %v5686_v52, 2  ;;  %v4354_v52 = vld [vmem:[%s6543_s3 + $0x108] sm:$0xff] }
  0x68   : > { %4912 = vmatpush3.msra.mxu1 %v4304_v23  ;;  %4886 = vmatprep.mubr.msk.f32.mxu1 %vm470_vm1, %v5673_v47  ;;  %v5823_v23 = vsel %vm713_vm2, %v3841_v26, %v3842_v30  ;;  %v2657_v26 = vrot.slane %v5964_v13, 2  ;;  %v3083_v30 = vrot.slane %v405_v24, 2 }
  0x69   : > { %4902 = vmatprep.mubr.msk.f32.mxu0 %vm470_vm1, %v5735_v2  ;;  %4913 = vmatprep.subr.mxu1 %v4303_v3  ;;  %v5847_v42 = vsel %vm713_vm2, %v1907_v37, %v1908_v39  ;;  %v6067_v39 = vld [vmem:[%s5791_s7 + $0x70] sm:$0xff] }
  0x6a   : > { %4903 = vmatmul.mubr.msk.f32.gmra.mxu0 %vm470_vm1, %v5743_v4  ;;  %4914 = vmatpush3.msra.mxu1 %v4303_v3  ;;  %v2295_v3 = vrot.slane %v5890_v59, 2 }
  0x6b   : > { %4887 = vmatmul.mubr.msk.f32.gmra.mxu1 %vm470_vm1, %v5683_v49  ;;  %4905 = vmatprep.mubr.msk.f32.mxu0 %vm470_vm1, %v5750_v8 }
  0x6c   : > { %4889 = vmatprep.mubr.msk.f32.mxu1 %vm470_vm1, %v5695_v53  ;;  %4929 = vmatprep.subr.mxu0 %v4313_v14  ;;  %v5942_v12 = vsel %vm713_vm2, %v2295_v3, %v2296_v5  ;;  %v2939_v3 = vrot.slane %v413_v48, 1  ;;  %v417_v5 = vld [vmem:[%s5791_s7 + $0x68] sm:$0x3] }
  0x6d   : > { %4930 = vmatpush3.msra.mxu0 %v4313_v14  ;;  %4943 = vmatprep.subr.mxu1 %v4324_v16  ;;  %v2176_v14 = vsel %vm442_vm0, %v2174_v9, %v2175_v10  ;;  %v4403_v10 = vld [vmem:[%s6543_s3 + $0x150] sm:$0xff] }
  0x6e   : > { %4906 = vmatmul.mubr.msk.f32.gmra.mxu0 %vm470_vm1, %v5776_v17  ;;  %4959 = vmatprep.subr.mxu0 %v4334_v19 }
  0x6f   : > { %4890 = vmatmul.mubr.msk.f32.gmra.mxu1 %vm470_vm1, %v5715_v62  ;;  %4908 = vmatprep.mubr.msk.f32.mxu0 %vm470_vm1, %v5786_v20 }
  0x70   : > { %4892 = vmatprep.mubr.msk.f32.mxu1 %vm470_vm1, %v5727_v0 }
  0x72   : > { %4909 = vmatmul.mubr.msk.f32.gmra.mxu0 %vm470_vm1, %v5807_v6 }
  0x73   : > { %4893 = vmatmul.mubr.msk.f32.gmra.mxu1 %vm470_vm1, %v5755_v11  ;;  %4931 = vmatprep.mubr.msk.f32.mxu0 %vm470_vm1, %v5651_v38  ;;  %v4323_v38 = vld [vmem:[%s6543_s3 + $0xd0] sm:$0xff] }
  0x74   : > { %4915 = vmatprep.mubr.msk.f32.mxu1 %vm470_vm1, %v1900_v31  ;;  %v407_v31 = vld [vmem:[%s5791_s7 + $0x18] sm:$0x3] }
  0x75   : > { %v2930_v43 = vrot.slane %v407_v31, 1 }
  0x76   : > { %4932 = vmatmul.mubr.msk.f32.vlgmr.msra.gmra.mxu0 %vm470_vm1, %v5673_v47 }
  0x77   : > { %4916 = vmatmul.mubr.msk.f32.vlgmr.msra.gmra.mxu1 %vm470_vm1, %v1903_v35  ;;  %4960 = vmatpush3.msra.mxu0 %v4334_v19  ;;  %v6019_v19 = vld [vmem:[%s5791_s7 + $0x30] sm:$0xff] }
  0x78   : > { %4944 = vmatpush3.msra.mxu1 %v4324_v16  ;;  %4918 = vmatprep.mubr.msk.f32.mxu1 %vm470_vm1, %v5834_v40  ;;  %v4363_v16 = vld [vmem:[%s6543_s3 + $0x110] sm:$0xff]  ;;  %v3091_v56 = vrot.slane %v6019_v19, 2 }
  0x79   : > { %4934 = vmatprep.mubr.msk.f32.mxu0 %vm470_vm1, %v5683_v49  ;;  %4945 = vmatprep.subr.mxu1 %v4323_v38 }
  0x7a   : > { %4935 = vmatmul.mubr.msk.f32.gmra.mxu0 %vm470_vm1, %v5695_v53  ;;  %4946 = vmatpush3.msra.mxu1 %v4323_v38 }
  0x7b   : > { %4919 = vmatmul.mubr.msk.f32.gmra.mxu1 %vm470_vm1, %v5847_v42  ;;  %4937 = vmatprep.mubr.msk.f32.mxu0 %vm470_vm1, %v5715_v62 }
  0x7c   : > { %4921 = vmatprep.mubr.msk.f32.mxu1 %vm470_vm1, %v5854_v45  ;;  %4961 = vmatprep.subr.mxu0 %v4333_v46 }
  0x7d   : > { %4962 = vmatpush3.msra.mxu0 %v4333_v46  ;;  %4975 = vmatprep.subr.mxu1 %v4344_v51 }
  0x7e   : > { %4938 = vmatmul.mubr.msk.f32.gmra.mxu0 %vm470_vm1, %v5727_v0  ;;  %4991 = vmatprep.subr.mxu0 %v4354_v52 }
  0x7f   : > { %4922 = vmatmul.mubr.msk.f32.gmra.mxu1 %vm470_vm1, %v5876_v54  ;;  %4940 = vmatprep.mubr.msk.f32.mxu0 %vm470_vm1, %v5755_v11 }
  0x80   : > { %4924 = vmatprep.mubr.msk.f32.mxu1 %vm470_vm1, %v5881_v58 }
  0x82   : > { %4941 = vmatmul.mubr.msk.f32.gmra.mxu0 %vm470_vm1, %v5890_v59 }
  0x83   : > { %4925 = vmatmul.mubr.msk.f32.gmra.mxu1 %vm470_vm1, %v5895_v60  ;;  %4963 = vmatprep.mubr.msk.f32.mxu0 %vm470_vm1, %v1903_v35  ;;  %v409_v35 = vld [vmem:[%s5791_s7 + $0x28] sm:$0x3] }
  0x84   : > { %4947 = vmatprep.mubr.msk.f32.mxu1 %vm470_vm1, %v5706_v57  ;;  %v4353_v57 = vld [vmem:[%s6543_s3 + $0x100] sm:$0xff]  ;;  %v2933_v46 = vrot.slane %v409_v35, 1 }
  0x86   : > { %4964 = vmatmul.mubr.msk.f32.vlgmr.msra.gmra.mxu0 %vm470_vm1, %v5834_v40 }
  0x87   : > { %4948 = vmatmul.mubr.msk.f32.vlgmr.msra.gmra.mxu1 %vm470_vm1, %v5735_v2  ;;  %4992 = vmatpush3.msra.mxu0 %v4354_v52  ;;  %v2935_v52 = vrot.slane %v6019_v19, 1 }
  0x88   : > { %4976 = vmatpush3.msra.mxu1 %v4344_v51  ;;  %4950 = vmatprep.mubr.msk.f32.mxu1 %vm470_vm1, %v5743_v4  ;;  %v3089_v51 = vrot.slane %v409_v35, 2 }
  0x89   : > { %4966 = vmatprep.mubr.msk.f32.mxu0 %vm470_vm1, %v5847_v42  ;;  %4977 = vmatprep.subr.mxu1 %v4343_v61 }
  0x8a   : > { %4967 = vmatmul.mubr.msk.f32.gmra.mxu0 %vm470_vm1, %v5854_v45  ;;  %4978 = vmatpush3.msra.mxu1 %v4343_v61  ;;  %v3095_v61 = vrot.slane %v413_v48, 2 }
  0x8b   : > { %4951 = vmatmul.mubr.msk.f32.gmra.mxu1 %vm470_vm1, %v5750_v8  ;;  %4969 = vmatprep.mubr.msk.f32.mxu0 %vm470_vm1, %v5876_v54 }
  0x8c   : > { %4953 = vmatprep.mubr.msk.f32.mxu1 %vm470_vm1, %v5776_v17  ;;  %4993 = vmatprep.subr.mxu0 %v4353_v57 }
  0x8d   : > { %4994 = vmatpush3.msra.mxu0 %v4353_v57  ;;  %5007 = vmatprep.subr.mxu1 %v4364_v1 }
  0x8e   : > { %4970 = vmatmul.mubr.msk.f32.gmra.mxu0 %vm470_vm1, %v5881_v58  ;;  %5023 = vmatprep.subr.mxu0 %v4374_v7 }
  0x8f   : > { %4954 = vmatmul.mubr.msk.f32.gmra.mxu1 %vm470_vm1, %v5786_v20  ;;  %4972 = vmatprep.mubr.msk.f32.mxu0 %vm470_vm1, %v5895_v60 }
  0x90   : > { %4956 = vmatprep.mubr.msk.f32.mxu1 %vm470_vm1, %v5807_v6 }
  0x92   : > { %4973 = vmatmul.mubr.msk.f32.gmra.mxu0 %vm470_vm1, %v5942_v12 }
  0x93   : > { %4957 = vmatmul.mubr.msk.f32.gmra.mxu1 %vm470_vm1, %v2176_v14  ;;  %4995 = vmatprep.mubr.msk.f32.mxu0 %vm470_vm1, %v5735_v2  ;;  %v5967_v2 = vld [vmem:[%s5623_s28 + $0x98] sm:$0x3] }
  0x94   : > { %4979 = vmatprep.mubr.msk.f32.mxu1 %vm470_vm1, %v5673_v47  ;;  %v4373_v47 = vld [vmem:[%s6543_s3 + $0x120] sm:$0xff]  ;;  %v2658_v29 = vrot.slane %v5967_v2, 2 }
  0x96   : > { %4996 = vmatmul.mubr.msk.f32.vlgmr.msra.gmra.mxu0 %vm470_vm1, %v5743_v4  ;;  %v2537_v4 = vrot.slane %v5967_v2, 1  ;;  %v2659_v38 = vsel %vm713_vm2, %v2657_v26, %v2658_v29 }
  0x97   : > { %4980 = vmatmul.mubr.msk.f32.vlgmr.msra.gmra.mxu1 %vm470_vm1, %v5683_v49  ;;  %5024 = vmatpush3.msra.mxu0 %v4374_v7  ;;  %v4384_v49 = vld [vmem:[%s6543_s3 + $0x138] sm:$0xff] }
  0x98   : > { %5008 = vmatpush3.msra.mxu1 %v4364_v1  ;;  %4982 = vmatprep.mubr.msk.f32.mxu1 %vm470_vm1, %v5695_v53  ;;  %v2536_v53 = vrot.slane %v5964_v13, 1 }
  0x99   : > { %4998 = vmatprep.mubr.msk.f32.mxu0 %vm470_vm1, %v5750_v8  ;;  %5009 = vmatprep.subr.mxu1 %v4363_v16  ;;  %v4394_v8 = vld [vmem:[%s6543_s3 + $0x148] sm:$0xff] }
  0x9a   : > { %4999 = vmatmul.mubr.msk.f32.gmra.mxu0 %vm470_vm1, %v5776_v17  ;;  %5010 = vmatpush3.msra.mxu1 %v4363_v16  ;;  %v6004_v17 = vld [vmem:[%s5791_s7 + $0x10] sm:$0xff] }
  0x9b   : > { %4983 = vmatmul.mubr.msk.f32.gmra.mxu1 %vm470_vm1, %v5715_v62  ;;  %5001 = vmatprep.mubr.msk.f32.mxu0 %vm470_vm1, %v5786_v20  ;;  %v2538_v62 = vsel %vm442_vm0, %v2536_v53, %v2537_v4  ;;  %v6024_v20 = vld [vmem:[%s5791_s7 + $0x40] sm:$0xff]  ;;  %v3085_v37 = vrot.slane %v6004_v17, 2  ;;  %v2929_v36 = vrot.slane %v6004_v17, 1  ;;  %v3101_v53 = vrot.slane %v417_v5, 2  ;;  %v419_v4 = vld [vmem:[%s5791_s7 + $0x78] sm:$0x3] }
  0x9c   : > { %4985 = vmatprep.mubr.msk.f32.mxu1 %vm470_vm1, %v5727_v0  ;;  %5025 = vmatprep.subr.mxu0 %v4373_v47  ;;  %v404_v0 = vld [vmem:[%s5791_s7] sm:$0xff]  ;;  %v2938_v1 = vrot.slane %v6024_v20, 1  ;;  %v3104_v26 = vrot.slane %v419_v4, 2 }
  0x9d   : > { %5026 = vmatpush3.msra.mxu0 %v4373_v47  ;;  %5039 = vmatprep.subr.mxu1 %v4384_v49  ;;  %v3082_v15 = vrot.slane %v404_v0, 2  ;;  %v2926_v32 = vrot.slane %v404_v0, 1  ;;  %v2942_v47 = vrot.slane %v415_v63, 1 }
  0x9e   : > { %5002 = vmatmul.mubr.msk.f32.gmra.mxu0 %vm470_vm1, %v5807_v6  ;;  %5055 = vmatprep.subr.mxu0 %v4394_v8  ;;  %v6045_v6 = vld [vmem:[%s5791_s7 + $0x50] sm:$0xff] }
  0x9f   : > { %4986 = vmatmul.mubr.msk.f32.gmra.mxu1 %vm470_vm1, %v5755_v11  ;;  %5004 = vmatprep.mubr.msk.f32.mxu0 %vm470_vm1, %v2176_v14  ;;  %v6011_v11 = vld [vmem:[%s5791_s7 + $0x20] sm:$0xff]  ;;  %v2928_v44 = vsel %vm442_vm0, %v2926_v32, %v2927_v33  ;;  %v2941_v14 = vrot.slane %v6045_v6, 1  ;;  %v3097_v16 = vrot.slane %v6045_v6, 2 }
  0xa0   : > { %4988 = vmatprep.mubr.msk.f32.mxu1 %vm470_vm1, %v5890_v59  ;;  %v3088_v50 = vrot.slane %v6011_v11, 2  ;;  %v2931_v59 = vsel %vm442_vm0, %v2929_v36, %v2930_v43  ;;  %v4444_v36 = vld [vmem:[%s6543_s3 + $0x198] sm:$0xff]  ;;  %v4454_v43 = vld [vmem:[%s6543_s3 + $0x1a8] sm:$0xff] }
  0xa2   : > { %5005 = vmatmul.mubr.msk.f32.gmra.mxu0 %vm470_vm1, %v2538_v62  ;;  %v6100_v7 = vsel %vm713_vm2, %v3088_v50, %v3089_v51  ;;  %v4413_v62 = vld [vmem:[%s6543_s3 + $0x160] sm:$0xff] }
  0xa3   : > { %4989 = vmatmul.mubr.msk.f32.gmra.mxu1 %vm470_vm1, %v5964_v13  ;;  %5027 = vmatprep.mubr.msk.f32.mxu0 %vm470_vm1, %v404_v0  ;;  %v3098_v13 = vrot.slane %v415_v63, 2  ;;  %v2944_v0 = vrot.slane %v6053_v28, 1 }
  0xa4   : > { %5011 = vmatprep.mubr.msk.f32.mxu1 %vm470_vm1, %v5834_v40  ;;  %v3086_v40 = vrot.slane %v407_v31, 2  ;;  %v2948_v31 = vrot.slane %v419_v4, 1 }
  0xa5   : > { %v6141_v24 = vsel %vm713_vm2, %v3097_v16, %v3098_v13 }
  0xa6   : > { %5028 = vmatmul.mubr.msk.f32.vlgmr.msra.gmra.mxu0 %vm470_vm1, %v6004_v17  ;;  %v6085_v55 = vsel %vm713_vm2, %v3085_v37, %v3086_v40  ;;  %v4423_v37 = vld [vmem:[%s6543_s3 + $0x170] sm:$0xff]  ;;  %v420_v40 = vld [vmem:[%s5791_s7 + $0x80] sm:$0xff] }
  0xa7   : > { %5012 = vmatmul.mubr.msk.f32.vlgmr.msra.gmra.mxu1 %vm470_vm1, %v5847_v42  ;;  %5056 = vmatpush3.msra.mxu0 %v4394_v8  ;;  %v3084_v42 = vsel %vm713_vm2, %v3082_v15, %v3083_v30  ;;  %v6125_v8 = vsel %vm442_vm0, %v2938_v1, %v2939_v3  ;;  %v6150_v15 = vsel %vm442_vm0, %v2941_v14, %v2942_v47  ;;  %v2947_v30 = vrot.slane %v6067_v39, 1 }
  0xa8   : > { %5040 = vmatpush3.msra.mxu1 %v4384_v49  ;;  %5014 = vmatprep.mubr.msk.f32.mxu1 %vm470_vm1, %v5854_v45  ;;  %v2932_v45 = vrot.slane %v6011_v11, 1  ;;  %v3100_v49 = vrot.slane %v6053_v28, 2 }
  0xa9   : > { %5030 = vmatprep.mubr.msk.f32.mxu0 %vm470_vm1, %v6011_v11  ;;  %5041 = vmatprep.subr.mxu1 %v4383_v18  ;;  %v6171_v35 = vsel %vm442_vm0, %v2947_v30, %v2948_v31 }
  0xaa   : > { %5031 = vmatmul.mubr.msk.f32.gmra.mxu0 %vm470_vm1, %v6019_v19  ;;  %5042 = vmatpush3.msra.mxu1 %v4383_v18  ;;  %v6093_v57 = vsel %vm442_vm0, %v2932_v45, %v2933_v46  ;;  %v2945_v18 = vrot.slane %v417_v5, 1  ;;  %v6153_v29 = vsel %vm713_vm2, %v3100_v49, %v3101_v53  ;;  %v4443_v45 = vld [vmem:[%s6543_s3 + $0x190] sm:$0xff] }
  0xab   : > { %5015 = vmatmul.mubr.msk.f32.gmra.mxu1 %vm470_vm1, %v5876_v54  ;;  %5033 = vmatprep.mubr.msk.f32.mxu0 %vm470_vm1, %v6024_v20  ;;  %v2936_v54 = vrot.slane %v411_v41, 1 }
  0xac   : > { %5017 = vmatprep.mubr.msk.f32.mxu1 %vm470_vm1, %v5881_v58  ;;  %5057 = vmatprep.subr.mxu0 %v4393_v21  ;;  %v3092_v58 = vrot.slane %v411_v41, 2  ;;  %v6157_v32 = vsel %vm442_vm0, %v2944_v0, %v2945_v18  ;;  %v421_v41 = vld [vmem:[%s5791_s7 + $0x88] sm:$0x3]  ;;  %s363_s7 = scalar_lea.vmem %s6545_s5, %s4194_s16 }
  0xad   : > { %5058 = vmatpush3.msra.mxu0 %v4393_v21  ;;  %5071 = vmatprep.subr.mxu1 %v6037_v22  ;;  %v6103_v9 = vsel %vm442_vm0, %v2935_v52, %v2936_v54  ;;  %v4424_v21 = vld [vmem:[%s6543_s3 + $0x178] sm:$0xff] }
  0xae   : > { %5034 = vmatmul.mubr.msk.f32.gmra.mxu0 %vm470_vm1, %v6045_v6  ;;  %5087 = vmatprep.subr.mxu0 %v4414_v27 }
  0xaf   : > { %5018 = vmatmul.mubr.msk.f32.gmra.mxu1 %vm470_vm1, %v5895_v60  ;;  %5036 = vmatprep.mubr.msk.f32.mxu0 %vm470_vm1, %v6053_v28  ;;  %v3094_v60 = vrot.slane %v6024_v20, 2 }
  0xb0   : > { %5020 = vmatprep.mubr.msk.f32.mxu1 %vm470_vm1, %v5942_v12  ;;  %v6110_v12 = vsel %vm713_vm2, %v3091_v56, %v3092_v58 }
  0xb1   : > { %v6118_v2 = vsel %vm713_vm2, %v3094_v60, %v3095_v61 }
  0xb2   : > { %5037 = vmatmul.mubr.msk.f32.gmra.mxu0 %vm470_vm1, %v6067_v39 }
  0xb3   : > { %5021 = vmatmul.mubr.msk.f32.gmra.mxu1 %vm470_vm1, %v2659_v38  ;;  %5059 = vmatprep.mubr.msk.f32.mxu0 %vm470_vm1, %v3084_v42  ;;  %v3358_v38 = vrot.slane %v420_v40, 1  ;;  %v3359_v42 = vrot.slane %v421_v41, 1 }
  0xb4   : > { %5043 = vmatprep.mubr.msk.f32.mxu1 %vm470_vm1, %v2928_v44 }
  0xb5   : > { %v6217_v44 = vsel %vm442_vm0, %v3358_v38, %v3359_v42 }
  0xb6   : > { %5060 = vmatmul.mubr.msk.f32.vlgmr.msra.gmra.mxu0 %vm470_vm1, %v6085_v55 }
  0xb7   : > { %5044 = vmatmul.mubr.msk.f32.vlgmr.msra.gmra.mxu1 %vm470_vm1, %v2931_v59  ;;  %5088 = vmatpush3.msra.mxu0 %v4414_v27  ;;  %v4434_v27 = vld [vmem:[%s6543_s3 + $0x188] sm:$0xff] }
  0xb8   : > { %5072 = vmatpush3.msra.mxu1 %v6037_v22  ;;  %5046 = vmatprep.mubr.msk.f32.mxu1 %vm470_vm1, %v6093_v57  ;;  %v3103_v22 = vrot.slane %v6067_v39, 2 }
  0xb9   : > { %5062 = vmatprep.mubr.msk.f32.mxu0 %vm470_vm1, %v6100_v7  ;;  %5073 = vmatprep.subr.mxu1 %v4403_v10 }
  0xba   : > { %5063 = vmatmul.mubr.msk.f32.gmra.mxu0 %vm470_vm1, %v6110_v12  ;;  %5074 = vmatpush3.msra.mxu1 %v4403_v10  ;;  %v6166_v33 = vsel %vm713_vm2, %v3103_v22, %v3104_v26 }
  0xbb   : > { %5047 = vmatmul.mubr.msk.f32.gmra.mxu1 %vm470_vm1, %v6103_v9  ;;  %5065 = vmatprep.mubr.msk.f32.mxu0 %vm470_vm1, %v6118_v2 }
  0xbc   : > { %5049 = vmatprep.mubr.msk.f32.mxu1 %vm470_vm1, %v6125_v8  ;;  %5089 = vmatprep.subr.mxu0 %v4413_v62 }
  0xbd   : > { %5090 = vmatpush3.msra.mxu0 %v4413_v62  ;;  %5103 = vmatprep.subr.mxu1 %v4424_v21 }
  0xbe   : > { %5066 = vmatmul.mubr.msk.f32.gmra.mxu0 %vm470_vm1, %v6141_v24  ;;  %5119 = vmatprep.subr.mxu0 %v4434_v27 }
  0xbf   : > { %5050 = vmatmul.mubr.msk.f32.gmra.mxu1 %vm470_vm1, %v6150_v15  ;;  %5068 = vmatprep.mubr.msk.f32.mxu0 %vm470_vm1, %v6153_v29 }
  0xc0   : > { %5052 = vmatprep.mubr.msk.f32.mxu1 %vm470_vm1, %v6157_v32 }
  0xc2   : > { %5069 = vmatmul.mubr.msk.f32.gmra.mxu0 %vm470_vm1, %v6166_v33 }
  0xc3   : > { %5053 = vmatmul.mubr.msk.f32.gmra.mxu1 %vm470_vm1, %v6171_v35  ;;  %5091 = vmatprep.mubr.msk.f32.mxu0 %vm470_vm1, %v2931_v59 }
  0xc4   : > { %5075 = vmatprep.mubr.msk.f32.mxu1 %vm470_vm1, %v6004_v17  ;;  %v4433_v17 = vld [vmem:[%s6543_s3 + $0x180] sm:$0xff] }
  0xc6   : > { %5092 = vmatmul.mubr.msk.f32.vlgmr.msra.gmra.mxu0 %vm470_vm1, %v6093_v57 }
  0xc7   : > { %5076 = vmatmul.mubr.msk.f32.vlgmr.msra.gmra.mxu1 %vm470_vm1, %v6011_v11  ;;  %5120 = vmatpush3.msra.mxu0 %v4434_v27 }
  0xc8   : > { %5104 = vmatpush3.msra.mxu1 %v4424_v21  ;;  %5078 = vmatprep.mubr.msk.f32.mxu1 %vm470_vm1, %v6019_v19 }
  0xc9   : > { %5094 = vmatprep.mubr.msk.f32.mxu0 %vm470_vm1, %v6103_v9  ;;  %5105 = vmatprep.subr.mxu1 %v4423_v37 }
  0xca   : > { %5095 = vmatmul.mubr.msk.f32.gmra.mxu0 %vm470_vm1, %v6125_v8  ;;  %5106 = vmatpush3.msra.mxu1 %v4423_v37 }
  0xcb   : > { %5079 = vmatmul.mubr.msk.f32.gmra.mxu1 %vm470_vm1, %v6024_v20  ;;  %5097 = vmatprep.mubr.msk.f32.mxu0 %vm470_vm1, %v6150_v15 }
  0xcc   : > { %5081 = vmatprep.mubr.msk.f32.mxu1 %vm470_vm1, %v6045_v6  ;;  %5121 = vmatprep.subr.mxu0 %v4433_v17 }
  0xcd   : > { %5122 = vmatpush3.msra.mxu0 %v4433_v17  ;;  %5135 = vmatprep.subr.mxu1 %v4444_v36 }
  0xce   : > { %5098 = vmatmul.mubr.msk.f32.gmra.mxu0 %vm470_vm1, %v6157_v32  ;;  %5151 = vmatprep.subr.mxu0 %v4454_v43 }
  0xcf   : > { %5082 = vmatmul.mubr.msk.f32.gmra.mxu1 %vm470_vm1, %v6053_v28  ;;  %5100 = vmatprep.mubr.msk.f32.mxu0 %vm470_vm1, %v6171_v35 }
  0xd0   : > { %5084 = vmatprep.mubr.msk.f32.mxu1 %vm470_vm1, %v6067_v39 }
  0xd2   : > { %5101 = vmatmul.mubr.msk.f32.gmra.mxu0 %vm470_vm1, %v6217_v44 }
  0xd3   : > { %5085 = vmatmul.mubr.msk.f32.gmra.mxu1 %vm470_vm1, %v420_v40  ;;  %5123 = vmatprep.mubr.msk.f32.mxu0 %vm470_vm1, %v6011_v11  ;;  %v4453_v11 = vld [vmem:[%s6543_s3 + $0x1a0] sm:$0xff] }
  0xd4   : > { %5107 = vmatprep.mubr.msk.f32.mxu1 %vm470_vm1, %v6085_v55 }
  0xd6   : > { %5124 = vmatmul.mubr.msk.f32.vlgmr.msra.gmra.mxu0 %vm470_vm1, %v6019_v19  ;;  %v3479_v19 = vrot.slane %v420_v40, 2 }
  0xd7   : > { %5108 = vmatmul.mubr.msk.f32.vlgmr.msra.gmra.mxu1 %vm470_vm1, %v6100_v7  ;;  %5152 = vmatpush3.msra.mxu0 %v4454_v43 }
  0xd8   : > { %5136 = vmatpush3.msra.mxu1 %v4444_v36  ;;  %5110 = vmatprep.mubr.msk.f32.mxu1 %vm470_vm1, %v6110_v12 }
  0xd9   : > { %5126 = vmatprep.mubr.msk.f32.mxu0 %vm470_vm1, %v6024_v20  ;;  %5137 = vmatprep.subr.mxu1 %v4443_v45  ;;  %v3480_v20 = vrot.slane %v421_v41, 2 }
  0xda   : > { %5127 = vmatmul.mubr.msk.f32.gmra.mxu0 %vm470_vm1, %v6045_v6  ;;  %5138 = vmatpush3.msra.mxu1 %v4443_v45 }
  0xdb   : > { %5111 = vmatmul.mubr.msk.f32.gmra.mxu1 %vm470_vm1, %v6118_v2  ;;  %5129 = vmatprep.mubr.msk.f32.mxu0 %vm470_vm1, %v6053_v28  ;;  %v3481_v28 = vsel %vm713_vm2, %v3479_v19, %v3480_v20 }
  0xdc   : > { %5113 = vmatprep.mubr.msk.f32.mxu1 %vm470_vm1, %v6141_v24  ;;  %5153 = vmatprep.subr.mxu0 %v4453_v11 }
  0xdd   : > { %5154 = vmatpush3.msra.mxu0 %v4453_v11 }
  0xde   : > { %v4741_v46 = vpop.f32.mrf.mxu0  ;;  %5130 = vmatmul.mubr.msk.f32.gmra.mxu0 %vm470_vm1, %v6067_v39 }
  0xdf   : > { %v4747_v48 = vpop.f32.mrf.mxu1  ;;  %5114 = vmatmul.mubr.msk.f32.gmra.mxu1 %vm470_vm1, %v6153_v29  ;;  %5132 = vmatprep.mubr.msk.f32.mxu0 %vm470_vm1, %v420_v40 }
  0xe0   : > { %v553_v6 = vpop.f32.mrf.mxu0  ;;  %5116 = vmatprep.mubr.msk.f32.mxu1 %vm470_vm1, %v6166_v33 }
  0xe1   : > { %v573_v50 = vpop.f32.mrf.mxu1 }
  0xe2   : > { %v4744_v51 = vpop.f32.mrf.mxu0  ;;  %5133 = vmatmul.mubr.msk.f32.gmra.mxu0 %vm470_vm1, %v5796_v25 }
  0xe3   : > { %v4750_v52 = vpop.f32.mrf.mxu1  ;;  %5117 = vmatmul.mubr.msk.f32.gmra.mxu1 %vm470_vm1, %v3481_v28  ;;  %5155 = vmatprep.mubr.msk.f32.mxu0 %vm470_vm1, %v6100_v7 }
  0xe4   : > { %v563_v39 = vpop.f32.mrf.mxu0  ;;  %5139 = vmatprep.mubr.msk.f32.mxu1 %vm470_vm1, %v6093_v57 }
  0xe5   : > { %v583_v54 = vpop.f32.mrf.mxu1 }
  0xe6   : > { %v4773_v55 = vpop.f32.mrf.mxu0  ;;  %5156 = vmatmul.mubr.msk.f32.vlgmr.msra.gmra.mxu0 %vm470_vm1, %v6110_v12 }
  0xe7   : > { %v4757_v56 = vpop.f32.mrf.mxu1  ;;  %5140 = vmatmul.mubr.msk.f32.vlgmr.msra.gmra.mxu1 %vm470_vm1, %v6103_v9  ;;  %5158 = vmatprep.mubr.msk.f32.mxu0 %vm470_vm1, %v6118_v2 }
  0xe8   : > { %v680_v25 = vadd.f32 %v4757_v56, %v4741_v46  ;;  %v823_v58 = vpop.f32.mrf.mxu0  ;;  %5142 = vmatprep.mubr.msk.f32.mxu1 %vm470_vm1, %v6125_v8 }
  0xe9   : > { %v674_v59 = vpop.f32.mrf.mxu1 }
  0xea   : > { %v863_v60 = vadd.f32 %v4773_v55, %v680_v25  ;;  %v675_v61 = vadd.f32 %v674_v59, %v553_v6  ;;  %v4776_v63 = vpop.f32.mrf.mxu0  ;;  %5159 = vmatmul.mubr.msk.f32.gmra.mxu0 %vm470_vm1, %v6141_v24 }
  0xeb   : > { %v4760_v57 = vpop.f32.mrf.mxu1  ;;  %5143 = vmatmul.mubr.msk.f32.gmra.mxu1 %vm470_vm1, %v6150_v15  ;;  %5161 = vmatprep.mubr.msk.f32.mxu0 %vm470_vm1, %v6153_v29 }
  0xec   : > { %v862_v1 = vadd.f32 %v823_v58, %v675_v61  ;;  %v690_v3 = vadd.f32 %v4760_v57, %v4744_v51  ;;  %v833_v5 = vpop.f32.mrf.mxu0  ;;  %5145 = vmatprep.mubr.msk.f32.mxu1 %vm470_vm1, %v6157_v32 }
  0xed   : > { %v684_v7 = vpop.f32.mrf.mxu1 }
  0xee   : > { %v865_v9 = vadd.f32 %v4776_v63, %v690_v3  ;;  %v685_v10 = vadd.f32 %v684_v7, %v563_v39  ;;  %v4779_v12 = vpop.f32.mrf.mxu0  ;;  %5162 = vmatmul.mubr.msk.f32.gmra.mxu0 %vm470_vm1, %v6166_v33 }
  0xef   : > { %v4763_v14 = vpop.f32.mrf.mxu1  ;;  %5146 = vmatmul.mubr.msk.f32.gmra.mxu1 %vm470_vm1, %v6171_v35  ;;  %5164 = vmatprep.mubr.msk.f32.mxu0 %vm470_vm1, %v3481_v28 }
  0xf0   : > { %v864_v16 = vadd.f32 %v833_v5, %v685_v10  ;;  %v700_v13 = vadd.f32 %v4763_v14, %v4747_v48  ;;  %v843_v2 = vpop.f32.mrf.mxu0  ;;  %5148 = vmatprep.mubr.msk.f32.mxu1 %vm470_vm1, %v6217_v44 }
  0xf1   : > { %v694_v47 = vpop.f32.mrf.mxu1 }
  0xf2   : > { %v867_v49 = vadd.f32 %v4779_v12, %v700_v13  ;;  %v695_v53 = vadd.f32 %v694_v47, %v573_v50  ;;  %v4782_v4 = vpop.f32.mrf.mxu0  ;;  %5165 = vmatmul.mubr.msk.f32.gmra.mxu0 %vm470_vm1, %v5823_v23 }
  0xf3   : > { %v4766_v8 = vpop.f32.mrf.mxu1  ;;  %5149 = vmatmul.mubr.msk.f32.gmra.mxu1 %vm470_vm1, %v5820_v34 }
  0xf4   : > { %v866_v62 = vadd.f32 %v843_v2, %v695_v53  ;;  %v710_v0 = vadd.f32 %v4766_v8, %v4750_v52  ;;  %v853_v18 = vpop.f32.mrf.mxu0 }
  0xf5   : > { %v704_v21 = vpop.f32.mrf.mxu1 }
  0xf6   : > { %v869_v24 = vadd.f32 %v4782_v4, %v710_v0  ;;  %v705_v22 = vadd.f32 %v704_v21, %v583_v54  ;;  %v4805_v26 = vpop.f32.mrf.mxu0 }
  0xf7   : > { %v4789_v27 = vpop.f32.mrf.mxu1 }
  0xf8   : > { %v868_v15 = vadd.f32 %v853_v18, %v705_v22  ;;  %v982_v29 = vadd.f32 %v4789_v27, %v863_v60  ;;  %v1064_v30 = vpop.f32.mrf.mxu0 }
  0xf9   : > { %v942_v31 = vpop.f32.mrf.mxu1 }
  0xfa   : > { %v1104_v32 = vadd.f32 %v4805_v26, %v982_v29  ;;  %v981_v33 = vadd.f32 %v942_v31, %v862_v1  ;;  %v4808_v35 = vpop.f32.mrf.mxu0 }
  0xfb   : > { %v4792_v23 = vpop.f32.mrf.mxu1 }
  0xfc   : > { %v1103_v37 = vadd.f32 %v1064_v30, %v981_v33  ;;  %v984_v40 = vadd.f32 %v4792_v23, %v865_v9  ;;  %v1074_v41 = vpop.f32.mrf.mxu0 }
  0xfd   : > { %v952_v34 = vpop.f32.mrf.mxu1 }
  0xfe   : > { %v1106_v17 = vadd.f32 %v4808_v35, %v984_v40  ;;  %v983_v36 = vadd.f32 %v952_v34, %v864_v16  ;;  %v4811_v38 = vpop.f32.mrf.mxu0 }
  0xff   : > { %v4795_v42 = vpop.f32.mrf.mxu1 }
 0x100   : > { %v1105_v43 = vadd.f32 %v1074_v41, %v983_v36  ;;  %v986_v44 = vadd.f32 %v4795_v42, %v867_v49  ;;  %v1084_v45 = vpop.f32.mrf.mxu0 }
 0x101   : > { %v962_v11 = vpop.f32.mrf.mxu1 }
 0x102   : > { %v1108_v19 = vadd.f32 %v4811_v38, %v986_v44  ;;  %v985_v20 = vadd.f32 %v962_v11, %v866_v62  ;;  %v4814_v46 = vpop.f32.mrf.mxu0 }
 0x103   : > { %v4798_v48 = vpop.f32.mrf.mxu1 }
 0x104   : > { %v1107_v6 = vadd.f32 %v1084_v45, %v985_v20  ;;  %v988_v28 = vadd.f32 %v4798_v48, %v869_v24  ;;  %v1094_v50 = vpop.f32.mrf.mxu0 }
 0x105   : > { %v972_v51 = vpop.f32.mrf.mxu1 }
 0x106   : > { %v1110_v52 = vadd.f32 %v4814_v46, %v988_v28  ;;  %v987_v39 = vadd.f32 %v972_v51, %v868_v15  ;;  %v4837_v54 = vpop.f32.mrf.mxu0 }
 0x107   : > { %v4821_v55 = vpop.f32.mrf.mxu1 }
 0x108   : > { %v1109_v56 = vadd.f32 %v1094_v50, %v987_v39  ;;  %v1225_v25 = vadd.f32 %v4821_v55, %v1104_v32  ;;  %v1304_v58 = vpop.f32.mrf.mxu0 }
 0x109   : > { %v1185_v59 = vpop.f32.mrf.mxu1 }
 0x10a   : > { %v1344_v60 = vadd.f32 %v4837_v54, %v1225_v25  ;;  %v1224_v61 = vadd.f32 %v1185_v59, %v1103_v37  ;;  %v4840_v63 = vpop.f32.mrf.mxu0 }
 0x10b   : > { %v4824_v57 = vpop.f32.mrf.mxu1 }
 0x10c   : > { %v1343_v1 = vadd.f32 %v1304_v58, %v1224_v61  ;;  %v1227_v3 = vadd.f32 %v4824_v57, %v1106_v17  ;;  %v1314_v5 = vpop.f32.mrf.mxu0 }
 0x10d   : > { %v1195_v7 = vpop.f32.mrf.mxu1 }
 0x10e   : > { %v1346_v9 = vadd.f32 %v4840_v63, %v1227_v3  ;;  %v1226_v10 = vadd.f32 %v1195_v7, %v1105_v43  ;;  %v4843_v12 = vpop.f32.mrf.mxu0 }
 0x10f   : > { %v4827_v14 = vpop.f32.mrf.mxu1 }
 0x110   : > { %v1345_v16 = vadd.f32 %v1314_v5, %v1226_v10  ;;  %v1229_v13 = vadd.f32 %v4827_v14, %v1108_v19  ;;  %v1324_v2 = vpop.f32.mrf.mxu0 }
 0x111   : > { %v1205_v47 = vpop.f32.mrf.mxu1 }
 0x112   : > { %v1348_v49 = vadd.f32 %v4843_v12, %v1229_v13  ;;  %v1228_v53 = vadd.f32 %v1205_v47, %v1107_v6  ;;  %v4846_v4 = vpop.f32.mrf.mxu0 }
 0x113   : > { %v4830_v8 = vpop.f32.mrf.mxu1 }
 0x114   : > { %v1347_v62 = vadd.f32 %v1324_v2, %v1228_v53  ;;  %v1231_v0 = vadd.f32 %v4830_v8, %v1110_v52  ;;  %v1334_v18 = vpop.f32.mrf.mxu0 }
 0x115   : > { %v1215_v21 = vpop.f32.mrf.mxu1 }
 0x116   : > { %v1350_v24 = vadd.f32 %v4846_v4, %v1231_v0  ;;  %v1230_v22 = vadd.f32 %v1215_v21, %v1109_v56  ;;  %v4869_v26 = vpop.f32.mrf.mxu0 }
 0x117   : > { %v4853_v27 = vpop.f32.mrf.mxu1 }
 0x118   : > { %v1349_v15 = vadd.f32 %v1334_v18, %v1230_v22  ;;  %v1466_v29 = vadd.f32 %v4853_v27, %v1344_v60  ;;  %v1547_v30 = vpop.f32.mrf.mxu0 }
 0x119   : > { %v1426_v31 = vpop.f32.mrf.mxu1 }
 0x11a   : > { %v1587_v32 = vadd.f32 %v4869_v26, %v1466_v29  ;;  %v1465_v33 = vadd.f32 %v1426_v31, %v1343_v1  ;;  %v4872_v35 = vpop.f32.mrf.mxu0 }
 0x11b   : > { %v4856_v23 = vpop.f32.mrf.mxu1 }
 0x11c   : > { %v1586_v37 = vadd.f32 %v1547_v30, %v1465_v33  ;;  %v1468_v40 = vadd.f32 %v4856_v23, %v1346_v9  ;;  %v1557_v41 = vpop.f32.mrf.mxu0 }
 0x11d   : > { %v1436_v34 = vpop.f32.mrf.mxu1 }
 0x11e   : > { %v1589_v17 = vadd.f32 %v4872_v35, %v1468_v40  ;;  %v1467_v36 = vadd.f32 %v1436_v34, %v1345_v16  ;;  %v4875_v38 = vpop.f32.mrf.mxu0 }
 0x11f   : > { %v4859_v42 = vpop.f32.mrf.mxu1 }
 0x120   : > { %v1588_v43 = vadd.f32 %v1557_v41, %v1467_v36  ;;  %v1470_v44 = vadd.f32 %v4859_v42, %v1348_v49  ;;  %v1567_v45 = vpop.f32.mrf.mxu0 }
 0x121   : > { %v1446_v11 = vpop.f32.mrf.mxu1 }
 0x122   : > { %v1591_v19 = vadd.f32 %v4875_v38, %v1470_v44  ;;  %v1469_v20 = vadd.f32 %v1446_v11, %v1347_v62  ;;  %v4878_v46 = vpop.f32.mrf.mxu0 }
 0x123   : > { %v4862_v48 = vpop.f32.mrf.mxu1 }
 0x124   : > { %v1590_v6 = vadd.f32 %v1567_v45, %v1469_v20  ;;  %v1472_v28 = vadd.f32 %v4862_v48, %v1350_v24  ;;  %v1577_v50 = vpop.f32.mrf.mxu0 }
 0x125   : > { %v1456_v51 = vpop.f32.mrf.mxu1 }
 0x126   : > { %v1593_v52 = vadd.f32 %v4878_v46, %v1472_v28  ;;  %v1471_v39 = vadd.f32 %v1456_v51, %v1349_v15  ;;  %v4901_v54 = vpop.f32.mrf.mxu0 }
 0x127   : > { %v4885_v55 = vpop.f32.mrf.mxu1 }
 0x128   : > { %v1592_v56 = vadd.f32 %v1577_v50, %v1471_v39  ;;  %v1727_v25 = vadd.f32 %v4885_v55, %v1587_v32  ;;  %v1851_v58 = vpop.f32.mrf.mxu0 }
 0x129   : > { %v1687_v59 = vpop.f32.mrf.mxu1 }
 0x12a   : > { %v1891_v60 = vadd.f32 %v4901_v54, %v1727_v25  ;;  %v1726_v61 = vadd.f32 %v1687_v59, %v1586_v37  ;;  %v4904_v63 = vpop.f32.mrf.mxu0 }
 0x12b   : > { %v4888_v57 = vpop.f32.mrf.mxu1 }
 0x12c   : > { %v1890_v1 = vadd.f32 %v1851_v58, %v1726_v61  ;;  %v1729_v3 = vadd.f32 %v4888_v57, %v1589_v17  ;;  %v1861_v5 = vpop.f32.mrf.mxu0 }
 0x12d   : > { %v1697_v7 = vpop.f32.mrf.mxu1 }
 0x12e   : > { %v1893_v9 = vadd.f32 %v4904_v63, %v1729_v3  ;;  %v1728_v10 = vadd.f32 %v1697_v7, %v1588_v43  ;;  %v4907_v12 = vpop.f32.mrf.mxu0 }
 0x12f   : > { %v4891_v14 = vpop.f32.mrf.mxu1 }
 0x130   : > { %v1892_v16 = vadd.f32 %v1861_v5, %v1728_v10  ;;  %v1731_v13 = vadd.f32 %v4891_v14, %v1591_v19  ;;  %v1871_v2 = vpop.f32.mrf.mxu0 }
 0x131   : > { %v1707_v47 = vpop.f32.mrf.mxu1 }
 0x132   : > { %v1895_v49 = vadd.f32 %v4907_v12, %v1731_v13  ;;  %v1730_v53 = vadd.f32 %v1707_v47, %v1590_v6  ;;  %v4910_v4 = vpop.f32.mrf.mxu0 }
 0x133   : > { %v4894_v8 = vpop.f32.mrf.mxu1 }
 0x134   : > { %v1894_v62 = vadd.f32 %v1871_v2, %v1730_v53  ;;  %v1733_v0 = vadd.f32 %v4894_v8, %v1593_v52  ;;  %v1881_v18 = vpop.f32.mrf.mxu0 }
 0x135   : > { %v1717_v21 = vpop.f32.mrf.mxu1 }
 0x136   : > { %v1897_v24 = vadd.f32 %v4910_v4, %v1733_v0  ;;  %v1732_v22 = vadd.f32 %v1717_v21, %v1592_v56  ;;  %v4933_v26 = vpop.f32.mrf.mxu0 }
 0x137   : > { %v4917_v27 = vpop.f32.mrf.mxu1 }
 0x138   : > { %v1896_v15 = vadd.f32 %v1881_v18, %v1732_v22  ;;  %v2047_v29 = vadd.f32 %v4917_v27, %v1891_v60  ;;  %v2126_v30 = vpop.f32.mrf.mxu0 }
 0x139   : > { %v2007_v31 = vpop.f32.mrf.mxu1 }
 0x13a   : > { %v2166_v32 = vadd.f32 %v4933_v26, %v2047_v29  ;;  %v2046_v33 = vadd.f32 %v2007_v31, %v1890_v1  ;;  %v4936_v35 = vpop.f32.mrf.mxu0 }
 0x13b   : > { %v4920_v23 = vpop.f32.mrf.mxu1 }
 0x13c   : > { %v2165_v37 = vadd.f32 %v2126_v30, %v2046_v33  ;;  %v2049_v40 = vadd.f32 %v4920_v23, %v1893_v9  ;;  %v2136_v41 = vpop.f32.mrf.mxu0 }
 0x13d   : > { %v2017_v34 = vpop.f32.mrf.mxu1 }
 0x13e   : > { %v2168_v17 = vadd.f32 %v4936_v35, %v2049_v40  ;;  %v2048_v36 = vadd.f32 %v2017_v34, %v1892_v16  ;;  %v4939_v38 = vpop.f32.mrf.mxu0 }
 0x13f   : > { %v4923_v42 = vpop.f32.mrf.mxu1 }
 0x140   : > { %v2167_v43 = vadd.f32 %v2136_v41, %v2048_v36  ;;  %v2051_v44 = vadd.f32 %v4923_v42, %v1895_v49  ;;  %v2146_v45 = vpop.f32.mrf.mxu0 }
 0x141   : > { %v2027_v11 = vpop.f32.mrf.mxu1 }
 0x142   : > { %v2170_v19 = vadd.f32 %v4939_v38, %v2051_v44  ;;  %v2050_v20 = vadd.f32 %v2027_v11, %v1894_v62  ;;  %v4942_v46 = vpop.f32.mrf.mxu0 }
 0x143   : > { %v4926_v48 = vpop.f32.mrf.mxu1 }
 0x144   : > { %v2169_v6 = vadd.f32 %v2146_v45, %v2050_v20  ;;  %v2053_v28 = vadd.f32 %v4926_v48, %v1897_v24  ;;  %v2156_v50 = vpop.f32.mrf.mxu0 }
 0x145   : > { %v2037_v51 = vpop.f32.mrf.mxu1 }
 0x146   : > { %v2172_v52 = vadd.f32 %v4942_v46, %v2053_v28  ;;  %v2052_v39 = vadd.f32 %v2037_v51, %v1896_v15  ;;  %v4965_v54 = vpop.f32.mrf.mxu0 }
 0x147   : > { %v4949_v55 = vpop.f32.mrf.mxu1 }
 0x148   : > { %v2171_v56 = vadd.f32 %v2156_v50, %v2052_v39  ;;  %v2288_v25 = vadd.f32 %v4949_v55, %v2166_v32  ;;  %v2369_v58 = vpop.f32.mrf.mxu0 }
 0x149   : > { %v2248_v59 = vpop.f32.mrf.mxu1 }
 0x14a   : > { %v6292_v60 = vadd.f32 %v4965_v54, %v2288_v25  ;;  %v2287_v61 = vadd.f32 %v2248_v59, %v2165_v37  ;;  %v4968_v63 = vpop.f32.mrf.mxu0 }
 0x14b   : > { %v4952_v57 = vpop.f32.mrf.mxu1 }
 0x14c   : > { %v6294_v1 = vadd.f32 %v2369_v58, %v2287_v61  ;;  %v2290_v3 = vadd.f32 %v4952_v57, %v2168_v17  ;;  %v2379_v5 = vpop.f32.mrf.mxu0 }
 0x14d   : > { %v2258_v7 = vpop.f32.mrf.mxu1 }
 0x14e   : > { %v6296_v9 = vadd.f32 %v4968_v63, %v2290_v3  ;;  %v2289_v10 = vadd.f32 %v2258_v7, %v2167_v43  ;;  %v4971_v12 = vpop.f32.mrf.mxu0 }
 0x14f   : > { %v4955_v14 = vpop.f32.mrf.mxu1 }
 0x150   : > { %v6298_v16 = vadd.f32 %v2379_v5, %v2289_v10  ;;  %v2292_v13 = vadd.f32 %v4955_v14, %v2170_v19  ;;  %v2389_v2 = vpop.f32.mrf.mxu0 }
 0x151   : > { %v2268_v47 = vpop.f32.mrf.mxu1 }
 0x152   : > { %v6300_v49 = vadd.f32 %v4971_v12, %v2292_v13  ;;  %v2291_v53 = vadd.f32 %v2268_v47, %v2169_v6  ;;  %v4974_v4 = vpop.f32.mrf.mxu0 }
 0x153   : > { %v4958_v8 = vpop.f32.mrf.mxu1 }
 0x154   : > { %v6302_v62 = vadd.f32 %v2389_v2, %v2291_v53  ;;  %v2294_v0 = vadd.f32 %v4958_v8, %v2172_v52  ;;  %v2399_v18 = vpop.f32.mrf.mxu0 }
 0x155   : > { %v2278_v21 = vpop.f32.mrf.mxu1 }
 0x156   : > { %v6304_v24 = vadd.f32 %v4974_v4, %v2294_v0  ;;  %v2293_v22 = vadd.f32 %v2278_v21, %v2171_v56  ;;  %v4997_v26 = vpop.f32.mrf.mxu0 }
 0x157   : > { %v4981_v27 = vpop.f32.mrf.mxu1 }
 0x158   : > { %v6306_v15 = vadd.f32 %v2399_v18, %v2293_v22  ;;  %v2610_v29 = vpop.f32.mrf.mxu0  ;;  %v2528_v0 = vadd.f32 %v4981_v27, %v6292_v60 }
 0x159   : > { %v2488_v30 = vpop.f32.mrf.mxu1 }
 0x15a   : > { %v6308_v31 = vpop.f32.mrf.mxu0  ;;  %v2527_v22 = vadd.f32 %v2488_v30, %v6294_v1 }
 0x15b   : > { %v4984_v32 = vpop.f32.mrf.mxu1 }
 0x15c   : > { %v6310_v33 = vpop.f32.mrf.mxu0 }
 0x15d   : > { %v2498_v35 = vpop.f32.mrf.mxu1 }
 0x15e   : > { %v6312_v23 = vpop.f32.mrf.mxu0  ;;  %v2529_v27 = vadd.f32 %v2498_v35, %v6298_v16 }
 0x15f   : > { %v4987_v37 = vpop.f32.mrf.mxu1 }
 0x160   : > { %v6314_v40 = vpop.f32.mrf.mxu0  ;;  %v2651_v16 = vadd.f32 %v6310_v33, %v2529_v27 }
 0x161   : > { %v2508_v41 = vpop.f32.mrf.mxu1 }
 0x162   : > { %v6316_v34 = vpop.f32.mrf.mxu0 }
 0x163   : > { %v6318_v17 = vpop.f32.mrf.mxu1 }
 0x164   : > { %v6320_v36 = vpop.f32.mrf.mxu0 }
 0x165   : > { %v6322_v38 = vpop.f32.mrf.mxu1 }
 0x166   : > { %v5029_v42 = vpop.f32.mrf.mxu0 }
 0x167   : > { %v5013_v43 = vpop.f32.mrf.mxu1 }
 0x168   : > { %v2871_v44 = vpop.f32.mrf.mxu0 }
 0x169   : > { %v2731_v45 = vpop.f32.mrf.mxu1 }
 0x16a   : > { %v6324_v11 = vpop.f32.mrf.mxu0 }
 0x16b   : > { %v5016_v19 = vpop.f32.mrf.mxu1 }
 0x16c   : > { %v6326_v20 = vpop.f32.mrf.mxu0 }
 0x16d   : > { %v2741_v46 = vpop.f32.mrf.mxu1 }
 0x16e   : > { %v6328_v48 = vpop.f32.mrf.mxu0 }
 0x16f   : > { %v5019_v6 = vpop.f32.mrf.mxu1 }
 0x170   : > { %v6330_v28 = vpop.f32.mrf.mxu0 }
 0x171   : > { %v6332_v50 = vpop.f32.mrf.mxu1 }
 0x172   : > { %v6334_v51 = vpop.f32.mrf.mxu0 }
 0x173   : > { %v6336_v52 = vpop.f32.mrf.mxu1 }
 0x174   : > { %v6338_v39 = vpop.f32.mrf.mxu0 }
 0x175   : > { %6547 = vst [vmem:[#allocation2_spill] sm:$0xff] %v6338_v39  ;;  %v6340_v54 = vpop.f32.mrf.mxu1 }
 0x176   : > { %v6342_v55 = vpop.f32.mrf.mxu0 }
 0x177   : > { %v5045_v56 = vpop.f32.mrf.mxu1 }
 0x178   : > { %v6344_v25 = vpop.f32.mrf.mxu0 }
 0x179   : > { %v3035_v58 = vpop.f32.mrf.mxu1 }
 0x17a   : > { %v6346_v59 = vpop.f32.mrf.mxu0 }
 0x17b   : > { %v5048_v61 = vpop.f32.mrf.mxu1 }
 0x17c   : > { %v6348_v63 = vpop.f32.mrf.mxu0 }
 0x17d   : > { %v6350_v57 = vpop.f32.mrf.mxu1 }
 0x17e   : > { %v6352_v3 = vpop.f32.mrf.mxu0 }
 0x17f   : > { %6548 = vst [vmem:[#allocation3_spill] sm:$0xff] %v6352_v3  ;;  %v6354_v5 = vpop.f32.mrf.mxu1 }
 0x180   : > { %v6356_v7 = vpop.f32.mrf.mxu0 }
 0x181   : > { %6549 = vst [vmem:[#allocation4_spill] sm:$0xff] %v6356_v7  ;;  %v6358_v10 = vpop.f32.mrf.mxu1  ;;  %v2530_v7 = vadd.f32 %v4984_v32, %v6296_v9  ;;  %v2531_v32 = vadd.f32 %v2508_v41, %v6302_v62 }
 0x182   : > { %v6360_v12 = vpop.f32.mrf.mxu0 }
 0x183   : > { %6550 = vst [vmem:[#allocation5_spill] sm:$0xff] %v6360_v12  ;;  %v6362_v14 = vpop.f32.mrf.mxu1  ;;  %v2652_v30 = vadd.f32 %v6308_v31, %v2530_v7  ;;  %v2534_v7 = vadd.f32 %v6318_v17, %v6304_v24 }
 0x184   : > { %6551 = vst [vmem:[#allocation6_spill] sm:$0xff] %v6362_v14  ;;  %v6364_v13 = vpop.f32.mrf.mxu0 }
 0x185   : > { %6552 = vst [vmem:[#allocation7_spill] sm:$0xff] %v6364_v13  ;;  %v6366_v2 = vpop.f32.mrf.mxu1 }
 0x186   : > { %6553 = vst [vmem:[#allocation8_spill] sm:$0xff] %v6366_v2  ;;  %v6368_v47 = vpop.f32.mrf.mxu0  ;;  %v2650_v2 = vadd.f32 %v4997_v26, %v2528_v0 }
 0x187   : > { %v5077_v53 = vpop.f32.mrf.mxu1 }
 0x188   : > { %v6370_v4 = vpop.f32.mrf.mxu0  ;;  %v2771_v3 = vadd.f32 %v5013_v43, %v2650_v2  ;;  %v2773_v43 = vadd.f32 %v5016_v19, %v2652_v30 }
 0x189   : > { %6554 = vst [vmem:[#allocation9_spill] sm:$0xff] %v6370_v4  ;;  %v6372_v8 = vpop.f32.mrf.mxu1  ;;  %v2649_v4 = vadd.f32 %v2610_v29, %v2527_v22 }
 0x18a   : > { %v6375_v18 = vpop.f32.mrf.mxu0  ;;  %v2911_v29 = vadd.f32 %v5029_v42, %v2771_v3  ;;  %v2653_v42 = vadd.f32 %v6314_v40, %v2531_v32  ;;  %v2913_v33 = vadd.f32 %v6324_v11, %v2773_v43  ;;  %v2656_v40 = vadd.f32 %v6316_v34, %v2534_v7 }
 0x18b   : > { %6555 = vst [vmem:[#allocation10_spill] sm:$0xff] %v6375_v18  ;;  %v6377_v21 = vpop.f32.mrf.mxu1  ;;  %v2532_v18 = vadd.f32 %v4987_v37, %v6300_v49 }
 0x18c   : > { %v6380_v12 = vpop.f32.mrf.mxu0  ;;  %v3075_v37 = vadd.f32 %v5045_v56, %v2911_v29  ;;  %v2774_v24 = vadd.f32 %v6332_v50, %v2653_v42  ;;  %v2777_v34 = vadd.f32 %v6336_v52, %v2656_v40 }
 0x18d   : > { %6556 = vst [vmem:[#allocation11_spill] sm:$0xff] %v6380_v12  ;;  %v6382_v13 = vpop.f32.mrf.mxu1  ;;  %v2770_v12 = vadd.f32 %v2731_v45, %v2649_v4  ;;  %v2654_v49 = vadd.f32 %v6312_v23, %v2532_v18  ;;  %v2772_v4 = vadd.f32 %v2741_v46, %v2651_v16  ;;  %v3077_v46 = vadd.f32 %v5048_v61, %v2913_v33  ;;  %v6560_v16 = vld [vmem:[#allocation6_spill] sm:$0xff] }
 0x18e   : > { %v6385_v14 = vpop.f32.mrf.mxu0  ;;  %v3231_v17 = vadd.f32 %v6342_v55, %v3075_v37  ;;  %v2914_v61 = vadd.f32 %v6330_v28, %v2774_v24  ;;  %v2917_v28 = vadd.f32 %v6334_v51, %v2777_v34  ;;  %v6561_v51 = vld [vmem:[#allocation4_spill] sm:$0xff]  ;;  %v6566_v34 = vld [vmem:[#allocation7_spill] sm:$0xff] }
 0x18f   : > { %v6387_v39 = vpop.f32.mrf.mxu1  ;;  %v2910_v31 = vadd.f32 %v2871_v44, %v2770_v12  ;;  %v2775_v62 = vadd.f32 %v5019_v6, %v2654_v49  ;;  %v2533_v44 = vadd.f32 %v6322_v38, %v6306_v15  ;;  %v2912_v11 = vadd.f32 %v6326_v20, %v2772_v4 }
 0x190   : > { %v6389_v60 = vpop.f32.mrf.mxu0  ;;  %v3350_v38 = vadd.f32 %v5077_v53, %v3231_v17  ;;  %v6558_v32 = vld [vmem:[#allocation9_spill] sm:$0xff] }
 0x191   : > { %v6393_v1 = vpop.f32.mrf.mxu1  ;;  %v3074_v23 = vadd.f32 %v3035_v58, %v2910_v31  ;;  %v2915_v58 = vadd.f32 %v6328_v48, %v2775_v62  ;;  %v2655_v50 = vadd.f32 %v6320_v36, %v2533_v44  ;;  %v3076_v20 = vadd.f32 %v6350_v57, %v2912_v11 }
 0x192   : > { %v6396_v26 = vpop.f32.mrf.mxu0  ;;  %v3078_v36 = vadd.f32 %v6358_v10, %v2914_v61  ;;  %v3472_v27 = vadd.f32 %v6368_v47, %v3350_v38  ;;  %v6559_v10 = vld [vmem:[#allocation2_spill] sm:$0xff] }
 0x193   : > { %v6398_v9 = vpop.f32.mrf.mxu1  ;;  %v3230_v15 = vadd.f32 %v6344_v25, %v3074_v23  ;;  %v3079_v48 = vadd.f32 %v6354_v5, %v2915_v58  ;;  %v3233_v25 = vadd.f32 %v6346_v59, %v3077_v46  ;;  %v2776_v18 = vadd.f32 %v6340_v54, %v2655_v50  ;;  %v6557_v5 = vld [vmem:[#allocation3_spill] sm:$0xff]  ;;  %v6562_v7 = vld [vmem:[#allocation10_spill] sm:$0xff] }
 0x194   : > { %v6401_v2 = vpop.f32.mrf.mxu0  ;;  %v3232_v59 = vadd.f32 %v6348_v63, %v3076_v20  ;;  %v3234_v63 = vadd.f32 %v6561_v51, %v3078_v36  ;;  %v6565_v40 = vld [vmem:[#allocation11_spill] sm:$0xff] }
 0x195   : > { %v6405_v35 = vpop.f32.mrf.mxu1  ;;  %v3349_v53 = vadd.f32 %v6372_v8, %v3230_v15  ;;  %v3352_v52 = vadd.f32 %v6377_v21, %v3233_v25  ;;  %v3235_v8 = vadd.f32 %v6557_v5, %v3079_v48  ;;  %v2916_v47 = vadd.f32 %v6559_v10, %v2776_v18 }
 0x196   : > { %v6407_v45 = vpop.f32.mrf.mxu0  ;;  %v3081_v21 = vadd.f32 %v6560_v16, %v2917_v28  ;;  %v3351_v49 = vadd.f32 %v6382_v13, %v3232_v59  ;;  %v3353_v44 = vadd.f32 %v6393_v1, %v3234_v63 }
 0x197   : > { %v5109_v41 = vpop.f32.mrf.mxu1  ;;  %v3471_v54 = vadd.f32 %v6558_v32, %v3349_v53  ;;  %v3354_v31 = vadd.f32 %v6387_v39, %v3235_v8  ;;  %v3474_v4 = vadd.f32 %v6562_v7, %v3352_v52  ;;  %v6564_v39 = vld [vmem:[#allocation5_spill] sm:$0xff] }
 0x198   : > { %v3672_v19 = vpop.f32.mrf.mxu0  ;;  %v3593_v29 = vadd.f32 %v5109_v41, %v3472_v27  ;;  %v6563_v41 = vld [vmem:[#allocation8_spill] sm:$0xff]  ;;  %v3237_v46 = vadd.f32 %v6564_v39, %v3081_v21  ;;  %v3473_v11 = vadd.f32 %v6565_v40, %v3351_v49 }
 0x199   : > { %v3553_v56 = vpop.f32.mrf.mxu1  ;;  %v3080_v33 = vadd.f32 %v6563_v41, %v2916_v47  ;;  %v3476_v58 = vadd.f32 %v6385_v14, %v3354_v31  ;;  %v3475_v14 = vadd.f32 %v6389_v60, %v3353_v44 }
 0x19a   : > { %v6419_v6 = vpop.f32.mrf.mxu0  ;;  %v3592_v62 = vadd.f32 %v3553_v56, %v3471_v54  ;;  %v3712_v24 = vadd.f32 %v6407_v45, %v3593_v29  ;;  %v3356_v1 = vadd.f32 %v6398_v9, %v3237_v46 }
 0x19b   : > { %v5112_v3 = vpop.f32.mrf.mxu1  ;;  %v3236_v20 = vadd.f32 %v6566_v34, %v3080_v33 }
 0x19c   : > { %v6430_v12 = vpop.f32.mrf.mxu0  ;;  %v3595_v17 = vadd.f32 %v5112_v3, %v3474_v4  ;;  %v3711_v56 = vadd.f32 %v3672_v19, %v3592_v62  ;;  %v3478_v28 = vadd.f32 %v6396_v26, %v3356_v1 }
 0x19d   : > { %v3563_v55 = vpop.f32.mrf.mxu1  ;;  %v3355_v18 = vadd.f32 %v6405_v35, %v3236_v20 }
 0x19e   : > { %v5131_v0 = vpop.f32.mrf.mxu0  ;;  %v3594_v48 = vadd.f32 %v3563_v55, %v3473_v11  ;;  %v3714_v19 = vadd.f32 %v6419_v6, %v3595_v17 }
 0x19f   : > { %v5115_v22 = vpop.f32.mrf.mxu1  ;;  %v3477_v54 = vadd.f32 %v6401_v2, %v3355_v18 }
 0x1a0   : > { %v6448_v57 = vpop.f32.mrf.mxu0  ;;  %v3597_v45 = vadd.f32 %v5115_v22, %v3476_v58  ;;  %v3713_v60 = vadd.f32 %v6430_v12, %v3594_v48 }
 0x1a1   : > { %v3573_v30 = vpop.f32.mrf.mxu1 }
 0x1a2   : > { %v6456_v43 = vpop.f32.mrf.mxu0  ;;  %v3596_v55 = vadd.f32 %v3573_v30, %v3475_v14  ;;  %v3716_v59 = vadd.f32 %v5131_v0, %v3597_v45 }
 0x1a3   : > { %v5118_v37 = vpop.f32.mrf.mxu1 }
 0x1a4   : > { %v6464_v42 = vpop.f32.mrf.mxu0  ;;  %v3599_v29 = vadd.f32 %v5118_v37, %v3478_v28  ;;  %v3715_v12 = vadd.f32 %v6448_v57, %v3596_v55 }
 0x1a5   : > { %v3583_v23 = vpop.f32.mrf.mxu1 }
 0x1a6   : > { %v5157_v13 = vpop.f32.mrf.mxu0  ;;  %v3598_v31 = vadd.f32 %v3583_v23, %v3477_v54  ;;  %v3718_v62 = vadd.f32 %v6456_v43, %v3599_v29 }
 0x1a7   : > { %v5141_v15 = vpop.f32.mrf.mxu1 }
 0x1a8   : > { %v3834_v38 = vadd.f32 %v5141_v15, %v3712_v24  ;;  %v3915_v50 = vpop.f32.mrf.mxu0  ;;  %v3717_v17 = vadd.f32 %v6464_v42, %v3598_v31 }
 0x1a9   : > { %v3794_v3 = vpop.f32.mrf.mxu1 }
 0x1aa   : > { %v3955_v61 = vadd.f32 %v5157_v13, %v3834_v38  ;;  %v3833_v25 = vadd.f32 %v3794_v3, %v3711_v56  ;;  %v5160_v53 = vpop.f32.mrf.mxu0 }
 0x1ab   : > { %v5144_v9 = vpop.f32.mrf.mxu1 }
 0x1ac   : > { %3964 = vst.msk [vmem:[%s6477_s13 + $0x8] sm:$0xff] %vm3962_vm3, %v3955_v61  ;;  %v3993_v22 = vmul.f32 %v3955_v61, %v3955_v61  ;;  %v3954_v36 = vadd.f32 %v3915_v50, %v3833_v25  ;;  %v3836_v27 = vadd.f32 %v5144_v9, %v3714_v19  ;;  %v3925_v52 = vpop.f32.mrf.mxu0  ;;  %v3972_v5 = vsel %vm3962_vm3, %v3955_v61, 0.0 }
 0x1ad   : > { %v3804_v6 = vpop.f32.mrf.mxu1 }
 0x1ae   : > { %3963 = vst.msk [vmem:[%s6477_s13] sm:$0xff] %vm3962_vm3, %v3954_v36  ;;  %v3971_v35 = vsel %vm3962_vm3, %v3954_v36, 0.0  ;;  %v3992_v8 = vmul.f32 %v3954_v36, %v3954_v36  ;;  %v3957_v30 = vadd.f32 %v5160_v53, %v3836_v27  ;;  %v5163_v32 = vpop.f32.mrf.mxu0  ;;  %v3835_v47 = vadd.f32 %v3804_v6, %v3713_v60 }
 0x1af   : > { %v3973_v10 = vadd.f32 %v3972_v5, %v3971_v35  ;;  %v5147_v26 = vpop.f32.mrf.mxu1  ;;  %v4001_v0 = vsel %vm3962_vm3, %v3993_v22, 0.0 }
 0x1b0   : > { %v4000_v16 = vsel %vm3962_vm3, %v3992_v8, 0.0  ;;  %3966 = vst.msk [vmem:[%s6477_s13 + $0x18] sm:$0xff] %vm3962_vm3, %v3957_v30  ;;  %v3838_v21 = vadd.f32 %v5147_v26, %v3716_v59  ;;  %v3935_v49 = vpop.f32.mrf.mxu0  ;;  %v3956_v63 = vadd.f32 %v3925_v52, %v3835_v47  ;;  %v3995_v37 = vmul.f32 %v3957_v30, %v3957_v30 }
 0x1b1   : > { %v4002_v51 = vadd.f32 %v4001_v0, %v4000_v16  ;;  %v3814_v2 = vpop.f32.mrf.mxu1  ;;  %v3976_v13 = vsel %vm3962_vm3, %v3957_v30, 0.0 }
 0x1b2   : > { %v3959_v7 = vadd.f32 %v5163_v32, %v3838_v21  ;;  %v3837_v4 = vadd.f32 %v3814_v2, %v3715_v12  ;;  %3965 = vst.msk [vmem:[%s6477_s13 + $0x10] sm:$0xff] %vm3962_vm3, %v3956_v63  ;;  %v3974_v57 = vsel %vm3962_vm3, %v3956_v63, 0.0  ;;  %v3994_v41 = vmul.f32 %v3956_v63, %v3956_v63  ;;  %v5166_v23 = vpop.f32.mrf.mxu0 }
 0x1b3   : > { %v5150_v33 = vpop.f32.mrf.mxu1  ;;  %v3975_v44 = vadd.f32 %v3974_v57, %v3973_v10  ;;  %v4005_v40 = vsel %vm3962_vm3, %v3995_v37, 0.0 }
 0x1b4   : > { %3968 = vst.msk [vmem:[%s6477_s13 + $0x28] sm:$0xff] %vm3962_vm3, %v3959_v7  ;;  %v3958_v24 = vadd.f32 %v3935_v49, %v3837_v4  ;;  %v4003_v39 = vsel %vm3962_vm3, %v3994_v41, 0.0  ;;  %v3840_v46 = vadd.f32 %v5150_v33, %v3718_v62  ;;  %v3997_v56 = vmul.f32 %v3959_v7, %v3959_v7  ;;  %v3945_v1 = vpop.f32.mrf.mxu0 }
 0x1b5   : > { %v3824_v43 = vpop.f32.mrf.mxu1  ;;  %v4004_v11 = vadd.f32 %v4003_v39, %v4002_v51  ;;  %v3977_v58 = vadd.f32 %v3976_v13, %v3975_v44  ;;  %v3980_v48 = vsel %vm3962_vm3, %v3959_v7, 0.0 }
 0x1b6   : > { %3967 = vst.msk [vmem:[%s6477_s13 + $0x20] sm:$0xff] %vm3962_vm3, %v3958_v24  ;;  %v3978_v15 = vsel %vm3962_vm3, %v3958_v24, 0.0  ;;  %v3996_v38 = vmul.f32 %v3958_v24, %v3958_v24  ;;  %v3961_v50 = vadd.f32 %v5166_v23, %v3840_v46  ;;  %v3839_v42 = vadd.f32 %v3824_v43, %v3717_v17 }
 0x1b7   : > { %v3979_v34 = vadd.f32 %v3978_v15, %v3977_v58  ;;  %v4006_v20 = vadd.f32 %v4005_v40, %v4004_v11  ;;  %v4009_v61 = vsel %vm3962_vm3, %v3997_v56, 0.0 }
 0x1b8   : > { %v4007_v45 = vsel %vm3962_vm3, %v3996_v38, 0.0  ;;  %3970 = vst.msk [vmem:[%s6477_s13 + $0x38] sm:$0xff] %vm3962_vm3, %v3961_v50  ;;  %v3960_v3 = vadd.f32 %v3945_v1, %v3839_v42  ;;  %v3999_v25 = vmul.f32 %v3961_v50, %v3961_v50  ;;  %v3984_v22 = vsel %vm3962_vm3, %v3961_v50, 0.0 }
 0x1b9   : > { %v4008_v14 = vadd.f32 %v4007_v45, %v4006_v20  ;;  %v3981_v19 = vadd.f32 %v3980_v48, %v3979_v34 }
 0x1ba   : > { %3969 = vst.msk [vmem:[%s6477_s13 + $0x30] sm:$0xff] %vm3962_vm3, %v3960_v3  ;;  %v3982_v53 = vsel %vm3962_vm3, %v3960_v3, 0.0  ;;  %v3998_v18 = vmul.f32 %v3960_v3, %v3960_v3  ;;  %v4013_v28 = vsel %vm3962_vm3, %v3999_v25, 0.0 }
 0x1bb   : > { %v3983_v9 = vadd.f32 %v3982_v53, %v3981_v19  ;;  %v4010_v55 = vadd.f32 %v4009_v61, %v4008_v14 }
 0x1bc   : > { %v4011_v36 = vsel %vm3962_vm3, %v3998_v18, 0.0 }
 0x1bd   : > { %v3985_v27 = vadd.f32 %v3984_v22, %v3983_v9  ;;  %v4012_v52 = vadd.f32 %v4011_v36, %v4010_v55 }
 0x1bf   : > { %v3986_v60 = vrot.slane %v3985_v27, 4  ;;  %v4014_v59 = vadd.f32 %v4013_v28, %v4012_v52 }
 0x1c1   : > { %v3987_v6 = vadd.f32 %v3986_v60, %v3985_v27  ;;  %v4015_v5 = vrot.slane %v4014_v59, 4 }
 0x1c3   : > { %v3988_v35 = vrot.slane %v3987_v6, 2  ;;  %v4016_v8 = vadd.f32 %v4015_v5, %v4014_v59 }
 0x1c5   : > { %v3989_v30 = vadd.f32 %v3988_v35, %v3987_v6  ;;  %v4017_v32 = vrot.slane %v4016_v8, 2 }
 0x1c7   : > { %v3990_v54 = vrot.slane %v3989_v30, 1  ;;  %v4018_v29 = vadd.f32 %v4017_v32, %v4016_v8 }
 0x1c9   : > { %v4019_v10 = vrot.slane %v4018_v29, 1  ;;  %v3991_v47 = vadd.f32 %v3990_v54, %v3989_v30 }
 0x1cb   : > { %v4020_v26 = vadd.f32 %v4019_v10, %v4018_v29 }
 0x1cd   : > { %v4022_v12 = vsel %vm4021_vm4, %v3991_v47, %v4020_v26 }
 0x1ce   : > { %4024 = vst.msk [vmem:[%s363_s7] sm:$0x3] %vm4023_vm5, %v4022_v12 }
 0x1cf PF: > { %s16_s22 = sadd.s32 1, %s5252_s22   ;;  %s6567_s18 = smov %s5244_s20 }
 0x1d0   : > { %p13_p10 = scmp.ge.s32.totalorder %s16_s22, 18   ;;  %s6568_s19 = smov %s5248_s21 }
 0x1d1   : > { %s6569_s20 = smov %s6572_s23  ;;  %s6570_s21 = smov %s6576_s24 }
 0x1d2   :  { %15 = sbr.rel (!%p13_p10) target bundleno = 3 (0x3), region = 110 }

</bundles_post_ra>
